<compile_context>
chip_gen: v5e
topology: v5e:2x2
jax: 0.10.0
libtpu: 0.0.40
codegen_flags: <defaults>
</compile_context>

<pallas_src>
import math

import numpy as np
import jax
import jax.numpy as jnp
from jax import lax
from jax.experimental import pallas as pl
from jax.experimental.pallas import tpu as pltpu

# ---------------- configuration (small, deterministic) ----------------
B = 2            # batch
S_LEN = 12       # src_len
T_LEN = 8        # trg_len (trg with <eos> removed)
EMB = 32         # emb_dim
HID = 32         # hid_dim
K = 3            # conv kernel size (odd)
N_LAYERS = 2     # conv layers in encoder and decoder
IN_VOCAB = 37    # encoder vocab
OUT_VOCAB = 41   # decoder vocab
VOCAB_PAD = 128  # lane-dense padded output vocab
MAX_LEN = 50     # positional-embedding table size
SCALE = math.sqrt(0.5)

assert EMB == HID  # the packed [5, 32, 32] projection slab relies on E == H

# packed embedding/positional table row offsets
DEC_TOK_OFF = IN_VOCAB                       # 37
POS_SRC_OFF = IN_VOCAB + OUT_VOCAB           # 78
POS_TRG_OFF = POS_SRC_OFF + S_LEN            # 90
TAB_ROWS = POS_TRG_OFF + T_LEN               # 98

# indices into the packed projection-weight slab
P_ENC_E2H, P_ENC_H2E, P_DEC_E2H, P_DEC_AH2E, P_DEC_AE2H = range(5)

# rows of the packed bias slab
B_ENC_E2H, B_ENC_H2E, B_DEC_E2H, B_DEC_AH2E, B_DEC_AE2H = range(5)
B_CONV = 5                       # enc layers [5, 5+L), dec layers [5+L, 5+2L)
B_FC = B_CONV + 2 * N_LAYERS     # composed final-projection bias (128-wide)
BIAS_ROWS = B_FC + 1

# TODO(synk): the predict_flag=True branch (host-side greedy decode loop using
# .item() and Python list append) has no clean single-kernel equivalent; only
# the predict_flag=False forward (output, attention) is implemented.


# ---------------- fused embedding + encoder + decoder kernel ----------------
def seq2seq_kernel(src_ref, trg_ref, emb_tab_ref,
                   proj_w_ref, conv_w_ref, fc_w_ref, bias_ref,
                   out_ref):
    f32 = jnp.float32
    bf16 = jnp.bfloat16

    def mm(x, w):
        # bf16 into the MXU, f32 accumulation (weights are already bf16)
        return jnp.dot(x.astype(bf16), w, preferred_element_type=f32)

    bias = bias_ref[...]                     # [BIAS_ROWS, 128] f32
    emb_tab = emb_tab_ref[...]               # [TAB_ROWS, EMB]  f32
    ids_src = src_ref[...]                   # [S, B] int32 (ids on sublanes)
    ids_trg = trg_ref[...]                   # [T, B] int32

    b_enc_e2h = bias[B_ENC_E2H:B_ENC_E2H + 1, :HID]
    b_enc_h2e = bias[B_ENC_H2E:B_ENC_H2E + 1, :EMB]
    b_dec_e2h = bias[B_DEC_E2H:B_DEC_E2H + 1, :HID]
    b_dec_ah2e = bias[B_DEC_AH2E:B_DEC_AH2E + 1, :EMB]
    b_dec_ae2h = bias[B_DEC_AE2H:B_DEC_AE2H + 1, :HID]
    b_fc = bias[B_FC:B_FC + 1, :]            # [1, 128]

    pad = (K - 1) // 2
    zpad = jnp.zeros((pad, HID), f32)
    zcaus = jnp.zeros((K - 1, HID), f32)

    for b in range(B):                       # static batch loop (single grid step)
        # ---- embeddings: exact one-hot matmul (tok row + pos row per position)
        sid = ids_src[:, b:b + 1]                                          # [S, 1]
        col_s = lax.broadcasted_iota(jnp.int32, (S_LEN, TAB_ROWS), 1)
        row_s = lax.broadcasted_iota(jnp.int32, (S_LEN, TAB_ROWS), 0)
        oh_src = ((col_s == sid) | (col_s == row_s + POS_SRC_OFF)).astype(f32)
        e_src = jnp.dot(oh_src, emb_tab, preferred_element_type=f32)       # [S, E]

        tid = ids_trg[:, b:b + 1]                                          # [T, 1]
        col_t = lax.broadcasted_iota(jnp.int32, (T_LEN, TAB_ROWS), 1)
        row_t = lax.broadcasted_iota(jnp.int32, (T_LEN, TAB_ROWS), 0)
        oh_trg = ((col_t == tid + DEC_TOK_OFF)
                  | (col_t == row_t + POS_TRG_OFF)).astype(f32)
        e_trg = jnp.dot(oh_trg, emb_tab, preferred_element_type=f32)       # [T, E]

        # ---- encoder ----
        x = mm(e_src, proj_w_ref[P_ENC_E2H]) + b_enc_e2h                   # [S, H]
        for l in range(N_LAYERS):
            # "same"-padded conv: K per-tap matmuls accumulated in f32
            xp = jnp.concatenate([zpad, x, zpad], axis=0)                  # [S+K-1, H]
            ag = bias[B_CONV + l:B_CONV + l + 1, :2 * HID]                 # [1, 2H]
            for k in range(K):
                ag = ag + mm(xp[k:k + S_LEN], conv_w_ref[l, k])            # [S, 2H]
            glu = ag[:, :HID] * jax.nn.sigmoid(ag[:, HID:])                # GLU
            x = (glu + x) * SCALE                                          # residual
        enc_conved = mm(x, proj_w_ref[P_ENC_H2E]) + b_enc_h2e              # [S, E]
        enc_combined = (enc_conved + e_src) * SCALE                        # [S, E]
        enc_conved_b = enc_conved.astype(bf16)
        enc_combined_b = enc_combined.astype(bf16)

        # ---- decoder ----
        x = mm(e_trg, proj_w_ref[P_DEC_E2H]) + b_dec_e2h                   # [T, H]
        attn = None
        for l in range(N_LAYERS):
            # causal (left-padded) conv, K per-tap matmuls accumulated
            xp = jnp.concatenate([zcaus, x], axis=0)                       # [T+K-1, H]
            ag = bias[B_CONV + N_LAYERS + l:B_CONV + N_LAYERS + l + 1, :2 * HID]
            for k in range(K):
                ag = ag + mm(xp[k:k + T_LEN], conv_w_ref[N_LAYERS + l, k])
            glu = ag[:, :HID] * jax.nn.sigmoid(ag[:, HID:])                # [T, H]

            # attention (energy contracts last dims -> no transposed input)
            ce = mm(glu, proj_w_ref[P_DEC_AH2E]) + b_dec_ah2e              # [T, E]
            comb = (ce + e_trg) * SCALE                                    # [T, E]
            energy = lax.dot_general(comb.astype(bf16), enc_conved_b,
                                     dimension_numbers=(((1,), (1,)), ((), ())),
                                     preferred_element_type=f32)           # [T, S]
            energy = energy - jnp.max(energy, axis=-1, keepdims=True)
            pexp = jnp.exp(energy)
            attn = pexp * (1.0 / jnp.sum(pexp, axis=-1, keepdims=True))    # exact
            att_enc = mm(attn, enc_combined_b)                             # [T, E]
            att_enc = mm(att_enc, proj_w_ref[P_DEC_AE2H]) + b_dec_ae2h     # [T, H]
            att_comb = (glu + att_enc) * SCALE
            x = (att_comb + x) * SCALE                                     # residual

        # composed (dec_h2e @ fc) projection -> padded logits [T, 128]
        logits = mm(x, fc_w_ref[...]) + b_fc
        # single lane-dense output slab: [logits(128) | attn(12) | zeros(116)]
        packed_row = jnp.concatenate(
            [logits, attn, jnp.zeros((T_LEN, VOCAB_PAD - S_LEN), f32)], axis=1)
        out_ref[b] = packed_row                                            # [T, 256]


# ---------------- pallas_call wrapper ----------------
def _const_spec(shape):
    nd = len(shape)
    return pl.BlockSpec(tuple(shape), lambda i, nd=nd: (0,) * nd)


def run_seq2seq(src_ids_t, trg_ids_t, packed):
    in_arrays = [src_ids_t, trg_ids_t,
                 packed['emb_tab'], packed['proj_w'],
                 packed['conv_w'], packed['fc_w'], packed['bias']]
    in_specs = [_const_spec(a.shape) for a in in_arrays]
    out_shape = jax.ShapeDtypeStruct((B, T_LEN, 2 * VOCAB_PAD), jnp.float32)
    out_specs = _const_spec((B, T_LEN, 2 * VOCAB_PAD))
    return pl.pallas_call(
        seq2seq_kernel,
        grid=(1,),
        in_specs=in_specs,
        out_specs=out_specs,
        out_shape=out_shape,
        compiler_params=pltpu.CompilerParams(dimension_semantics=("arbitrary",)),
    )(*in_arrays)


@jax.jit
def seq2seq_forward(src_tokens, trg_tokens, packed):
    """predict_flag=False branch: returns (output, attention). Dropout = 0 (eval)."""
    out = run_seq2seq(src_tokens.T.astype(jnp.int32),
                      trg_tokens.T.astype(jnp.int32), packed)
    logits = out[..., :OUT_VOCAB]
    attention = out[..., VOCAB_PAD:VOCAB_PAD + S_LEN]
    return logits, attention


# ---------------- parameter init & packing ----------------
def init_params(key):
    keys = jax.random.split(key, 32)
    it = iter(keys)

    def w(shape, scale=0.1):
        return (scale * jax.random.normal(next(it), shape)).astype(jnp.float32)

    p = {}
    # encoder
    p['enc_tok_emb'] = w((IN_VOCAB, EMB))
    p['enc_pos_emb'] = w((MAX_LEN, EMB))
    p['enc_w_e2h'] = w((EMB, HID)); p['enc_b_e2h'] = w((1, HID), 0.02)
    p['enc_cwa'] = w((N_LAYERS, K, HID, HID)); p['enc_cba'] = w((N_LAYERS, 1, HID), 0.02)
    p['enc_cwb'] = w((N_LAYERS, K, HID, HID)); p['enc_cbb'] = w((N_LAYERS, 1, HID), 0.02)
    p['enc_w_h2e'] = w((HID, EMB)); p['enc_b_h2e'] = w((1, EMB), 0.02)
    # decoder
    p['dec_tok_emb'] = w((OUT_VOCAB, EMB))
    p['dec_pos_emb'] = w((MAX_LEN, EMB))
    p['dec_w_e2h'] = w((EMB, HID)); p['dec_b_e2h'] = w((1, HID), 0.02)
    p['dec_cwa'] = w((N_LAYERS, K, HID, HID)); p['dec_cba'] = w((N_LAYERS, 1, HID), 0.02)
    p['dec_cwb'] = w((N_LAYERS, K, HID, HID)); p['dec_cbb'] = w((N_LAYERS, 1, HID), 0.02)
    p['dec_w_ah2e'] = w((HID, EMB)); p['dec_b_ah2e'] = w((1, EMB), 0.02)
    p['dec_w_ae2h'] = w((EMB, HID)); p['dec_b_ae2h'] = w((1, HID), 0.02)
    p['dec_w_h2e'] = w((HID, EMB)); p['dec_b_h2e'] = w((1, EMB), 0.02)
    p['dec_w_fc'] = w((EMB, OUT_VOCAB)); p['dec_b_fc'] = w((1, OUT_VOCAB), 0.02)
    return p


def pack_params(p):
    """Pack weights into a few contiguous slabs (bf16 MXU weights, f32 biases)."""
    # projection slab [5, 32, 32] bf16
    proj_w = jnp.stack([p['enc_w_e2h'], p['enc_w_h2e'],
                        p['dec_w_e2h'], p['dec_w_ah2e'],
                        p['dec_w_ae2h']]).astype(jnp.bfloat16)

    # conv slab [2L, K, H, 2H] bf16 (a/g branches packed along the output dim)
    enc_w = jnp.concatenate([p['enc_cwa'], p['enc_cwb']], axis=-1)
    dec_w = jnp.concatenate([p['dec_cwa'], p['dec_cwb']], axis=-1)
    conv_w = jnp.concatenate([enc_w, dec_w], axis=0).astype(jnp.bfloat16)

    # final projection precomposed with FC (f32 compose, single bf16 cast)
    w_comp = p['dec_w_h2e'] @ p['dec_w_fc']                      # [H, OUT_VOCAB] f32
    b_comp = p['dec_b_h2e'] @ p['dec_w_fc'] + p['dec_b_fc']      # [1, OUT_VOCAB] f32
    fc_w = jnp.zeros((EMB, VOCAB_PAD), jnp.float32).at[:, :OUT_VOCAB].set(w_comp)
    fc_w = fc_w.astype(jnp.bfloat16)

    # packed embedding/positional table [98, 32] f32
    emb_tab = jnp.concatenate([p['enc_tok_emb'], p['dec_tok_emb'],
                               p['enc_pos_emb'][:S_LEN],
                               p['dec_pos_emb'][:T_LEN]], axis=0)

    # single bias slab [10, 128] f32
    def row(v, width):
        return jnp.zeros((1, 128), jnp.float32).at[:, :width].set(v)

    bias_rows = [row(p['enc_b_e2h'], HID), row(p['enc_b_h2e'], EMB),
                 row(p['dec_b_e2h'], HID), row(p['dec_b_ah2e'], EMB),
                 row(p['dec_b_ae2h'], HID)]
    for l in range(N_LAYERS):
        bias_rows.append(row(jnp.concatenate([p['enc_cba'][l], p['enc_cbb'][l]], -1),
                             2 * HID))
    for l in range(N_LAYERS):
        bias_rows.append(row(jnp.concatenate([p['dec_cba'][l], p['dec_cbb'][l]], -1),
                             2 * HID))
    bias_rows.append(row(b_comp, OUT_VOCAB))
    bias = jnp.concatenate(bias_rows, axis=0)                    # [10, 128]

    return {'emb_tab': emb_tab, 'proj_w': proj_w, 'conv_w': conv_w,
            'fc_w': fc_w, 'bias': bias}


# ---------------- pure-JAX reference (for correctness check) ----------------
def ref_forward(src_tokens, trg_tokens, p):
    emb_src = p['enc_tok_emb'][src_tokens] + p['enc_pos_emb'][:S_LEN][None]
    x = emb_src @ p['enc_w_e2h'] + p['enc_b_e2h']
    pad = (K - 1) // 2
    for l in range(N_LAYERS):
        xp = jnp.pad(x, ((0, 0), (pad, pad), (0, 0)))
        a = sum(xp[:, k:k + S_LEN] @ p['enc_cwa'][l, k] for k in range(K)) + p['enc_cba'][l]
        g = sum(xp[:, k:k + S_LEN] @ p['enc_cwb'][l, k] for k in range(K)) + p['enc_cbb'][l]
        x = (a * jax.nn.sigmoid(g) + x) * SCALE
    enc_conved = x @ p['enc_w_h2e'] + p['enc_b_h2e']
    enc_combined = (enc_conved + emb_src) * SCALE

    emb_trg = p['dec_tok_emb'][trg_tokens] + p['dec_pos_emb'][:T_LEN][None]
    x = emb_trg @ p['dec_w_e2h'] + p['dec_b_e2h']
    attn = None
    for l in range(N_LAYERS):
        xp = jnp.pad(x, ((0, 0), (K - 1, 0), (0, 0)))
        a = sum(xp[:, k:k + T_LEN] @ p['dec_cwa'][l, k] for k in range(K)) + p['dec_cba'][l]
        g = sum(xp[:, k:k + T_LEN] @ p['dec_cwb'][l, k] for k in range(K)) + p['dec_cbb'][l]
        glu = a * jax.nn.sigmoid(g)
        ce = glu @ p['dec_w_ah2e'] + p['dec_b_ah2e']
        comb = (ce + emb_trg) * SCALE
        energy = jnp.einsum('bte,bse->bts', comb, enc_conved)
        attn = jax.nn.softmax(energy, axis=-1)
        att_enc = jnp.einsum('bts,bse->bte', attn, enc_combined)
        att_enc = att_enc @ p['dec_w_ae2h'] + p['dec_b_ae2h']
        att_comb = (glu + att_enc) * SCALE
        x = (att_comb + x) * SCALE
    conved = x @ p['dec_w_h2e'] + p['dec_b_h2e']
    out = conved @ p['dec_w_fc'] + p['dec_b_fc']
    return out, attn


if __name__ == "__main__":
    key = jax.random.PRNGKey(0)
    pkey, skey, tkey = jax.random.split(key, 3)
    params = init_params(pkey)
    packed = pack_params(params)
    src = jax.random.randint(skey, (B, S_LEN), 0, IN_VOCAB)   # [batch, src_len]
    trg = jax.random.randint(tkey, (B, T_LEN), 0, OUT_VOCAB)  # [batch, trg_len-1]

    output, attention = seq2seq_forward(src, trg, packed)
    jax.block_until_ready((output, attention))

    assert output.shape == (B, T_LEN, OUT_VOCAB)
    assert attention.shape == (B, T_LEN, S_LEN)

    ref_out, ref_attn = ref_forward(src, trg, params)
    # tolerance sized for bf16 MXU inputs (embeddings/softmax are exact f32)
    np.testing.assert_allclose(np.asarray(output), np.asarray(ref_out),
                               rtol=2e-2, atol=5e-3)
    np.testing.assert_allclose(np.asarray(attention), np.asarray(ref_attn),
                               rtol=2e-2, atol=5e-3)
    print("KERNEL_OK")
</pallas_src>

<mosaic_0001>
module attributes {stable_mosaic.version = 11 : i64} {
  func.func @seq2seq_kernel(%arg0: i32, %arg1: memref<12x2xi32, #tpu.memory_space<vmem>>, %arg2: memref<8x2xi32, #tpu.memory_space<vmem>>, %arg3: memref<98x32xf32, #tpu.memory_space<vmem>>, %arg4: memref<5x32x32xbf16, #tpu.memory_space<vmem>>, %arg5: memref<4x3x32x64xbf16, #tpu.memory_space<vmem>>, %arg6: memref<32x128xbf16, #tpu.memory_space<vmem>>, %arg7: memref<10x128xf32, #tpu.memory_space<vmem>>, %arg8: memref<2x8x256xf32, #tpu.memory_space<vmem>>) attributes {dimension_semantics = [#tpu.dimension_semantics<arbitrary>], iteration_bounds = array<i64: 1>, scalar_prefetch = 0 : i64, scratch_operands = 0 : i64, tpu.core_type = #tpu.core_type<tc>, window_params = [{pipeline_mode = #tpu.pipeline_mode<synchronous>, transform_indices = @transform_0, window_bounds = array<i64: 12, 2>}, {pipeline_mode = #tpu.pipeline_mode<synchronous>, transform_indices = @transform_1, window_bounds = array<i64: 8, 2>}, {pipeline_mode = #tpu.pipeline_mode<synchronous>, transform_indices = @transform_2, window_bounds = array<i64: 98, 32>}, {pipeline_mode = #tpu.pipeline_mode<synchronous>, transform_indices = @transform_3, window_bounds = array<i64: 5, 32, 32>}, {pipeline_mode = #tpu.pipeline_mode<synchronous>, transform_indices = @transform_4, window_bounds = array<i64: 4, 3, 32, 64>}, {pipeline_mode = #tpu.pipeline_mode<synchronous>, transform_indices = @transform_5, window_bounds = array<i64: 32, 128>}, {pipeline_mode = #tpu.pipeline_mode<synchronous>, transform_indices = @transform_6, window_bounds = array<i64: 10, 128>}, {pipeline_mode = #tpu.pipeline_mode<synchronous>, transform_indices = @transform_7, window_bounds = array<i64: 2, 8, 256>}]} {
    %c0 = arith.constant 0 : index
    %c0_0 = arith.constant 0 : index
    %0 = vector.load %arg7[%c0, %c0_0] : memref<10x128xf32, #tpu.memory_space<vmem>>, vector<10x128xf32>
    %c0_1 = arith.constant 0 : index
    %c0_2 = arith.constant 0 : index
    %1 = vector.load %arg3[%c0_1, %c0_2] : memref<98x32xf32, #tpu.memory_space<vmem>>, vector<98x32xf32>
    %c0_3 = arith.constant 0 : index
    %c0_4 = arith.constant 0 : index
    %2 = vector.load %arg1[%c0_3, %c0_4] : memref<12x2xi32, #tpu.memory_space<vmem>>, vector<12x2xi32>
    %c0_5 = arith.constant 0 : index
    %c0_6 = arith.constant 0 : index
    %3 = vector.load %arg2[%c0_5, %c0_6] : memref<8x2xi32, #tpu.memory_space<vmem>>, vector<8x2xi32>
    %4 = vector.extract_strided_slice %0 {offsets = [0, 0], sizes = [1, 32], strides = [1, 1]} : vector<10x128xf32> to vector<1x32xf32>
    %5 = vector.extract_strided_slice %0 {offsets = [1, 0], sizes = [1, 32], strides = [1, 1]} : vector<10x128xf32> to vector<1x32xf32>
    %6 = vector.extract_strided_slice %0 {offsets = [2, 0], sizes = [1, 32], strides = [1, 1]} : vector<10x128xf32> to vector<1x32xf32>
    %7 = vector.extract_strided_slice %0 {offsets = [3, 0], sizes = [1, 32], strides = [1, 1]} : vector<10x128xf32> to vector<1x32xf32>
    %8 = vector.extract_strided_slice %0 {offsets = [4, 0], sizes = [1, 32], strides = [1, 1]} : vector<10x128xf32> to vector<1x32xf32>
    %9 = vector.extract_strided_slice %0 {offsets = [9, 0], sizes = [1, 128], strides = [1, 1]} : vector<10x128xf32> to vector<1x128xf32>
    %cst = arith.constant 0.000000e+00 : f32
    %10 = vector.broadcast %cst : f32 to vector<1x32xf32>
    %cst_7 = arith.constant 0.000000e+00 : f32
    %11 = vector.broadcast %cst_7 : f32 to vector<2x32xf32>
    %12 = vector.extract_strided_slice %2 {offsets = [0, 0], sizes = [12, 1], strides = [1, 1]} : vector<12x2xi32> to vector<12x1xi32>
    %13 = tpu.iota {dimensions = array<i32: 1>} : vector<12x98xi32>
    %14 = tpu.iota {dimensions = array<i32: 0>} : vector<12x98xi32>
    %15 = vector.broadcast %12 : vector<12x1xi32> to vector<12x98xi32>
    %16 = arith.cmpi eq, %13, %15 : vector<12x98xi32>
    %c78_i32 = arith.constant 78 : i32
    %17 = vector.broadcast %c78_i32 : i32 to vector<12x98xi32>
    %18 = arith.addi %14, %17 : vector<12x98xi32>
    %19 = arith.cmpi eq, %13, %18 : vector<12x98xi32>
    %20 = arith.ori %16, %19 : vector<12x98xi1>
    %21 = arith.extui %20 : vector<12x98xi1> to vector<12x98xi32>
    %22 = arith.sitofp %21 : vector<12x98xi32> to vector<12x98xf32>
    %cst_8 = arith.constant dense<0.000000e+00> : vector<12x32xf32>
    %23 = tpu.matmul %22, %1, %cst_8 {dimension_numbers = #tpu.dot_dimension_numbers<[1], [0], [0], [1], [0, 0, 1, 1], [], []>} : vector<12x98xf32>, vector<98x32xf32>, vector<12x32xf32> -> vector<12x32xf32>
    %24 = vector.extract_strided_slice %3 {offsets = [0, 0], sizes = [8, 1], strides = [1, 1]} : vector<8x2xi32> to vector<8x1xi32>
    %25 = tpu.iota {dimensions = array<i32: 1>} : vector<8x98xi32>
    %26 = tpu.iota {dimensions = array<i32: 0>} : vector<8x98xi32>
    %c37_i32 = arith.constant 37 : i32
    %27 = vector.broadcast %c37_i32 : i32 to vector<8x1xi32>
    %28 = arith.addi %24, %27 : vector<8x1xi32>
    %29 = vector.broadcast %28 : vector<8x1xi32> to vector<8x98xi32>
    %30 = arith.cmpi eq, %25, %29 : vector<8x98xi32>
    %c90_i32 = arith.constant 90 : i32
    %31 = vector.broadcast %c90_i32 : i32 to vector<8x98xi32>
    %32 = arith.addi %26, %31 : vector<8x98xi32>
    %33 = arith.cmpi eq, %25, %32 : vector<8x98xi32>
    %34 = arith.ori %30, %33 : vector<8x98xi1>
    %35 = arith.extui %34 : vector<8x98xi1> to vector<8x98xi32>
    %36 = arith.sitofp %35 : vector<8x98xi32> to vector<8x98xf32>
    %cst_9 = arith.constant dense<0.000000e+00> : vector<8x32xf32>
    %37 = tpu.matmul %36, %1, %cst_9 {dimension_numbers = #tpu.dot_dimension_numbers<[1], [0], [0], [1], [0, 0, 1, 1], [], []>} : vector<8x98xf32>, vector<98x32xf32>, vector<8x32xf32> -> vector<8x32xf32>
    %c0_10 = arith.constant 0 : index
    %c0_11 = arith.constant 0 : index
    %c0_12 = arith.constant 0 : index
    %38 = vector.load %arg4[%c0_10, %c0_11, %c0_12] : memref<5x32x32xbf16, #tpu.memory_space<vmem>>, vector<1x32x32xbf16>
    %39 = vector.shape_cast %38 : vector<1x32x32xbf16> to vector<32x32xbf16>
    %40 = arith.truncf %23 : vector<12x32xf32> to vector<12x32xbf16>
    %cst_13 = arith.constant dense<0.000000e+00> : vector<12x32xf32>
    %41 = tpu.matmul %40, %39, %cst_13 {dimension_numbers = #tpu.dot_dimension_numbers<[1], [0], [0], [1], [0, 0, 1, 1], [], []>} : vector<12x32xbf16>, vector<32x32xbf16>, vector<12x32xf32> -> vector<12x32xf32>
    %42 = vector.broadcast %4 : vector<1x32xf32> to vector<12x32xf32>
    %43 = arith.addf %41, %42 : vector<12x32xf32>
    %44 = tpu.concatenate %10, %43, %10 in 0 : vector<1x32xf32>, vector<12x32xf32>, vector<1x32xf32> -> vector<14x32xf32>
    %45 = vector.extract_strided_slice %0 {offsets = [5, 0], sizes = [1, 64], strides = [1, 1]} : vector<10x128xf32> to vector<1x64xf32>
    %46 = vector.extract_strided_slice %44 {offsets = [0, 0], sizes = [12, 32], strides = [1, 1]} : vector<14x32xf32> to vector<12x32xf32>
    %c0_14 = arith.constant 0 : index
    %c0_15 = arith.constant 0 : index
    %c0_16 = arith.constant 0 : index
    %c0_17 = arith.constant 0 : index
    %47 = vector.load %arg5[%c0_14, %c0_15, %c0_16, %c0_17] : memref<4x3x32x64xbf16, #tpu.memory_space<vmem>>, vector<1x1x32x64xbf16>
    %48 = vector.shape_cast %47 : vector<1x1x32x64xbf16> to vector<32x64xbf16>
    %49 = arith.truncf %46 : vector<12x32xf32> to vector<12x32xbf16>
    %cst_18 = arith.constant dense<0.000000e+00> : vector<12x64xf32>
    %50 = tpu.matmul %49, %48, %cst_18 {dimension_numbers = #tpu.dot_dimension_numbers<[1], [0], [0], [1], [0, 0, 1, 1], [], []>} : vector<12x32xbf16>, vector<32x64xbf16>, vector<12x64xf32> -> vector<12x64xf32>
    %51 = vector.broadcast %45 : vector<1x64xf32> to vector<12x64xf32>
    %52 = arith.addf %51, %50 : vector<12x64xf32>
    %53 = vector.extract_strided_slice %44 {offsets = [1, 0], sizes = [12, 32], strides = [1, 1]} : vector<14x32xf32> to vector<12x32xf32>
    %c0_19 = arith.constant 0 : index
    %c1 = arith.constant 1 : index
    %c0_20 = arith.constant 0 : index
    %c0_21 = arith.constant 0 : index
    %54 = vector.load %arg5[%c0_19, %c1, %c0_20, %c0_21] : memref<4x3x32x64xbf16, #tpu.memory_space<vmem>>, vector<1x1x32x64xbf16>
    %55 = vector.shape_cast %54 : vector<1x1x32x64xbf16> to vector<32x64xbf16>
    %56 = arith.truncf %53 : vector<12x32xf32> to vector<12x32xbf16>
    %cst_22 = arith.constant dense<0.000000e+00> : vector<12x64xf32>
    %57 = tpu.matmul %56, %55, %cst_22 {dimension_numbers = #tpu.dot_dimension_numbers<[1], [0], [0], [1], [0, 0, 1, 1], [], []>} : vector<12x32xbf16>, vector<32x64xbf16>, vector<12x64xf32> -> vector<12x64xf32>
    %58 = arith.addf %52, %57 : vector<12x64xf32>
    %59 = vector.extract_strided_slice %44 {offsets = [2, 0], sizes = [12, 32], strides = [1, 1]} : vector<14x32xf32> to vector<12x32xf32>
    %c0_23 = arith.constant 0 : index
    %c2 = arith.constant 2 : index
    %c0_24 = arith.constant 0 : index
    %c0_25 = arith.constant 0 : index
    %60 = vector.load %arg5[%c0_23, %c2, %c0_24, %c0_25] : memref<4x3x32x64xbf16, #tpu.memory_space<vmem>>, vector<1x1x32x64xbf16>
    %61 = vector.shape_cast %60 : vector<1x1x32x64xbf16> to vector<32x64xbf16>
    %62 = arith.truncf %59 : vector<12x32xf32> to vector<12x32xbf16>
    %cst_26 = arith.constant dense<0.000000e+00> : vector<12x64xf32>
    %63 = tpu.matmul %62, %61, %cst_26 {dimension_numbers = #tpu.dot_dimension_numbers<[1], [0], [0], [1], [0, 0, 1, 1], [], []>} : vector<12x32xbf16>, vector<32x64xbf16>, vector<12x64xf32> -> vector<12x64xf32>
    %64 = arith.addf %58, %63 : vector<12x64xf32>
    %65 = vector.extract_strided_slice %64 {offsets = [0, 0], sizes = [12, 32], strides = [1, 1]} : vector<12x64xf32> to vector<12x32xf32>
    %66 = vector.extract_strided_slice %64 {offsets = [0, 32], sizes = [12, 32], strides = [1, 1]} : vector<12x64xf32> to vector<12x32xf32>
    %67 = arith.negf %66 : vector<12x32xf32>
    %68 = math.exp %67 : vector<12x32xf32>
    %cst_27 = arith.constant 1.000000e+00 : f32
    %69 = vector.broadcast %cst_27 : f32 to vector<12x32xf32>
    %70 = arith.addf %69, %68 : vector<12x32xf32>
    %71 = arith.divf %69, %70 : vector<12x32xf32>
    %72 = arith.mulf %65, %71 : vector<12x32xf32>
    %73 = arith.addf %72, %43 : vector<12x32xf32>
    %cst_28 = arith.constant 0.707106769 : f32
    %74 = vector.broadcast %cst_28 : f32 to vector<12x32xf32>
    %75 = arith.mulf %73, %74 : vector<12x32xf32>
    %76 = tpu.concatenate %10, %75, %10 in 0 : vector<1x32xf32>, vector<12x32xf32>, vector<1x32xf32> -> vector<14x32xf32>
    %77 = vector.extract_strided_slice %0 {offsets = [6, 0], sizes = [1, 64], strides = [1, 1]} : vector<10x128xf32> to vector<1x64xf32>
    %78 = vector.extract_strided_slice %76 {offsets = [0, 0], sizes = [12, 32], strides = [1, 1]} : vector<14x32xf32> to vector<12x32xf32>
    %c1_29 = arith.constant 1 : index
    %c0_30 = arith.constant 0 : index
    %c0_31 = arith.constant 0 : index
    %c0_32 = arith.constant 0 : index
    %79 = vector.load %arg5[%c1_29, %c0_30, %c0_31, %c0_32] : memref<4x3x32x64xbf16, #tpu.memory_space<vmem>>, vector<1x1x32x64xbf16>
    %80 = vector.shape_cast %79 : vector<1x1x32x64xbf16> to vector<32x64xbf16>
    %81 = arith.truncf %78 : vector<12x32xf32> to vector<12x32xbf16>
    %cst_33 = arith.constant dense<0.000000e+00> : vector<12x64xf32>
    %82 = tpu.matmul %81, %80, %cst_33 {dimension_numbers = #tpu.dot_dimension_numbers<[1], [0], [0], [1], [0, 0, 1, 1], [], []>} : vector<12x32xbf16>, vector<32x64xbf16>, vector<12x64xf32> -> vector<12x64xf32>
    %83 = vector.broadcast %77 : vector<1x64xf32> to vector<12x64xf32>
    %84 = arith.addf %83, %82 : vector<12x64xf32>
    %85 = vector.extract_strided_slice %76 {offsets = [1, 0], sizes = [12, 32], strides = [1, 1]} : vector<14x32xf32> to vector<12x32xf32>
    %c1_34 = arith.constant 1 : index
    %c1_35 = arith.constant 1 : index
    %c0_36 = arith.constant 0 : index
    %c0_37 = arith.constant 0 : index
    %86 = vector.load %arg5[%c1_34, %c1_35, %c0_36, %c0_37] : memref<4x3x32x64xbf16, #tpu.memory_space<vmem>>, vector<1x1x32x64xbf16>
    %87 = vector.shape_cast %86 : vector<1x1x32x64xbf16> to vector<32x64xbf16>
    %88 = arith.truncf %85 : vector<12x32xf32> to vector<12x32xbf16>
    %cst_38 = arith.constant dense<0.000000e+00> : vector<12x64xf32>
    %89 = tpu.matmul %88, %87, %cst_38 {dimension_numbers = #tpu.dot_dimension_numbers<[1], [0], [0], [1], [0, 0, 1, 1], [], []>} : vector<12x32xbf16>, vector<32x64xbf16>, vector<12x64xf32> -> vector<12x64xf32>
    %90 = arith.addf %84, %89 : vector<12x64xf32>
    %91 = vector.extract_strided_slice %76 {offsets = [2, 0], sizes = [12, 32], strides = [1, 1]} : vector<14x32xf32> to vector<12x32xf32>
    %c1_39 = arith.constant 1 : index
    %c2_40 = arith.constant 2 : index
    %c0_41 = arith.constant 0 : index
    %c0_42 = arith.constant 0 : index
    %92 = vector.load %arg5[%c1_39, %c2_40, %c0_41, %c0_42] : memref<4x3x32x64xbf16, #tpu.memory_space<vmem>>, vector<1x1x32x64xbf16>
    %93 = vector.shape_cast %92 : vector<1x1x32x64xbf16> to vector<32x64xbf16>
    %94 = arith.truncf %91 : vector<12x32xf32> to vector<12x32xbf16>
    %cst_43 = arith.constant dense<0.000000e+00> : vector<12x64xf32>
    %95 = tpu.matmul %94, %93, %cst_43 {dimension_numbers = #tpu.dot_dimension_numbers<[1], [0], [0], [1], [0, 0, 1, 1], [], []>} : vector<12x32xbf16>, vector<32x64xbf16>, vector<12x64xf32> -> vector<12x64xf32>
    %96 = arith.addf %90, %95 : vector<12x64xf32>
    %97 = vector.extract_strided_slice %96 {offsets = [0, 0], sizes = [12, 32], strides = [1, 1]} : vector<12x64xf32> to vector<12x32xf32>
    %98 = vector.extract_strided_slice %96 {offsets = [0, 32], sizes = [12, 32], strides = [1, 1]} : vector<12x64xf32> to vector<12x32xf32>
    %99 = arith.negf %98 : vector<12x32xf32>
    %100 = math.exp %99 : vector<12x32xf32>
    %cst_44 = arith.constant 1.000000e+00 : f32
    %101 = vector.broadcast %cst_44 : f32 to vector<12x32xf32>
    %102 = arith.addf %101, %100 : vector<12x32xf32>
    %103 = arith.divf %101, %102 : vector<12x32xf32>
    %104 = arith.mulf %97, %103 : vector<12x32xf32>
    %105 = arith.addf %104, %75 : vector<12x32xf32>
    %cst_45 = arith.constant 0.707106769 : f32
    %106 = vector.broadcast %cst_45 : f32 to vector<12x32xf32>
    %107 = arith.mulf %105, %106 : vector<12x32xf32>
    %c1_46 = arith.constant 1 : index
    %c0_47 = arith.constant 0 : index
    %c0_48 = arith.constant 0 : index
    %108 = vector.load %arg4[%c1_46, %c0_47, %c0_48] : memref<5x32x32xbf16, #tpu.memory_space<vmem>>, vector<1x32x32xbf16>
    %109 = vector.shape_cast %108 : vector<1x32x32xbf16> to vector<32x32xbf16>
    %110 = arith.truncf %107 : vector<12x32xf32> to vector<12x32xbf16>
    %cst_49 = arith.constant dense<0.000000e+00> : vector<12x32xf32>
    %111 = tpu.matmul %110, %109, %cst_49 {dimension_numbers = #tpu.dot_dimension_numbers<[1], [0], [0], [1], [0, 0, 1, 1], [], []>} : vector<12x32xbf16>, vector<32x32xbf16>, vector<12x32xf32> -> vector<12x32xf32>
    %112 = vector.broadcast %5 : vector<1x32xf32> to vector<12x32xf32>
    %113 = arith.addf %111, %112 : vector<12x32xf32>
    %114 = arith.addf %113, %23 : vector<12x32xf32>
    %cst_50 = arith.constant 0.707106769 : f32
    %115 = vector.broadcast %cst_50 : f32 to vector<12x32xf32>
    %116 = arith.mulf %114, %115 : vector<12x32xf32>
    %117 = arith.truncf %113 : vector<12x32xf32> to vector<12x32xbf16>
    %118 = arith.truncf %116 : vector<12x32xf32> to vector<12x32xbf16>
    %c2_51 = arith.constant 2 : index
    %c0_52 = arith.constant 0 : index
    %c0_53 = arith.constant 0 : index
    %119 = vector.load %arg4[%c2_51, %c0_52, %c0_53] : memref<5x32x32xbf16, #tpu.memory_space<vmem>>, vector<1x32x32xbf16>
    %120 = vector.shape_cast %119 : vector<1x32x32xbf16> to vector<32x32xbf16>
    %121 = arith.truncf %37 : vector<8x32xf32> to vector<8x32xbf16>
    %cst_54 = arith.constant dense<0.000000e+00> : vector<8x32xf32>
    %122 = tpu.matmul %121, %120, %cst_54 {dimension_numbers = #tpu.dot_dimension_numbers<[1], [0], [0], [1], [0, 0, 1, 1], [], []>} : vector<8x32xbf16>, vector<32x32xbf16>, vector<8x32xf32> -> vector<8x32xf32>
    %123 = vector.broadcast %6 : vector<1x32xf32> to vector<8x32xf32>
    %124 = arith.addf %122, %123 : vector<8x32xf32>
    %125 = tpu.concatenate %11, %124 in 0 : vector<2x32xf32>, vector<8x32xf32> -> vector<10x32xf32>
    %126 = vector.extract_strided_slice %0 {offsets = [7, 0], sizes = [1, 64], strides = [1, 1]} : vector<10x128xf32> to vector<1x64xf32>
    %127 = vector.extract_strided_slice %125 {offsets = [0, 0], sizes = [8, 32], strides = [1, 1]} : vector<10x32xf32> to vector<8x32xf32>
    %c2_55 = arith.constant 2 : index
    %c0_56 = arith.constant 0 : index
    %c0_57 = arith.constant 0 : index
    %c0_58 = arith.constant 0 : index
    %128 = vector.load %arg5[%c2_55, %c0_56, %c0_57, %c0_58] : memref<4x3x32x64xbf16, #tpu.memory_space<vmem>>, vector<1x1x32x64xbf16>
    %129 = vector.shape_cast %128 : vector<1x1x32x64xbf16> to vector<32x64xbf16>
    %130 = arith.truncf %127 : vector<8x32xf32> to vector<8x32xbf16>
    %cst_59 = arith.constant dense<0.000000e+00> : vector<8x64xf32>
    %131 = tpu.matmul %130, %129, %cst_59 {dimension_numbers = #tpu.dot_dimension_numbers<[1], [0], [0], [1], [0, 0, 1, 1], [], []>} : vector<8x32xbf16>, vector<32x64xbf16>, vector<8x64xf32> -> vector<8x64xf32>
    %132 = vector.broadcast %126 : vector<1x64xf32> to vector<8x64xf32>
    %133 = arith.addf %132, %131 : vector<8x64xf32>
    %134 = vector.extract_strided_slice %125 {offsets = [1, 0], sizes = [8, 32], strides = [1, 1]} : vector<10x32xf32> to vector<8x32xf32>
    %c2_60 = arith.constant 2 : index
    %c1_61 = arith.constant 1 : index
    %c0_62 = arith.constant 0 : index
    %c0_63 = arith.constant 0 : index
    %135 = vector.load %arg5[%c2_60, %c1_61, %c0_62, %c0_63] : memref<4x3x32x64xbf16, #tpu.memory_space<vmem>>, vector<1x1x32x64xbf16>
    %136 = vector.shape_cast %135 : vector<1x1x32x64xbf16> to vector<32x64xbf16>
    %137 = arith.truncf %134 : vector<8x32xf32> to vector<8x32xbf16>
    %cst_64 = arith.constant dense<0.000000e+00> : vector<8x64xf32>
    %138 = tpu.matmul %137, %136, %cst_64 {dimension_numbers = #tpu.dot_dimension_numbers<[1], [0], [0], [1], [0, 0, 1, 1], [], []>} : vector<8x32xbf16>, vector<32x64xbf16>, vector<8x64xf32> -> vector<8x64xf32>
    %139 = arith.addf %133, %138 : vector<8x64xf32>
    %140 = vector.extract_strided_slice %125 {offsets = [2, 0], sizes = [8, 32], strides = [1, 1]} : vector<10x32xf32> to vector<8x32xf32>
    %c2_65 = arith.constant 2 : index
    %c2_66 = arith.constant 2 : index
    %c0_67 = arith.constant 0 : index
    %c0_68 = arith.constant 0 : index
    %141 = vector.load %arg5[%c2_65, %c2_66, %c0_67, %c0_68] : memref<4x3x32x64xbf16, #tpu.memory_space<vmem>>, vector<1x1x32x64xbf16>
    %142 = vector.shape_cast %141 : vector<1x1x32x64xbf16> to vector<32x64xbf16>
    %143 = arith.truncf %140 : vector<8x32xf32> to vector<8x32xbf16>
    %cst_69 = arith.constant dense<0.000000e+00> : vector<8x64xf32>
    %144 = tpu.matmul %143, %142, %cst_69 {dimension_numbers = #tpu.dot_dimension_numbers<[1], [0], [0], [1], [0, 0, 1, 1], [], []>} : vector<8x32xbf16>, vector<32x64xbf16>, vector<8x64xf32> -> vector<8x64xf32>
    %145 = arith.addf %139, %144 : vector<8x64xf32>
    %146 = vector.extract_strided_slice %145 {offsets = [0, 0], sizes = [8, 32], strides = [1, 1]} : vector<8x64xf32> to vector<8x32xf32>
    %147 = vector.extract_strided_slice %145 {offsets = [0, 32], sizes = [8, 32], strides = [1, 1]} : vector<8x64xf32> to vector<8x32xf32>
    %148 = arith.negf %147 : vector<8x32xf32>
    %149 = math.exp %148 : vector<8x32xf32>
    %cst_70 = arith.constant 1.000000e+00 : f32
    %150 = vector.broadcast %cst_70 : f32 to vector<8x32xf32>
    %151 = arith.addf %150, %149 : vector<8x32xf32>
    %152 = arith.divf %150, %151 : vector<8x32xf32>
    %153 = arith.mulf %146, %152 : vector<8x32xf32>
    %c3 = arith.constant 3 : index
    %c0_71 = arith.constant 0 : index
    %c0_72 = arith.constant 0 : index
    %154 = vector.load %arg4[%c3, %c0_71, %c0_72] : memref<5x32x32xbf16, #tpu.memory_space<vmem>>, vector<1x32x32xbf16>
    %155 = vector.shape_cast %154 : vector<1x32x32xbf16> to vector<32x32xbf16>
    %156 = arith.truncf %153 : vector<8x32xf32> to vector<8x32xbf16>
    %cst_73 = arith.constant dense<0.000000e+00> : vector<8x32xf32>
    %157 = tpu.matmul %156, %155, %cst_73 {dimension_numbers = #tpu.dot_dimension_numbers<[1], [0], [0], [1], [0, 0, 1, 1], [], []>} : vector<8x32xbf16>, vector<32x32xbf16>, vector<8x32xf32> -> vector<8x32xf32>
    %158 = vector.broadcast %7 : vector<1x32xf32> to vector<8x32xf32>
    %159 = arith.addf %157, %158 : vector<8x32xf32>
    %160 = arith.addf %159, %37 : vector<8x32xf32>
    %cst_74 = arith.constant 0.707106769 : f32
    %161 = vector.broadcast %cst_74 : f32 to vector<8x32xf32>
    %162 = arith.mulf %160, %161 : vector<8x32xf32>
    %163 = arith.truncf %162 : vector<8x32xf32> to vector<8x32xbf16>
    %cst_75 = arith.constant dense<0.000000e+00> : vector<8x12xf32>
    %164 = tpu.matmul %163, %117, %cst_75 {dimension_numbers = #tpu.dot_dimension_numbers<[1], [1], [0], [0], [0, 0, 1, 0], [], []>} : vector<8x32xbf16>, vector<12x32xbf16>, vector<8x12xf32> -> vector<8x12xf32>
    %cst_76 = arith.constant dense<0xFF800000> : vector<8xf32>
    %165 = vector.multi_reduction <maximumf>, %164, %cst_76 [1] : vector<8x12xf32> to vector<8xf32>
    %166 = vector.shape_cast %165 : vector<8xf32> to vector<8x1xf32>
    %167 = vector.broadcast %166 : vector<8x1xf32> to vector<8x12xf32>
    %168 = arith.subf %164, %167 : vector<8x12xf32>
    %169 = math.exp %168 : vector<8x12xf32>
    %cst_77 = arith.constant dense<0.000000e+00> : vector<8xf32>
    %170 = vector.multi_reduction <add>, %169, %cst_77 [1] : vector<8x12xf32> to vector<8xf32>
    %171 = vector.shape_cast %170 : vector<8xf32> to vector<8x1xf32>
    %cst_78 = arith.constant 1.000000e+00 : f32
    %172 = vector.broadcast %cst_78 : f32 to vector<8x1xf32>
    %173 = arith.divf %172, %171 : vector<8x1xf32>
    %174 = vector.broadcast %173 : vector<8x1xf32> to vector<8x12xf32>
    %175 = arith.mulf %169, %174 : vector<8x12xf32>
    %176 = arith.truncf %175 : vector<8x12xf32> to vector<8x12xbf16>
    %cst_79 = arith.constant dense<0.000000e+00> : vector<8x32xf32>
    %177 = tpu.matmul %176, %118, %cst_79 {dimension_numbers = #tpu.dot_dimension_numbers<[1], [0], [0], [1], [0, 0, 1, 1], [], []>} : vector<8x12xbf16>, vector<12x32xbf16>, vector<8x32xf32> -> vector<8x32xf32>
    %c4 = arith.constant 4 : index
    %c0_80 = arith.constant 0 : index
    %c0_81 = arith.constant 0 : index
    %178 = vector.load %arg4[%c4, %c0_80, %c0_81] : memref<5x32x32xbf16, #tpu.memory_space<vmem>>, vector<1x32x32xbf16>
    %179 = vector.shape_cast %178 : vector<1x32x32xbf16> to vector<32x32xbf16>
    %180 = arith.truncf %177 : vector<8x32xf32> to vector<8x32xbf16>
    %cst_82 = arith.constant dense<0.000000e+00> : vector<8x32xf32>
    %181 = tpu.matmul %180, %179, %cst_82 {dimension_numbers = #tpu.dot_dimension_numbers<[1], [0], [0], [1], [0, 0, 1, 1], [], []>} : vector<8x32xbf16>, vector<32x32xbf16>, vector<8x32xf32> -> vector<8x32xf32>
    %182 = vector.broadcast %8 : vector<1x32xf32> to vector<8x32xf32>
    %183 = arith.addf %181, %182 : vector<8x32xf32>
    %184 = arith.addf %153, %183 : vector<8x32xf32>
    %cst_83 = arith.constant 0.707106769 : f32
    %185 = vector.broadcast %cst_83 : f32 to vector<8x32xf32>
    %186 = arith.mulf %184, %185 : vector<8x32xf32>
    %187 = arith.addf %186, %124 : vector<8x32xf32>
    %cst_84 = arith.constant 0.707106769 : f32
    %188 = vector.broadcast %cst_84 : f32 to vector<8x32xf32>
    %189 = arith.mulf %187, %188 : vector<8x32xf32>
    %190 = tpu.concatenate %11, %189 in 0 : vector<2x32xf32>, vector<8x32xf32> -> vector<10x32xf32>
    %191 = vector.extract_strided_slice %0 {offsets = [8, 0], sizes = [1, 64], strides = [1, 1]} : vector<10x128xf32> to vector<1x64xf32>
    %192 = vector.extract_strided_slice %190 {offsets = [0, 0], sizes = [8, 32], strides = [1, 1]} : vector<10x32xf32> to vector<8x32xf32>
    %c3_85 = arith.constant 3 : index
    %c0_86 = arith.constant 0 : index
    %c0_87 = arith.constant 0 : index
    %c0_88 = arith.constant 0 : index
    %193 = vector.load %arg5[%c3_85, %c0_86, %c0_87, %c0_88] : memref<4x3x32x64xbf16, #tpu.memory_space<vmem>>, vector<1x1x32x64xbf16>
    %194 = vector.shape_cast %193 : vector<1x1x32x64xbf16> to vector<32x64xbf16>
    %195 = arith.truncf %192 : vector<8x32xf32> to vector<8x32xbf16>
    %cst_89 = arith.constant dense<0.000000e+00> : vector<8x64xf32>
    %196 = tpu.matmul %195, %194, %cst_89 {dimension_numbers = #tpu.dot_dimension_numbers<[1], [0], [0], [1], [0, 0, 1, 1], [], []>} : vector<8x32xbf16>, vector<32x64xbf16>, vector<8x64xf32> -> vector<8x64xf32>
    %197 = vector.broadcast %191 : vector<1x64xf32> to vector<8x64xf32>
    %198 = arith.addf %197, %196 : vector<8x64xf32>
    %199 = vector.extract_strided_slice %190 {offsets = [1, 0], sizes = [8, 32], strides = [1, 1]} : vector<10x32xf32> to vector<8x32xf32>
    %c3_90 = arith.constant 3 : index
    %c1_91 = arith.constant 1 : index
    %c0_92 = arith.constant 0 : index
    %c0_93 = arith.constant 0 : index
    %200 = vector.load %arg5[%c3_90, %c1_91, %c0_92, %c0_93] : memref<4x3x32x64xbf16, #tpu.memory_space<vmem>>, vector<1x1x32x64xbf16>
    %201 = vector.shape_cast %200 : vector<1x1x32x64xbf16> to vector<32x64xbf16>
    %202 = arith.truncf %199 : vector<8x32xf32> to vector<8x32xbf16>
    %cst_94 = arith.constant dense<0.000000e+00> : vector<8x64xf32>
    %203 = tpu.matmul %202, %201, %cst_94 {dimension_numbers = #tpu.dot_dimension_numbers<[1], [0], [0], [1], [0, 0, 1, 1], [], []>} : vector<8x32xbf16>, vector<32x64xbf16>, vector<8x64xf32> -> vector<8x64xf32>
    %204 = arith.addf %198, %203 : vector<8x64xf32>
    %205 = vector.extract_strided_slice %190 {offsets = [2, 0], sizes = [8, 32], strides = [1, 1]} : vector<10x32xf32> to vector<8x32xf32>
    %c3_95 = arith.constant 3 : index
    %c2_96 = arith.constant 2 : index
    %c0_97 = arith.constant 0 : index
    %c0_98 = arith.constant 0 : index
    %206 = vector.load %arg5[%c3_95, %c2_96, %c0_97, %c0_98] : memref<4x3x32x64xbf16, #tpu.memory_space<vmem>>, vector<1x1x32x64xbf16>
    %207 = vector.shape_cast %206 : vector<1x1x32x64xbf16> to vector<32x64xbf16>
    %208 = arith.truncf %205 : vector<8x32xf32> to vector<8x32xbf16>
    %cst_99 = arith.constant dense<0.000000e+00> : vector<8x64xf32>
    %209 = tpu.matmul %208, %207, %cst_99 {dimension_numbers = #tpu.dot_dimension_numbers<[1], [0], [0], [1], [0, 0, 1, 1], [], []>} : vector<8x32xbf16>, vector<32x64xbf16>, vector<8x64xf32> -> vector<8x64xf32>
    %210 = arith.addf %204, %209 : vector<8x64xf32>
    %211 = vector.extract_strided_slice %210 {offsets = [0, 0], sizes = [8, 32], strides = [1, 1]} : vector<8x64xf32> to vector<8x32xf32>
    %212 = vector.extract_strided_slice %210 {offsets = [0, 32], sizes = [8, 32], strides = [1, 1]} : vector<8x64xf32> to vector<8x32xf32>
    %213 = arith.negf %212 : vector<8x32xf32>
    %214 = math.exp %213 : vector<8x32xf32>
    %cst_100 = arith.constant 1.000000e+00 : f32
    %215 = vector.broadcast %cst_100 : f32 to vector<8x32xf32>
    %216 = arith.addf %215, %214 : vector<8x32xf32>
    %217 = arith.divf %215, %216 : vector<8x32xf32>
    %218 = arith.mulf %211, %217 : vector<8x32xf32>
    %c3_101 = arith.constant 3 : index
    %c0_102 = arith.constant 0 : index
    %c0_103 = arith.constant 0 : index
    %219 = vector.load %arg4[%c3_101, %c0_102, %c0_103] : memref<5x32x32xbf16, #tpu.memory_space<vmem>>, vector<1x32x32xbf16>
    %220 = vector.shape_cast %219 : vector<1x32x32xbf16> to vector<32x32xbf16>
    %221 = arith.truncf %218 : vector<8x32xf32> to vector<8x32xbf16>
    %cst_104 = arith.constant dense<0.000000e+00> : vector<8x32xf32>
    %222 = tpu.matmul %221, %220, %cst_104 {dimension_numbers = #tpu.dot_dimension_numbers<[1], [0], [0], [1], [0, 0, 1, 1], [], []>} : vector<8x32xbf16>, vector<32x32xbf16>, vector<8x32xf32> -> vector<8x32xf32>
    %223 = vector.broadcast %7 : vector<1x32xf32> to vector<8x32xf32>
    %224 = arith.addf %222, %223 : vector<8x32xf32>
    %225 = arith.addf %224, %37 : vector<8x32xf32>
    %cst_105 = arith.constant 0.707106769 : f32
    %226 = vector.broadcast %cst_105 : f32 to vector<8x32xf32>
    %227 = arith.mulf %225, %226 : vector<8x32xf32>
    %228 = arith.truncf %227 : vector<8x32xf32> to vector<8x32xbf16>
    %cst_106 = arith.constant dense<0.000000e+00> : vector<8x12xf32>
    %229 = tpu.matmul %228, %117, %cst_106 {dimension_numbers = #tpu.dot_dimension_numbers<[1], [1], [0], [0], [0, 0, 1, 0], [], []>} : vector<8x32xbf16>, vector<12x32xbf16>, vector<8x12xf32> -> vector<8x12xf32>
    %cst_107 = arith.constant dense<0xFF800000> : vector<8xf32>
    %230 = vector.multi_reduction <maximumf>, %229, %cst_107 [1] : vector<8x12xf32> to vector<8xf32>
    %231 = vector.shape_cast %230 : vector<8xf32> to vector<8x1xf32>
    %232 = vector.broadcast %231 : vector<8x1xf32> to vector<8x12xf32>
    %233 = arith.subf %229, %232 : vector<8x12xf32>
    %234 = math.exp %233 : vector<8x12xf32>
    %cst_108 = arith.constant dense<0.000000e+00> : vector<8xf32>
    %235 = vector.multi_reduction <add>, %234, %cst_108 [1] : vector<8x12xf32> to vector<8xf32>
    %236 = vector.shape_cast %235 : vector<8xf32> to vector<8x1xf32>
    %cst_109 = arith.constant 1.000000e+00 : f32
    %237 = vector.broadcast %cst_109 : f32 to vector<8x1xf32>
    %238 = arith.divf %237, %236 : vector<8x1xf32>
    %239 = vector.broadcast %238 : vector<8x1xf32> to vector<8x12xf32>
    %240 = arith.mulf %234, %239 : vector<8x12xf32>
    %241 = arith.truncf %240 : vector<8x12xf32> to vector<8x12xbf16>
    %cst_110 = arith.constant dense<0.000000e+00> : vector<8x32xf32>
    %242 = tpu.matmul %241, %118, %cst_110 {dimension_numbers = #tpu.dot_dimension_numbers<[1], [0], [0], [1], [0, 0, 1, 1], [], []>} : vector<8x12xbf16>, vector<12x32xbf16>, vector<8x32xf32> -> vector<8x32xf32>
    %c4_111 = arith.constant 4 : index
    %c0_112 = arith.constant 0 : index
    %c0_113 = arith.constant 0 : index
    %243 = vector.load %arg4[%c4_111, %c0_112, %c0_113] : memref<5x32x32xbf16, #tpu.memory_space<vmem>>, vector<1x32x32xbf16>
    %244 = vector.shape_cast %243 : vector<1x32x32xbf16> to vector<32x32xbf16>
    %245 = arith.truncf %242 : vector<8x32xf32> to vector<8x32xbf16>
    %cst_114 = arith.constant dense<0.000000e+00> : vector<8x32xf32>
    %246 = tpu.matmul %245, %244, %cst_114 {dimension_numbers = #tpu.dot_dimension_numbers<[1], [0], [0], [1], [0, 0, 1, 1], [], []>} : vector<8x32xbf16>, vector<32x32xbf16>, vector<8x32xf32> -> vector<8x32xf32>
    %247 = vector.broadcast %8 : vector<1x32xf32> to vector<8x32xf32>
    %248 = arith.addf %246, %247 : vector<8x32xf32>
    %249 = arith.addf %218, %248 : vector<8x32xf32>
    %cst_115 = arith.constant 0.707106769 : f32
    %250 = vector.broadcast %cst_115 : f32 to vector<8x32xf32>
    %251 = arith.mulf %249, %250 : vector<8x32xf32>
    %252 = arith.addf %251, %189 : vector<8x32xf32>
    %cst_116 = arith.constant 0.707106769 : f32
    %253 = vector.broadcast %cst_116 : f32 to vector<8x32xf32>
    %254 = arith.mulf %252, %253 : vector<8x32xf32>
    %c0_117 = arith.constant 0 : index
    %c0_118 = arith.constant 0 : index
    %255 = vector.load %arg6[%c0_117, %c0_118] : memref<32x128xbf16, #tpu.memory_space<vmem>>, vector<32x128xbf16>
    %256 = arith.truncf %254 : vector<8x32xf32> to vector<8x32xbf16>
    %cst_119 = arith.constant dense<0.000000e+00> : vector<8x128xf32>
    %257 = tpu.matmul %256, %255, %cst_119 {dimension_numbers = #tpu.dot_dimension_numbers<[1], [0], [0], [1], [0, 0, 1, 1], [], []>} : vector<8x32xbf16>, vector<32x128xbf16>, vector<8x128xf32> -> vector<8x128xf32>
    %258 = vector.broadcast %9 : vector<1x128xf32> to vector<8x128xf32>
    %259 = arith.addf %257, %258 : vector<8x128xf32>
    %cst_120 = arith.constant 0.000000e+00 : f32
    %260 = vector.broadcast %cst_120 : f32 to vector<8x116xf32>
    %261 = tpu.concatenate %259, %240, %260 in 1 : vector<8x128xf32>, vector<8x12xf32>, vector<8x116xf32> -> vector<8x256xf32>
    %c0_121 = arith.constant 0 : index
    %c0_122 = arith.constant 0 : index
    %c0_123 = arith.constant 0 : index
    %262 = vector.load %arg8[%c0_121, %c0_122, %c0_123] : memref<2x8x256xf32, #tpu.memory_space<vmem>>, vector<1x8x256xf32>
    %263 = vector.shape_cast %262 : vector<1x8x256xf32> to vector<8x256xf32>
    %264 = vector.shape_cast %261 : vector<8x256xf32> to vector<1x8x256xf32>
    tpu.vector_store %arg8[%c0_121, %c0_122, %c0_123], %264 {strides = array<i32>} : memref<2x8x256xf32, #tpu.memory_space<vmem>>, vector<1x8x256xf32>,
    %265 = vector.extract_strided_slice %2 {offsets = [0, 1], sizes = [12, 1], strides = [1, 1]} : vector<12x2xi32> to vector<12x1xi32>
    %266 = tpu.iota {dimensions = array<i32: 1>} : vector<12x98xi32>
    %267 = tpu.iota {dimensions = array<i32: 0>} : vector<12x98xi32>
    %268 = vector.broadcast %265 : vector<12x1xi32> to vector<12x98xi32>
    %269 = arith.cmpi eq, %266, %268 : vector<12x98xi32>
    %c78_i32_124 = arith.constant 78 : i32
    %270 = vector.broadcast %c78_i32_124 : i32 to vector<12x98xi32>
    %271 = arith.addi %267, %270 : vector<12x98xi32>
    %272 = arith.cmpi eq, %266, %271 : vector<12x98xi32>
    %273 = arith.ori %269, %272 : vector<12x98xi1>
    %274 = arith.extui %273 : vector<12x98xi1> to vector<12x98xi32>
    %275 = arith.sitofp %274 : vector<12x98xi32> to vector<12x98xf32>
    %cst_125 = arith.constant dense<0.000000e+00> : vector<12x32xf32>
    %276 = tpu.matmul %275, %1, %cst_125 {dimension_numbers = #tpu.dot_dimension_numbers<[1], [0], [0], [1], [0, 0, 1, 1], [], []>} : vector<12x98xf32>, vector<98x32xf32>, vector<12x32xf32> -> vector<12x32xf32>
    %277 = vector.extract_strided_slice %3 {offsets = [0, 1], sizes = [8, 1], strides = [1, 1]} : vector<8x2xi32> to vector<8x1xi32>
    %278 = tpu.iota {dimensions = array<i32: 1>} : vector<8x98xi32>
    %279 = tpu.iota {dimensions = array<i32: 0>} : vector<8x98xi32>
    %c37_i32_126 = arith.constant 37 : i32
    %280 = vector.broadcast %c37_i32_126 : i32 to vector<8x1xi32>
    %281 = arith.addi %277, %280 : vector<8x1xi32>
    %282 = vector.broadcast %281 : vector<8x1xi32> to vector<8x98xi32>
    %283 = arith.cmpi eq, %278, %282 : vector<8x98xi32>
    %c90_i32_127 = arith.constant 90 : i32
    %284 = vector.broadcast %c90_i32_127 : i32 to vector<8x98xi32>
    %285 = arith.addi %279, %284 : vector<8x98xi32>
    %286 = arith.cmpi eq, %278, %285 : vector<8x98xi32>
    %287 = arith.ori %283, %286 : vector<8x98xi1>
    %288 = arith.extui %287 : vector<8x98xi1> to vector<8x98xi32>
    %289 = arith.sitofp %288 : vector<8x98xi32> to vector<8x98xf32>
    %cst_128 = arith.constant dense<0.000000e+00> : vector<8x32xf32>
    %290 = tpu.matmul %289, %1, %cst_128 {dimension_numbers = #tpu.dot_dimension_numbers<[1], [0], [0], [1], [0, 0, 1, 1], [], []>} : vector<8x98xf32>, vector<98x32xf32>, vector<8x32xf32> -> vector<8x32xf32>
    %c0_129 = arith.constant 0 : index
    %c0_130 = arith.constant 0 : index
    %c0_131 = arith.constant 0 : index
    %291 = vector.load %arg4[%c0_129, %c0_130, %c0_131] : memref<5x32x32xbf16, #tpu.memory_space<vmem>>, vector<1x32x32xbf16>
    %292 = vector.shape_cast %291 : vector<1x32x32xbf16> to vector<32x32xbf16>
    %293 = arith.truncf %276 : vector<12x32xf32> to vector<12x32xbf16>
    %cst_132 = arith.constant dense<0.000000e+00> : vector<12x32xf32>
    %294 = tpu.matmul %293, %292, %cst_132 {dimension_numbers = #tpu.dot_dimension_numbers<[1], [0], [0], [1], [0, 0, 1, 1], [], []>} : vector<12x32xbf16>, vector<32x32xbf16>, vector<12x32xf32> -> vector<12x32xf32>
    %295 = vector.broadcast %4 : vector<1x32xf32> to vector<12x32xf32>
    %296 = arith.addf %294, %295 : vector<12x32xf32>
    %297 = tpu.concatenate %10, %296, %10 in 0 : vector<1x32xf32>, vector<12x32xf32>, vector<1x32xf32> -> vector<14x32xf32>
    %298 = vector.extract_strided_slice %0 {offsets = [5, 0], sizes = [1, 64], strides = [1, 1]} : vector<10x128xf32> to vector<1x64xf32>
    %299 = vector.extract_strided_slice %297 {offsets = [0, 0], sizes = [12, 32], strides = [1, 1]} : vector<14x32xf32> to vector<12x32xf32>
    %c0_133 = arith.constant 0 : index
    %c0_134 = arith.constant 0 : index
    %c0_135 = arith.constant 0 : index
    %c0_136 = arith.constant 0 : index
    %300 = vector.load %arg5[%c0_133, %c0_134, %c0_135, %c0_136] : memref<4x3x32x64xbf16, #tpu.memory_space<vmem>>, vector<1x1x32x64xbf16>
    %301 = vector.shape_cast %300 : vector<1x1x32x64xbf16> to vector<32x64xbf16>
    %302 = arith.truncf %299 : vector<12x32xf32> to vector<12x32xbf16>
    %cst_137 = arith.constant dense<0.000000e+00> : vector<12x64xf32>
    %303 = tpu.matmul %302, %301, %cst_137 {dimension_numbers = #tpu.dot_dimension_numbers<[1], [0], [0], [1], [0, 0, 1, 1], [], []>} : vector<12x32xbf16>, vector<32x64xbf16>, vector<12x64xf32> -> vector<12x64xf32>
    %304 = vector.broadcast %298 : vector<1x64xf32> to vector<12x64xf32>
    %305 = arith.addf %304, %303 : vector<12x64xf32>
    %306 = vector.extract_strided_slice %297 {offsets = [1, 0], sizes = [12, 32], strides = [1, 1]} : vector<14x32xf32> to vector<12x32xf32>
    %c0_138 = arith.constant 0 : index
    %c1_139 = arith.constant 1 : index
    %c0_140 = arith.constant 0 : index
    %c0_141 = arith.constant 0 : index
    %307 = vector.load %arg5[%c0_138, %c1_139, %c0_140, %c0_141] : memref<4x3x32x64xbf16, #tpu.memory_space<vmem>>, vector<1x1x32x64xbf16>
    %308 = vector.shape_cast %307 : vector<1x1x32x64xbf16> to vector<32x64xbf16>
    %309 = arith.truncf %306 : vector<12x32xf32> to vector<12x32xbf16>
    %cst_142 = arith.constant dense<0.000000e+00> : vector<12x64xf32>
    %310 = tpu.matmul %309, %308, %cst_142 {dimension_numbers = #tpu.dot_dimension_numbers<[1], [0], [0], [1], [0, 0, 1, 1], [], []>} : vector<12x32xbf16>, vector<32x64xbf16>, vector<12x64xf32> -> vector<12x64xf32>
    %311 = arith.addf %305, %310 : vector<12x64xf32>
    %312 = vector.extract_strided_slice %297 {offsets = [2, 0], sizes = [12, 32], strides = [1, 1]} : vector<14x32xf32> to vector<12x32xf32>
    %c0_143 = arith.constant 0 : index
    %c2_144 = arith.constant 2 : index
    %c0_145 = arith.constant 0 : index
    %c0_146 = arith.constant 0 : index
    %313 = vector.load %arg5[%c0_143, %c2_144, %c0_145, %c0_146] : memref<4x3x32x64xbf16, #tpu.memory_space<vmem>>, vector<1x1x32x64xbf16>
    %314 = vector.shape_cast %313 : vector<1x1x32x64xbf16> to vector<32x64xbf16>
    %315 = arith.truncf %312 : vector<12x32xf32> to vector<12x32xbf16>
    %cst_147 = arith.constant dense<0.000000e+00> : vector<12x64xf32>
    %316 = tpu.matmul %315, %314, %cst_147 {dimension_numbers = #tpu.dot_dimension_numbers<[1], [0], [0], [1], [0, 0, 1, 1], [], []>} : vector<12x32xbf16>, vector<32x64xbf16>, vector<12x64xf32> -> vector<12x64xf32>
    %317 = arith.addf %311, %316 : vector<12x64xf32>
    %318 = vector.extract_strided_slice %317 {offsets = [0, 0], sizes = [12, 32], strides = [1, 1]} : vector<12x64xf32> to vector<12x32xf32>
    %319 = vector.extract_strided_slice %317 {offsets = [0, 32], sizes = [12, 32], strides = [1, 1]} : vector<12x64xf32> to vector<12x32xf32>
    %320 = arith.negf %319 : vector<12x32xf32>
    %321 = math.exp %320 : vector<12x32xf32>
    %cst_148 = arith.constant 1.000000e+00 : f32
    %322 = vector.broadcast %cst_148 : f32 to vector<12x32xf32>
    %323 = arith.addf %322, %321 : vector<12x32xf32>
    %324 = arith.divf %322, %323 : vector<12x32xf32>
    %325 = arith.mulf %318, %324 : vector<12x32xf32>
    %326 = arith.addf %325, %296 : vector<12x32xf32>
    %cst_149 = arith.constant 0.707106769 : f32
    %327 = vector.broadcast %cst_149 : f32 to vector<12x32xf32>
    %328 = arith.mulf %326, %327 : vector<12x32xf32>
    %329 = tpu.concatenate %10, %328, %10 in 0 : vector<1x32xf32>, vector<12x32xf32>, vector<1x32xf32> -> vector<14x32xf32>
    %330 = vector.extract_strided_slice %0 {offsets = [6, 0], sizes = [1, 64], strides = [1, 1]} : vector<10x128xf32> to vector<1x64xf32>
    %331 = vector.extract_strided_slice %329 {offsets = [0, 0], sizes = [12, 32], strides = [1, 1]} : vector<14x32xf32> to vector<12x32xf32>
    %c1_150 = arith.constant 1 : index
    %c0_151 = arith.constant 0 : index
    %c0_152 = arith.constant 0 : index
    %c0_153 = arith.constant 0 : index
    %332 = vector.load %arg5[%c1_150, %c0_151, %c0_152, %c0_153] : memref<4x3x32x64xbf16, #tpu.memory_space<vmem>>, vector<1x1x32x64xbf16>
    %333 = vector.shape_cast %332 : vector<1x1x32x64xbf16> to vector<32x64xbf16>
    %334 = arith.truncf %331 : vector<12x32xf32> to vector<12x32xbf16>
    %cst_154 = arith.constant dense<0.000000e+00> : vector<12x64xf32>
    %335 = tpu.matmul %334, %333, %cst_154 {dimension_numbers = #tpu.dot_dimension_numbers<[1], [0], [0], [1], [0, 0, 1, 1], [], []>} : vector<12x32xbf16>, vector<32x64xbf16>, vector<12x64xf32> -> vector<12x64xf32>
    %336 = vector.broadcast %330 : vector<1x64xf32> to vector<12x64xf32>
    %337 = arith.addf %336, %335 : vector<12x64xf32>
    %338 = vector.extract_strided_slice %329 {offsets = [1, 0], sizes = [12, 32], strides = [1, 1]} : vector<14x32xf32> to vector<12x32xf32>
    %c1_155 = arith.constant 1 : index
    %c1_156 = arith.constant 1 : index
    %c0_157 = arith.constant 0 : index
    %c0_158 = arith.constant 0 : index
    %339 = vector.load %arg5[%c1_155, %c1_156, %c0_157, %c0_158] : memref<4x3x32x64xbf16, #tpu.memory_space<vmem>>, vector<1x1x32x64xbf16>
    %340 = vector.shape_cast %339 : vector<1x1x32x64xbf16> to vector<32x64xbf16>
    %341 = arith.truncf %338 : vector<12x32xf32> to vector<12x32xbf16>
    %cst_159 = arith.constant dense<0.000000e+00> : vector<12x64xf32>
    %342 = tpu.matmul %341, %340, %cst_159 {dimension_numbers = #tpu.dot_dimension_numbers<[1], [0], [0], [1], [0, 0, 1, 1], [], []>} : vector<12x32xbf16>, vector<32x64xbf16>, vector<12x64xf32> -> vector<12x64xf32>
    %343 = arith.addf %337, %342 : vector<12x64xf32>
    %344 = vector.extract_strided_slice %329 {offsets = [2, 0], sizes = [12, 32], strides = [1, 1]} : vector<14x32xf32> to vector<12x32xf32>
    %c1_160 = arith.constant 1 : index
    %c2_161 = arith.constant 2 : index
    %c0_162 = arith.constant 0 : index
    %c0_163 = arith.constant 0 : index
    %345 = vector.load %arg5[%c1_160, %c2_161, %c0_162, %c0_163] : memref<4x3x32x64xbf16, #tpu.memory_space<vmem>>, vector<1x1x32x64xbf16>
    %346 = vector.shape_cast %345 : vector<1x1x32x64xbf16> to vector<32x64xbf16>
    %347 = arith.truncf %344 : vector<12x32xf32> to vector<12x32xbf16>
    %cst_164 = arith.constant dense<0.000000e+00> : vector<12x64xf32>
    %348 = tpu.matmul %347, %346, %cst_164 {dimension_numbers = #tpu.dot_dimension_numbers<[1], [0], [0], [1], [0, 0, 1, 1], [], []>} : vector<12x32xbf16>, vector<32x64xbf16>, vector<12x64xf32> -> vector<12x64xf32>
    %349 = arith.addf %343, %348 : vector<12x64xf32>
    %350 = vector.extract_strided_slice %349 {offsets = [0, 0], sizes = [12, 32], strides = [1, 1]} : vector<12x64xf32> to vector<12x32xf32>
    %351 = vector.extract_strided_slice %349 {offsets = [0, 32], sizes = [12, 32], strides = [1, 1]} : vector<12x64xf32> to vector<12x32xf32>
    %352 = arith.negf %351 : vector<12x32xf32>
    %353 = math.exp %352 : vector<12x32xf32>
    %cst_165 = arith.constant 1.000000e+00 : f32
    %354 = vector.broadcast %cst_165 : f32 to vector<12x32xf32>
    %355 = arith.addf %354, %353 : vector<12x32xf32>
    %356 = arith.divf %354, %355 : vector<12x32xf32>
    %357 = arith.mulf %350, %356 : vector<12x32xf32>
    %358 = arith.addf %357, %328 : vector<12x32xf32>
    %cst_166 = arith.constant 0.707106769 : f32
    %359 = vector.broadcast %cst_166 : f32 to vector<12x32xf32>
    %360 = arith.mulf %358, %359 : vector<12x32xf32>
    %c1_167 = arith.constant 1 : index
    %c0_168 = arith.constant 0 : index
    %c0_169 = arith.constant 0 : index
    %361 = vector.load %arg4[%c1_167, %c0_168, %c0_169] : memref<5x32x32xbf16, #tpu.memory_space<vmem>>, vector<1x32x32xbf16>
    %362 = vector.shape_cast %361 : vector<1x32x32xbf16> to vector<32x32xbf16>
    %363 = arith.truncf %360 : vector<12x32xf32> to vector<12x32xbf16>
    %cst_170 = arith.constant dense<0.000000e+00> : vector<12x32xf32>
    %364 = tpu.matmul %363, %362, %cst_170 {dimension_numbers = #tpu.dot_dimension_numbers<[1], [0], [0], [1], [0, 0, 1, 1], [], []>} : vector<12x32xbf16>, vector<32x32xbf16>, vector<12x32xf32> -> vector<12x32xf32>
    %365 = vector.broadcast %5 : vector<1x32xf32> to vector<12x32xf32>
    %366 = arith.addf %364, %365 : vector<12x32xf32>
    %367 = arith.addf %366, %276 : vector<12x32xf32>
    %cst_171 = arith.constant 0.707106769 : f32
    %368 = vector.broadcast %cst_171 : f32 to vector<12x32xf32>
    %369 = arith.mulf %367, %368 : vector<12x32xf32>
    %370 = arith.truncf %366 : vector<12x32xf32> to vector<12x32xbf16>
    %371 = arith.truncf %369 : vector<12x32xf32> to vector<12x32xbf16>
    %c2_172 = arith.constant 2 : index
    %c0_173 = arith.constant 0 : index
    %c0_174 = arith.constant 0 : index
    %372 = vector.load %arg4[%c2_172, %c0_173, %c0_174] : memref<5x32x32xbf16, #tpu.memory_space<vmem>>, vector<1x32x32xbf16>
    %373 = vector.shape_cast %372 : vector<1x32x32xbf16> to vector<32x32xbf16>
    %374 = arith.truncf %290 : vector<8x32xf32> to vector<8x32xbf16>
    %cst_175 = arith.constant dense<0.000000e+00> : vector<8x32xf32>
    %375 = tpu.matmul %374, %373, %cst_175 {dimension_numbers = #tpu.dot_dimension_numbers<[1], [0], [0], [1], [0, 0, 1, 1], [], []>} : vector<8x32xbf16>, vector<32x32xbf16>, vector<8x32xf32> -> vector<8x32xf32>
    %376 = vector.broadcast %6 : vector<1x32xf32> to vector<8x32xf32>
    %377 = arith.addf %375, %376 : vector<8x32xf32>
    %378 = tpu.concatenate %11, %377 in 0 : vector<2x32xf32>, vector<8x32xf32> -> vector<10x32xf32>
    %379 = vector.extract_strided_slice %0 {offsets = [7, 0], sizes = [1, 64], strides = [1, 1]} : vector<10x128xf32> to vector<1x64xf32>
    %380 = vector.extract_strided_slice %378 {offsets = [0, 0], sizes = [8, 32], strides = [1, 1]} : vector<10x32xf32> to vector<8x32xf32>
    %c2_176 = arith.constant 2 : index
    %c0_177 = arith.constant 0 : index
    %c0_178 = arith.constant 0 : index
    %c0_179 = arith.constant 0 : index
    %381 = vector.load %arg5[%c2_176, %c0_177, %c0_178, %c0_179] : memref<4x3x32x64xbf16, #tpu.memory_space<vmem>>, vector<1x1x32x64xbf16>
    %382 = vector.shape_cast %381 : vector<1x1x32x64xbf16> to vector<32x64xbf16>
    %383 = arith.truncf %380 : vector<8x32xf32> to vector<8x32xbf16>
    %cst_180 = arith.constant dense<0.000000e+00> : vector<8x64xf32>
    %384 = tpu.matmul %383, %382, %cst_180 {dimension_numbers = #tpu.dot_dimension_numbers<[1], [0], [0], [1], [0, 0, 1, 1], [], []>} : vector<8x32xbf16>, vector<32x64xbf16>, vector<8x64xf32> -> vector<8x64xf32>
    %385 = vector.broadcast %379 : vector<1x64xf32> to vector<8x64xf32>
    %386 = arith.addf %385, %384 : vector<8x64xf32>
    %387 = vector.extract_strided_slice %378 {offsets = [1, 0], sizes = [8, 32], strides = [1, 1]} : vector<10x32xf32> to vector<8x32xf32>
    %c2_181 = arith.constant 2 : index
    %c1_182 = arith.constant 1 : index
    %c0_183 = arith.constant 0 : index
    %c0_184 = arith.constant 0 : index
    %388 = vector.load %arg5[%c2_181, %c1_182, %c0_183, %c0_184] : memref<4x3x32x64xbf16, #tpu.memory_space<vmem>>, vector<1x1x32x64xbf16>
    %389 = vector.shape_cast %388 : vector<1x1x32x64xbf16> to vector<32x64xbf16>
    %390 = arith.truncf %387 : vector<8x32xf32> to vector<8x32xbf16>
    %cst_185 = arith.constant dense<0.000000e+00> : vector<8x64xf32>
    %391 = tpu.matmul %390, %389, %cst_185 {dimension_numbers = #tpu.dot_dimension_numbers<[1], [0], [0], [1], [0, 0, 1, 1], [], []>} : vector<8x32xbf16>, vector<32x64xbf16>, vector<8x64xf32> -> vector<8x64xf32>
    %392 = arith.addf %386, %391 : vector<8x64xf32>
    %393 = vector.extract_strided_slice %378 {offsets = [2, 0], sizes = [8, 32], strides = [1, 1]} : vector<10x32xf32> to vector<8x32xf32>
    %c2_186 = arith.constant 2 : index
    %c2_187 = arith.constant 2 : index
    %c0_188 = arith.constant 0 : index
    %c0_189 = arith.constant 0 : index
    %394 = vector.load %arg5[%c2_186, %c2_187, %c0_188, %c0_189] : memref<4x3x32x64xbf16, #tpu.memory_space<vmem>>, vector<1x1x32x64xbf16>
    %395 = vector.shape_cast %394 : vector<1x1x32x64xbf16> to vector<32x64xbf16>
    %396 = arith.truncf %393 : vector<8x32xf32> to vector<8x32xbf16>
    %cst_190 = arith.constant dense<0.000000e+00> : vector<8x64xf32>
    %397 = tpu.matmul %396, %395, %cst_190 {dimension_numbers = #tpu.dot_dimension_numbers<[1], [0], [0], [1], [0, 0, 1, 1], [], []>} : vector<8x32xbf16>, vector<32x64xbf16>, vector<8x64xf32> -> vector<8x64xf32>
    %398 = arith.addf %392, %397 : vector<8x64xf32>
    %399 = vector.extract_strided_slice %398 {offsets = [0, 0], sizes = [8, 32], strides = [1, 1]} : vector<8x64xf32> to vector<8x32xf32>
    %400 = vector.extract_strided_slice %398 {offsets = [0, 32], sizes = [8, 32], strides = [1, 1]} : vector<8x64xf32> to vector<8x32xf32>
    %401 = arith.negf %400 : vector<8x32xf32>
    %402 = math.exp %401 : vector<8x32xf32>
    %cst_191 = arith.constant 1.000000e+00 : f32
    %403 = vector.broadcast %cst_191 : f32 to vector<8x32xf32>
    %404 = arith.addf %403, %402 : vector<8x32xf32>
    %405 = arith.divf %403, %404 : vector<8x32xf32>
    %406 = arith.mulf %399, %405 : vector<8x32xf32>
    %c3_192 = arith.constant 3 : index
    %c0_193 = arith.constant 0 : index
    %c0_194 = arith.constant 0 : index
    %407 = vector.load %arg4[%c3_192, %c0_193, %c0_194] : memref<5x32x32xbf16, #tpu.memory_space<vmem>>, vector<1x32x32xbf16>
    %408 = vector.shape_cast %407 : vector<1x32x32xbf16> to vector<32x32xbf16>
    %409 = arith.truncf %406 : vector<8x32xf32> to vector<8x32xbf16>
    %cst_195 = arith.constant dense<0.000000e+00> : vector<8x32xf32>
    %410 = tpu.matmul %409, %408, %cst_195 {dimension_numbers = #tpu.dot_dimension_numbers<[1], [0], [0], [1], [0, 0, 1, 1], [], []>} : vector<8x32xbf16>, vector<32x32xbf16>, vector<8x32xf32> -> vector<8x32xf32>
    %411 = vector.broadcast %7 : vector<1x32xf32> to vector<8x32xf32>
    %412 = arith.addf %410, %411 : vector<8x32xf32>
    %413 = arith.addf %412, %290 : vector<8x32xf32>
    %cst_196 = arith.constant 0.707106769 : f32
    %414 = vector.broadcast %cst_196 : f32 to vector<8x32xf32>
    %415 = arith.mulf %413, %414 : vector<8x32xf32>
    %416 = arith.truncf %415 : vector<8x32xf32> to vector<8x32xbf16>
    %cst_197 = arith.constant dense<0.000000e+00> : vector<8x12xf32>
    %417 = tpu.matmul %416, %370, %cst_197 {dimension_numbers = #tpu.dot_dimension_numbers<[1], [1], [0], [0], [0, 0, 1, 0], [], []>} : vector<8x32xbf16>, vector<12x32xbf16>, vector<8x12xf32> -> vector<8x12xf32>
    %cst_198 = arith.constant dense<0xFF800000> : vector<8xf32>
    %418 = vector.multi_reduction <maximumf>, %417, %cst_198 [1] : vector<8x12xf32> to vector<8xf32>
    %419 = vector.shape_cast %418 : vector<8xf32> to vector<8x1xf32>
    %420 = vector.broadcast %419 : vector<8x1xf32> to vector<8x12xf32>
    %421 = arith.subf %417, %420 : vector<8x12xf32>
    %422 = math.exp %421 : vector<8x12xf32>
    %cst_199 = arith.constant dense<0.000000e+00> : vector<8xf32>
    %423 = vector.multi_reduction <add>, %422, %cst_199 [1] : vector<8x12xf32> to vector<8xf32>
    %424 = vector.shape_cast %423 : vector<8xf32> to vector<8x1xf32>
    %cst_200 = arith.constant 1.000000e+00 : f32
    %425 = vector.broadcast %cst_200 : f32 to vector<8x1xf32>
    %426 = arith.divf %425, %424 : vector<8x1xf32>
    %427 = vector.broadcast %426 : vector<8x1xf32> to vector<8x12xf32>
    %428 = arith.mulf %422, %427 : vector<8x12xf32>
    %429 = arith.truncf %428 : vector<8x12xf32> to vector<8x12xbf16>
    %cst_201 = arith.constant dense<0.000000e+00> : vector<8x32xf32>
    %430 = tpu.matmul %429, %371, %cst_201 {dimension_numbers = #tpu.dot_dimension_numbers<[1], [0], [0], [1], [0, 0, 1, 1], [], []>} : vector<8x12xbf16>, vector<12x32xbf16>, vector<8x32xf32> -> vector<8x32xf32>
    %c4_202 = arith.constant 4 : index
    %c0_203 = arith.constant 0 : index
    %c0_204 = arith.constant 0 : index
    %431 = vector.load %arg4[%c4_202, %c0_203, %c0_204] : memref<5x32x32xbf16, #tpu.memory_space<vmem>>, vector<1x32x32xbf16>
    %432 = vector.shape_cast %431 : vector<1x32x32xbf16> to vector<32x32xbf16>
    %433 = arith.truncf %430 : vector<8x32xf32> to vector<8x32xbf16>
    %cst_205 = arith.constant dense<0.000000e+00> : vector<8x32xf32>
    %434 = tpu.matmul %433, %432, %cst_205 {dimension_numbers = #tpu.dot_dimension_numbers<[1], [0], [0], [1], [0, 0, 1, 1], [], []>} : vector<8x32xbf16>, vector<32x32xbf16>, vector<8x32xf32> -> vector<8x32xf32>
    %435 = vector.broadcast %8 : vector<1x32xf32> to vector<8x32xf32>
    %436 = arith.addf %434, %435 : vector<8x32xf32>
    %437 = arith.addf %406, %436 : vector<8x32xf32>
    %cst_206 = arith.constant 0.707106769 : f32
    %438 = vector.broadcast %cst_206 : f32 to vector<8x32xf32>
    %439 = arith.mulf %437, %438 : vector<8x32xf32>
    %440 = arith.addf %439, %377 : vector<8x32xf32>
    %cst_207 = arith.constant 0.707106769 : f32
    %441 = vector.broadcast %cst_207 : f32 to vector<8x32xf32>
    %442 = arith.mulf %440, %441 : vector<8x32xf32>
    %443 = tpu.concatenate %11, %442 in 0 : vector<2x32xf32>, vector<8x32xf32> -> vector<10x32xf32>
    %444 = vector.extract_strided_slice %0 {offsets = [8, 0], sizes = [1, 64], strides = [1, 1]} : vector<10x128xf32> to vector<1x64xf32>
    %445 = vector.extract_strided_slice %443 {offsets = [0, 0], sizes = [8, 32], strides = [1, 1]} : vector<10x32xf32> to vector<8x32xf32>
    %c3_208 = arith.constant 3 : index
    %c0_209 = arith.constant 0 : index
    %c0_210 = arith.constant 0 : index
    %c0_211 = arith.constant 0 : index
    %446 = vector.load %arg5[%c3_208, %c0_209, %c0_210, %c0_211] : memref<4x3x32x64xbf16, #tpu.memory_space<vmem>>, vector<1x1x32x64xbf16>
    %447 = vector.shape_cast %446 : vector<1x1x32x64xbf16> to vector<32x64xbf16>
    %448 = arith.truncf %445 : vector<8x32xf32> to vector<8x32xbf16>
    %cst_212 = arith.constant dense<0.000000e+00> : vector<8x64xf32>
    %449 = tpu.matmul %448, %447, %cst_212 {dimension_numbers = #tpu.dot_dimension_numbers<[1], [0], [0], [1], [0, 0, 1, 1], [], []>} : vector<8x32xbf16>, vector<32x64xbf16>, vector<8x64xf32> -> vector<8x64xf32>
    %450 = vector.broadcast %444 : vector<1x64xf32> to vector<8x64xf32>
    %451 = arith.addf %450, %449 : vector<8x64xf32>
    %452 = vector.extract_strided_slice %443 {offsets = [1, 0], sizes = [8, 32], strides = [1, 1]} : vector<10x32xf32> to vector<8x32xf32>
    %c3_213 = arith.constant 3 : index
    %c1_214 = arith.constant 1 : index
    %c0_215 = arith.constant 0 : index
    %c0_216 = arith.constant 0 : index
    %453 = vector.load %arg5[%c3_213, %c1_214, %c0_215, %c0_216] : memref<4x3x32x64xbf16, #tpu.memory_space<vmem>>, vector<1x1x32x64xbf16>
    %454 = vector.shape_cast %453 : vector<1x1x32x64xbf16> to vector<32x64xbf16>
    %455 = arith.truncf %452 : vector<8x32xf32> to vector<8x32xbf16>
    %cst_217 = arith.constant dense<0.000000e+00> : vector<8x64xf32>
    %456 = tpu.matmul %455, %454, %cst_217 {dimension_numbers = #tpu.dot_dimension_numbers<[1], [0], [0], [1], [0, 0, 1, 1], [], []>} : vector<8x32xbf16>, vector<32x64xbf16>, vector<8x64xf32> -> vector<8x64xf32>
    %457 = arith.addf %451, %456 : vector<8x64xf32>
    %458 = vector.extract_strided_slice %443 {offsets = [2, 0], sizes = [8, 32], strides = [1, 1]} : vector<10x32xf32> to vector<8x32xf32>
    %c3_218 = arith.constant 3 : index
    %c2_219 = arith.constant 2 : index
    %c0_220 = arith.constant 0 : index
    %c0_221 = arith.constant 0 : index
    %459 = vector.load %arg5[%c3_218, %c2_219, %c0_220, %c0_221] : memref<4x3x32x64xbf16, #tpu.memory_space<vmem>>, vector<1x1x32x64xbf16>
    %460 = vector.shape_cast %459 : vector<1x1x32x64xbf16> to vector<32x64xbf16>
    %461 = arith.truncf %458 : vector<8x32xf32> to vector<8x32xbf16>
    %cst_222 = arith.constant dense<0.000000e+00> : vector<8x64xf32>
    %462 = tpu.matmul %461, %460, %cst_222 {dimension_numbers = #tpu.dot_dimension_numbers<[1], [0], [0], [1], [0, 0, 1, 1], [], []>} : vector<8x32xbf16>, vector<32x64xbf16>, vector<8x64xf32> -> vector<8x64xf32>
    %463 = arith.addf %457, %462 : vector<8x64xf32>
    %464 = vector.extract_strided_slice %463 {offsets = [0, 0], sizes = [8, 32], strides = [1, 1]} : vector<8x64xf32> to vector<8x32xf32>
    %465 = vector.extract_strided_slice %463 {offsets = [0, 32], sizes = [8, 32], strides = [1, 1]} : vector<8x64xf32> to vector<8x32xf32>
    %466 = arith.negf %465 : vector<8x32xf32>
    %467 = math.exp %466 : vector<8x32xf32>
    %cst_223 = arith.constant 1.000000e+00 : f32
    %468 = vector.broadcast %cst_223 : f32 to vector<8x32xf32>
    %469 = arith.addf %468, %467 : vector<8x32xf32>
    %470 = arith.divf %468, %469 : vector<8x32xf32>
    %471 = arith.mulf %464, %470 : vector<8x32xf32>
    %c3_224 = arith.constant 3 : index
    %c0_225 = arith.constant 0 : index
    %c0_226 = arith.constant 0 : index
    %472 = vector.load %arg4[%c3_224, %c0_225, %c0_226] : memref<5x32x32xbf16, #tpu.memory_space<vmem>>, vector<1x32x32xbf16>
    %473 = vector.shape_cast %472 : vector<1x32x32xbf16> to vector<32x32xbf16>
    %474 = arith.truncf %471 : vector<8x32xf32> to vector<8x32xbf16>
    %cst_227 = arith.constant dense<0.000000e+00> : vector<8x32xf32>
    %475 = tpu.matmul %474, %473, %cst_227 {dimension_numbers = #tpu.dot_dimension_numbers<[1], [0], [0], [1], [0, 0, 1, 1], [], []>} : vector<8x32xbf16>, vector<32x32xbf16>, vector<8x32xf32> -> vector<8x32xf32>
    %476 = vector.broadcast %7 : vector<1x32xf32> to vector<8x32xf32>
    %477 = arith.addf %475, %476 : vector<8x32xf32>
    %478 = arith.addf %477, %290 : vector<8x32xf32>
    %cst_228 = arith.constant 0.707106769 : f32
    %479 = vector.broadcast %cst_228 : f32 to vector<8x32xf32>
    %480 = arith.mulf %478, %479 : vector<8x32xf32>
    %481 = arith.truncf %480 : vector<8x32xf32> to vector<8x32xbf16>
    %cst_229 = arith.constant dense<0.000000e+00> : vector<8x12xf32>
    %482 = tpu.matmul %481, %370, %cst_229 {dimension_numbers = #tpu.dot_dimension_numbers<[1], [1], [0], [0], [0, 0, 1, 0], [], []>} : vector<8x32xbf16>, vector<12x32xbf16>, vector<8x12xf32> -> vector<8x12xf32>
    %cst_230 = arith.constant dense<0xFF800000> : vector<8xf32>
    %483 = vector.multi_reduction <maximumf>, %482, %cst_230 [1] : vector<8x12xf32> to vector<8xf32>
    %484 = vector.shape_cast %483 : vector<8xf32> to vector<8x1xf32>
    %485 = vector.broadcast %484 : vector<8x1xf32> to vector<8x12xf32>
    %486 = arith.subf %482, %485 : vector<8x12xf32>
    %487 = math.exp %486 : vector<8x12xf32>
    %cst_231 = arith.constant dense<0.000000e+00> : vector<8xf32>
    %488 = vector.multi_reduction <add>, %487, %cst_231 [1] : vector<8x12xf32> to vector<8xf32>
    %489 = vector.shape_cast %488 : vector<8xf32> to vector<8x1xf32>
    %cst_232 = arith.constant 1.000000e+00 : f32
    %490 = vector.broadcast %cst_232 : f32 to vector<8x1xf32>
    %491 = arith.divf %490, %489 : vector<8x1xf32>
    %492 = vector.broadcast %491 : vector<8x1xf32> to vector<8x12xf32>
    %493 = arith.mulf %487, %492 : vector<8x12xf32>
    %494 = arith.truncf %493 : vector<8x12xf32> to vector<8x12xbf16>
    %cst_233 = arith.constant dense<0.000000e+00> : vector<8x32xf32>
    %495 = tpu.matmul %494, %371, %cst_233 {dimension_numbers = #tpu.dot_dimension_numbers<[1], [0], [0], [1], [0, 0, 1, 1], [], []>} : vector<8x12xbf16>, vector<12x32xbf16>, vector<8x32xf32> -> vector<8x32xf32>
    %c4_234 = arith.constant 4 : index
    %c0_235 = arith.constant 0 : index
    %c0_236 = arith.constant 0 : index
    %496 = vector.load %arg4[%c4_234, %c0_235, %c0_236] : memref<5x32x32xbf16, #tpu.memory_space<vmem>>, vector<1x32x32xbf16>
    %497 = vector.shape_cast %496 : vector<1x32x32xbf16> to vector<32x32xbf16>
    %498 = arith.truncf %495 : vector<8x32xf32> to vector<8x32xbf16>
    %cst_237 = arith.constant dense<0.000000e+00> : vector<8x32xf32>
    %499 = tpu.matmul %498, %497, %cst_237 {dimension_numbers = #tpu.dot_dimension_numbers<[1], [0], [0], [1], [0, 0, 1, 1], [], []>} : vector<8x32xbf16>, vector<32x32xbf16>, vector<8x32xf32> -> vector<8x32xf32>
    %500 = vector.broadcast %8 : vector<1x32xf32> to vector<8x32xf32>
    %501 = arith.addf %499, %500 : vector<8x32xf32>
    %502 = arith.addf %471, %501 : vector<8x32xf32>
    %cst_238 = arith.constant 0.707106769 : f32
    %503 = vector.broadcast %cst_238 : f32 to vector<8x32xf32>
    %504 = arith.mulf %502, %503 : vector<8x32xf32>
    %505 = arith.addf %504, %442 : vector<8x32xf32>
    %cst_239 = arith.constant 0.707106769 : f32
    %506 = vector.broadcast %cst_239 : f32 to vector<8x32xf32>
    %507 = arith.mulf %505, %506 : vector<8x32xf32>
    %c0_240 = arith.constant 0 : index
    %c0_241 = arith.constant 0 : index
    %508 = vector.load %arg6[%c0_240, %c0_241] : memref<32x128xbf16, #tpu.memory_space<vmem>>, vector<32x128xbf16>
    %509 = arith.truncf %507 : vector<8x32xf32> to vector<8x32xbf16>
    %cst_242 = arith.constant dense<0.000000e+00> : vector<8x128xf32>
    %510 = tpu.matmul %509, %508, %cst_242 {dimension_numbers = #tpu.dot_dimension_numbers<[1], [0], [0], [1], [0, 0, 1, 1], [], []>} : vector<8x32xbf16>, vector<32x128xbf16>, vector<8x128xf32> -> vector<8x128xf32>
    %511 = vector.broadcast %9 : vector<1x128xf32> to vector<8x128xf32>
    %512 = arith.addf %510, %511 : vector<8x128xf32>
    %cst_243 = arith.constant 0.000000e+00 : f32
    %513 = vector.broadcast %cst_243 : f32 to vector<8x116xf32>
    %514 = tpu.concatenate %512, %493, %513 in 1 : vector<8x128xf32>, vector<8x12xf32>, vector<8x116xf32> -> vector<8x256xf32>
    %c1_244 = arith.constant 1 : index
    %c0_245 = arith.constant 0 : index
    %c0_246 = arith.constant 0 : index
    %515 = vector.load %arg8[%c1_244, %c0_245, %c0_246] : memref<2x8x256xf32, #tpu.memory_space<vmem>>, vector<1x8x256xf32>
    %516 = vector.shape_cast %515 : vector<1x8x256xf32> to vector<8x256xf32>
    %517 = vector.shape_cast %514 : vector<8x256xf32> to vector<1x8x256xf32>
    tpu.vector_store %arg8[%c1_244, %c0_245, %c0_246], %517 {strides = array<i32>} : memref<2x8x256xf32, #tpu.memory_space<vmem>>, vector<1x8x256xf32>,
    return
  }
  func.func @transform_0(%arg0: i32) -> (i32, i32) {
    %c0_i32 = arith.constant 0 : i32
    %c0_i32_0 = arith.constant 0 : i32
    %c0_i32_1 = arith.constant 0 : i32
    return %c0_i32, %c0_i32_0 : i32, i32
  }
  func.func @transform_1(%arg0: i32) -> (i32, i32) {
    %c0_i32 = arith.constant 0 : i32
    %c0_i32_0 = arith.constant 0 : i32
    %c0_i32_1 = arith.constant 0 : i32
    return %c0_i32, %c0_i32_0 : i32, i32
  }
  func.func @transform_2(%arg0: i32) -> (i32, i32) {
    %c0_i32 = arith.constant 0 : i32
    %c0_i32_0 = arith.constant 0 : i32
    %c0_i32_1 = arith.constant 0 : i32
    return %c0_i32, %c0_i32_0 : i32, i32
  }
  func.func @transform_3(%arg0: i32) -> (i32, i32, i32) {
    %c0_i32 = arith.constant 0 : i32
    %c0_i32_0 = arith.constant 0 : i32
    %c0_i32_1 = arith.constant 0 : i32
    %c0_i32_2 = arith.constant 0 : i32
    return %c0_i32, %c0_i32_0, %c0_i32_1 : i32, i32, i32
  }
  func.func @transform_4(%arg0: i32) -> (i32, i32, i32, i32) {
    %c0_i32 = arith.constant 0 : i32
    %c0_i32_0 = arith.constant 0 : i32
    %c0_i32_1 = arith.constant 0 : i32
    %c0_i32_2 = arith.constant 0 : i32
    %c0_i32_3 = arith.constant 0 : i32
    return %c0_i32, %c0_i32_0, %c0_i32_1, %c0_i32_2 : i32, i32, i32, i32
  }
  func.func @transform_5(%arg0: i32) -> (i32, i32) {
    %c0_i32 = arith.constant 0 : i32
    %c0_i32_0 = arith.constant 0 : i32
    %c0_i32_1 = arith.constant 0 : i32
    return %c0_i32, %c0_i32_0 : i32, i32
  }
  func.func @transform_6(%arg0: i32) -> (i32, i32) {
    %c0_i32 = arith.constant 0 : i32
    %c0_i32_0 = arith.constant 0 : i32
    %c0_i32_1 = arith.constant 0 : i32
    return %c0_i32, %c0_i32_0 : i32, i32
  }
  func.func @transform_7(%arg0: i32) -> (i32, i32, i32) {
    %c0_i32 = arith.constant 0 : i32
    %c0_i32_0 = arith.constant 0 : i32
    %c0_i32_1 = arith.constant 0 : i32
    %c0_i32_2 = arith.constant 0 : i32
    return %c0_i32, %c0_i32_0, %c0_i32_1 : i32, i32, i32
  }
}

</mosaic_0001>

<bundles_post_ra>
// kernel: seq2seq_forward.1
= control target key start
LH: loop header
LB: loop body
LE: loop exit
PB: predicated region body
PF: predicated region fallthrough
CT: control target
= control target key end

     0   :  { %12 = vsyncpa [#allocation3], 0  ;;  %s2843_s27 = smov [#allocation2]   ;;  %s2844_s29 = smov 64   ;;  %s3467_s0 = inlined_call_operand.vmem [shape: s32[12,2], index: 0, kind: input, shape index: {}]   ;;  %s3468_s1 = inlined_call_operand.vmem [shape: s32[8,2], index: 1, kind: input, shape index: {}]   ;;  %s3469_s2 = inlined_call_operand.vmem [shape: f32[98,32], index: 2, kind: input, shape index: {}]   ;;  %s3470_s3 = inlined_call_operand.vmem [shape: bf16[5,32,32], index: 3, kind: input, shape index: {}]   ;;  %s3471_s4 = inlined_call_operand.hbm [shape: bf16[4,3,32,64], index: 4, kind: input, shape index: {}]   ;;  %s3472_s5 = inlined_call_operand.vmem [shape: bf16[32,128], index: 5, kind: input, shape index: {}]   ;;  %s3473_s6 = inlined_call_operand.vmem [shape: f32[10,128], index: 6, kind: input, shape index: {}]   ;;  %s3474_s7 = inlined_call_operand.vmem [shape: f32[2,8,256], index: 7, kind: output, shape index: {}]  }
   0x1   :  { %s25_s26 = sshll.u32 %s3471_s4, 4  ;;  %s27_s28 = sshll.u32 %s2843_s27, 4  ;;  %s26_s26 = int_to_ptr.hbm [resolvable:$true] %s25_s26  ;;  %s28_s28 = int_to_ptr.vmem [resolvable:$true] %s27_s28 }
   0x2   :  { %s2845_s30 = smov 4  }
   0x3   :  { %33 = dma.hbm_to_vmem [thread:$0]  %s26_s26, 3072, %s28_s28, [#allocation3], %s2844_s29, %s2844_s29, %s2845_s30  }
   0x4   :  { %2841 = dma.done.wait [#allocation3], 3072  }
   0x5   :  { %2842 = vsyncadd [#allocation3], 4294964224  ;;  %v2846_v0 = vmov 0   ;;  %vm91_vm0 = vcmask 1041408   ;;  %v58_v1 = vld [vmem:[%s3467_s0] sm:$0xff]  ;;  %v2906_v3 = vld [vmem:[%s3469_s2 + $0x58] sm:$0xff]  ;;  %v61_v16 = vlaneseq }
   0x6   :  { %2747 = vset.pattern.permute.xlu0 %v2846_v0  ;;  %2748 = vset.pattern.permute.xlu1 %v2846_v0  ;;  %v2899_v2 = vld [vmem:[%s3469_s2 + $0x60] sm:$0x3]  ;;  %v2911_v4 = vld [vmem:[%s3469_s2 + $0x50] sm:$0xff]  ;;  %v2919_v5 = vld [vmem:[%s3469_s2 + $0x48] sm:$0xff]  ;;  %vm84_vm3 = vcmask 801792   ;;  %v2847_v22 = vmov 0.0  }
   0x7   :  { %67 = vperm.xlu0 %2747, %v58_v1   ;;  %2272 = vmatpush.msk.msra.mxu0 %vm91_vm0, %v2899_v2  ;;  %v2926_v6 = vld [vmem:[%s3467_s0 + $0x8] sm:$0xf]  ;;  %v2931_v7 = vld [vmem:[%s3469_s2 + $0x40] sm:$0xff]  ;;  %v2938_v8 = vld [vmem:[%s3469_s2 + $0x38] sm:$0xff]  ;;  %v2995_v17 = vshrl.u32 %v61_v16, 7  ;;  %v2997_v18 = vand.u32 127, %v61_v16 }
   0x8   :  { %2276 = vmatpush.msk.msra.mxu1 %vm91_vm0, %v2899_v2  ;;  %v2946_v9 = vld [vmem:[%s3469_s2 + $0x30] sm:$0xff]  ;;  %v2953_v10 = vld [vmem:[%s3469_s2 + $0x28] sm:$0xff]  ;;  %v2960_v11 = vld [vmem:[%s3469_s2 + $0x20] sm:$0xff]  ;;  %vm169_vm8 = vcmask 261120   ;;  %vm189_vm9 = vcmask 1040384   ;;  %vm196_vm10 = vcmask 1044480  }
   0x9   :  { %99 = vmatpush.msra.mxu0 %v2906_v3  ;;  %v2967_v12 = vld [vmem:[%s3469_s2 + $0x18] sm:$0xff]  ;;  %v2974_v13 = vld [vmem:[%s3469_s2 + $0x10] sm:$0xff]  ;;  %v2984_v14 = vld [vmem:[%s3469_s2 + $0x8] sm:$0xff]  ;;  %v3000_v19 = vadd.s32 78, %v2995_v17  ;;  %v65_v20 = vadd.s32 8, %v2995_v17 }
   0xa   :  { %135 = vmatpush.msra.mxu1 %v2906_v3  ;;  %v2991_v15 = vld [vmem:[%s3469_s2] sm:$0xff]  ;;  %v2669_v27 = vld [vmem:[%s3470_s3 + $0x8] sm:$0xff]  ;;  %v2673_v34 = vld [vmem:[#allocation2 + $0x18] sm:$0xff] }
   0xb   :  { %100 = vmatpush.msra.mxu0 %v2911_v4  ;;  %vm76_vm1 = vcmp.eq.s32.totalorder %v2997_v18, %v3000_v19  ;;  %v3010_v24 = vadd.s32 78, %v65_v20  ;;  %179 = vmatpush.bf16.msra.mxu2 %v2669_v27  ;;  %v2668_v28 = vld [vmem:[%s3470_s3] sm:$0xff]  ;;  %v2671_v32 = vld [vmem:[#allocation2 + $0x8] sm:$0xff]  ;;  %v2672_v36 = vld [vmem:[#allocation2 + $0x10] sm:$0xff] }
   0xc   :  { %136 = vmatpush.msra.mxu1 %v2911_v4  ;;  %224 = vmatpush.bf16.msra.mxu3 %v2671_v32  ;;  %v2670_v33 = vld [vmem:[#allocation2] sm:$0xff]  ;;  %v2675_v35 = vld [vmem:[#allocation2 + $0x28] sm:$0xff] }
   0xd   :  { %101 = vmatpush.msra.mxu0 %v2919_v5  ;;  %vm77_vm5 = vcmp.eq.s32.totalorder %v2997_v18, %v3010_v24  ;;  %v2674_v37 = vld [vmem:[#allocation2 + $0x20] sm:$0xff]  ;;  %v2705_v24 = vld [vmem:[%s3470_s3 + $0x8] sm:$0xff] }
   0xe   :  { %137 = vmatpush.msra.mxu1 %v2919_v5  ;;  %v3037_v38 = vld [vmem:[%s3473_s6] sm:$0xff] }
   0xf   :  { %70 = vperm.xlu0 %2747, %v2926_v6   ;;  %102 = vmatpush.msra.mxu0 %v2931_v7  ;;  %v3040_v40 = vperm.slane %v3037_v38, 0  ;;  %v60_v55 = vld [vmem:[%s3468_s1] sm:$0xff]  ;;  %v3063_v59 = vperm.slane %v3037_v38, 5  ;;  %s2848_s1 = smov 96  }
  0x10   :  { %138 = vmatpush.msra.mxu1 %v2931_v7  ;;  %180 = vmatpush.bf16.msra.mxu2 %v2668_v28  ;;  %v3059_v56 = vadd.s32 37, %v60_v55 }
  0x11   :  { %103 = vmatpush.msra.mxu0 %v2938_v8  ;;  %225 = vmatpush.bf16.msra.mxu3 %v2670_v33 }
  0x12   :  { %139 = vmatpush.msra.mxu1 %v2938_v8  ;;  %120 = vperm.xlu1 %2748, %v3059_v56  }
  0x13   :  { %104 = vmatpush.msra.mxu0 %v2946_v9 }
  0x14   :  { %140 = vmatpush.msra.mxu1 %v2946_v9  ;;  %267 = vmatpush.bf16.msrb.mxu2 %v2673_v34 }
  0x15   :  { %105 = vmatpush.msra.mxu0 %v2953_v10  ;;  %305 = vmatpush.bf16.msrb.mxu3 %v2675_v35 }
  0x16   :  { %141 = vmatpush.msra.mxu1 %v2953_v10 }
  0x17   :  { %106 = vmatpush.msra.mxu0 %v2960_v11 }
  0x18   :  { %142 = vmatpush.msra.mxu1 %v2960_v11  ;;  %268 = vmatpush.bf16.msrb.mxu2 %v2672_v36 }
  0x19   :  { %107 = vmatpush.msra.mxu0 %v2967_v12  ;;  %306 = vmatpush.bf16.msrb.mxu3 %v2674_v37 }
  0x1a   :  { %143 = vmatpush.msra.mxu1 %v2967_v12 }
  0x1b   :  { %108 = vmatpush.msra.mxu0 %v2974_v13 }
  0x1c   :  { %144 = vmatpush.msra.mxu1 %v2974_v13 }
  0x1d   :  { %109 = vmatpush.msra.mxu0 %v2984_v14 }
  0x1e   :  { %145 = vmatpush.msra.mxu1 %v2984_v14 }
  0x1f   :  { %110 = vmatpush.msra.mxu0 %v2991_v15 }
  0x20   :  { %146 = vmatpush.msra.mxu1 %v2991_v15 }
  0x79   :  { %v68_v21 = vpop.permute.xlu0 %67 }
  0x7a   :  { %vm72_vm2 = vcmp.eq.s32.totalorder %v2997_v18, %v68_v21 }
  0x7b   :  { %vm78_vm4 = vmor %vm72_vm2, %vm76_vm1 }
  0x7c   :  { %v2270_v23 = vsel %vm78_vm4, 1.0, %v2847_v22 }
  0x7d   :  { %2273 = vmatmul.msk.f32.vlgmr.msra.gmra.mxu0 %vm84_vm3, %v2270_v23 }
  0x81   :  { %v71_v25 = vpop.permute.xlu0 %70 }
  0x82   :  { %vm73_vm6 = vcmp.eq.s32.totalorder %v2997_v18, %v71_v25 }
  0x83   :  { %vm79_vm7 = vmor %vm73_vm6, %vm77_vm5 }
  0x84   :  { %v2271_v26 = vsel %vm79_vm7, 1.0, %v2847_v22 }
  0x85   :  { %2274 = vmatmul.msk.f32.gmra.mxu0 %vm84_vm3, %v2271_v26 }
  0xfa   :  { %v3027_v29 = vpop.f32.mrf.mxu0 }
 0x102   :  { %v3029_v30 = vpop.f32.mrf.mxu0 }
 0x103   :  { %v155_v31 = vpack.c.bf16 %v3029_v30, %v3027_v29 }
 0x105   :  { %2286 = vmatmul.msk.bf16.vlgmr.msra.gmra.mxu2 %vm169_vm8, %v155_v31 }
 0x188   :  { %v182_v39 = vpop.f32.mrf.mxu2 }
 0x189   :  { %v3043_v41 = vadd.f32 %v182_v39, %v3040_v40 }
 0x18b   :  { %v190_v44 = vrot.slane %v3043_v41, 7 }
 0x18d   :  { %v195_v47 = vsel %vm189_vm9, 0.0, %v190_v44 }
 0x190   :  { %v184_v42 = vpop.f32.mrf.mxu2 }
 0x191   :  { %v3046_v43 = vadd.f32 %v184_v42, %v3040_v40 }
 0x193   :  { %v191_v45 = vrot.slane %v3046_v43, 7 }
 0x195   :  { %v192_v46 = vsel %vm189_vm9, %v190_v44, %v191_v45 }
 0x196   :  { %v197_v48 = vsel %vm196_vm10, %v192_v46, 0.0 }
 0x197   :  { %v202_v49 = vpack.c.bf16 %v197_v48, %v195_v47 }
 0x199   :  { %2295 = vmatmul.msk.bf16.vlgmr.msra.gmra.mxu3 %vm169_vm8, %v202_v49  ;;  %v242_v50 = vshll.u32 %v202_v49, 16  ;;  %v240_v51 = vshrl.u32 %v202_v49, 16  ;;  %v283_v54 = vrot.slane %v202_v49, 1 }
 0x19b   :  { %v244_v52 = vrot.slane %v242_v50, 1 }
 0x19d   :  { %v245_v53 = vor.u32 %v244_v52, %v240_v51 }
 0x19f   :  { %2304 = vmatmul.msk.bf16.vlgmr.msrb.gmra.mxu2 %vm169_vm8, %v245_v53 }
 0x1a9   :  { %2313 = vmatmul.msk.bf16.vlgmr.msrb.gmra.mxu3 %vm169_vm8, %v283_v54 }
 0x21c   :  { %v227_v57 = vpop.f32.mrf.mxu3 }
 0x21d   :  { %v233_v61 = vadd.f32 %v3063_v59, %v227_v57 }
 0x222   :  { %v270_v60 = vpop.f32.mrf.mxu2 }
 0x223   :  { %v275_v62 = vadd.f32 %v270_v60, %v233_v61  ;;  %v121_v60 = vpop.permute.xlu1 %120 }
 0x224   :  { %v229_v58 = vpop.f32.mrf.mxu3 }
 0x225   :  { %v234_v20 = vadd.f32 %v3063_v59, %v229_v58  ;;  %v3073_v58 = vadd.s32 90, %v2995_v17  ;;  %v2676_v17 = vld [vmem:[#allocation2 + $0x30] sm:$0xff] }
 0x227   :  { %vm124_vm7 = vcmp.eq.s32.totalorder %v2997_v18, %v3073_v58 }
 0x22a   :  { %v272_v16 = vpop.f32.mrf.mxu2 }
 0x22b   :  { %v276_v21 = vadd.f32 %v272_v16, %v234_v20  ;;  %v2680_v16 = vld [vmem:[#allocation2 + $0x50] sm:$0xff]  ;;  %v2678_v20 = vld [vmem:[#allocation2 + $0x40] sm:$0xff] }
 0x22c   :  { %v308_v63 = vpop.f32.mrf.mxu3 }
 0x22d   :  { %v3066_v0 = vadd.f32 %v308_v63, %v275_v62  ;;  %v2677_v62 = vld [vmem:[#allocation2 + $0x38] sm:$0xff] }
 0x22e   :  { %v2681_v63 = vld [vmem:[#allocation2 + $0x58] sm:$0xff]  ;;  %403 = vmatpush.bf16.msrb.mxu1 %v2677_v62 }
 0x22f   :  { %v2314_v1 = vmul.f32 -1.442695, %v3066_v0  ;;  %484 = vmatpush.bf16.msra.mxu3 %v2681_v63 }
 0x231   :  { %2752 = vpow2.f32 %v2314_v1  ;;  %v2679_v1 = vld [vmem:[#allocation2 + $0x48] sm:$0xff] }
 0x232   :  { %404 = vmatpush.bf16.msrb.mxu1 %v2676_v17  ;;  %446 = vmatpush.bf16.msra.mxu2 %v2679_v1 }
 0x233   :  { %485 = vmatpush.bf16.msra.mxu3 %v2680_v16 }
 0x234   :  { %v310_v23 = vpop.f32.mrf.mxu3 }
 0x235   :  { %v314_v25 = vadd.f32 %v310_v23, %v276_v21  ;;  %v2685_v21 = vld [vmem:[%s3470_s3 + $0x28] sm:$0xff] }
 0x236   :  { %447 = vmatpush.bf16.msra.mxu2 %v2678_v20 }
 0x237   :  { %v2753_v26 = vpop.eup %2752  ;;  %v2315_v27 = vmul.f32 -1.442695, %v314_v25 }
 0x238   :  { %v321_v28 = vadd.f32 1.0, %v2753_v26 }
 0x239   :  { %2754 = vpow2.f32 %v2315_v27 }
 0x23a   :  { %2756 = vrcp.f32 %v321_v28  ;;  %v334_v36 = vand.u32 2147483648, %v321_v28  ;;  %v332_v39 = vand.u32 2147483647, %v321_v28  ;;  %vm328_vm12 = vweird.f32 %v321_v28 }
 0x23c   :  { %v335_v45 = vor.u32 1.1754944e-38, %v334_v36  ;;  %vm333_vm14 = vcmp.eq.f32.partialorder %v332_v39, 8.507059e+37 }
 0x23f   :  { %v2755_v31 = vpop.eup %2754 }
 0x240   :  { %v2757_v32 = vpop.eup %2756  ;;  %v322_v33 = vadd.f32 1.0, %v2755_v31 }
 0x241   :  { %v324_v34 = vmul.f32 %v2757_v32, %v321_v28  ;;  %vm329_vm11 = vweird.f32 %v2757_v32 }
 0x242   :  { %2758 = vrcp.f32 %v322_v33  ;;  %vm330_vm13 = vmor %vm328_vm12, %vm329_vm11  ;;  %v349_v50 = vand.u32 2147483648, %v322_v33  ;;  %v347_v52 = vand.u32 2147483647, %v322_v33  ;;  %vm343_vm2 = vweird.f32 %v322_v33 }
 0x243   :  { %v325_v35 = vsub.f32 1.0, %v324_v34  ;;  %vm122_vm11 = vcmp.eq.s32.totalorder %v2997_v18, %v121_v60 }
 0x244   :  { %v350_v54 = vor.u32 1.1754944e-38, %v349_v50  ;;  %vm348_vm6 = vcmp.eq.f32.partialorder %v347_v52, 8.507059e+37  ;;  %vm125_vm12 = vmor %vm122_vm11, %vm124_vm7  ;;  %v3110_v50 = vperm.slane %v3037_v38, 6 }
 0x245   :  { %v326_v37 = vmul.f32 %v2757_v32, %v325_v35  ;;  %v2275_v61 = vsel %vm125_vm12, 1.0, %v2847_v22 }
 0x246   :  { %2277 = vmatmul.msk.f32.vlgmr.msra.gmra.mxu1 %vm84_vm3, %v2275_v61 }
 0x247   :  { %v327_v42 = vadd.f32 %v2757_v32, %v326_v37  ;;  %616 = vmatpush.bf16.msra.mxu1 %v2685_v21 }
 0x248   :  { %v2759_v44 = vpop.eup %2758 }
 0x249   :  { %v331_v46 = vsel %vm330_vm13, %v2757_v32, %v327_v42  ;;  %v339_v47 = vmul.f32 %v2759_v44, %v322_v33  ;;  %vm344_vm15 = vweird.f32 %v2759_v44 }
 0x24a   :  { %v336_v48 = vsel %vm333_vm14, %v335_v45, %v331_v46  ;;  %vm345_vm4 = vmor %vm343_vm2, %vm344_vm15  ;;  %v2684_v46 = vld [vmem:[%s3470_s3 + $0x20] sm:$0xff] }
 0x24b   :  { %355 = vrot.lane.b32.xlu1 %v336_v48, %s2848_s1  ;;  %v340_v49 = vsub.f32 1.0, %v339_v47  ;;  %617 = vmatpush.bf16.msra.mxu1 %v2684_v46 }
 0x24d   :  { %v341_v51 = vmul.f32 %v2759_v44, %v340_v49 }
 0x24f   :  { %v342_v53 = vadd.f32 %v2759_v44, %v341_v51 }
 0x251   :  { %v346_v55 = vsel %vm345_vm4, %v2759_v44, %v342_v53 }
 0x252   :  { %v351_v57 = vsel %vm348_vm6, %v350_v54, %v346_v55 }
 0x253   :  { %357 = vrot.lane.b32.xlu2 %v351_v57, %s2848_s1 }
 0x2ad   :  { %v358_v23 = vpop.permute.xlu2 %357 }
 0x2ae   :  { %v362_v26 = vmul.f32 %v358_v23, %v314_v25 }
 0x2b0   :  { %v364_v27 = vadd.f32 %v362_v26, %v3046_v43 }
 0x2b2   :  { %v3088_v32 = vmul.f32 0.70710677, %v364_v27 }
 0x2b4   :  { %v370_v35 = vrot.slane %v3088_v32, 7 }
 0x2bd   :  { %v356_v28 = vpop.permute.xlu1 %355 }
 0x2be   :  { %v361_v31 = vmul.f32 %v356_v28, %v3066_v0 }
 0x2c0   :  { %v363_v33 = vadd.f32 %v361_v31, %v3043_v41 }
 0x2c2   :  { %v3091_v34 = vmul.f32 0.70710677, %v363_v33 }
 0x2c3   :  { %v3104_v47 = vpop.f32.mrf.mxu1 }
 0x2c4   :  { %v369_v36 = vrot.slane %v3091_v34, 7  ;;  %v593_v48 = vpack.c.bf16 %v3104_v47, %v3104_v47 }
 0x2c6   :  { %v374_v37 = vsel %vm189_vm9, 0.0, %v369_v36  ;;  %v371_v39 = vsel %vm189_vm9, %v369_v36, %v370_v35 }
 0x2c7   :  { %v375_v25 = vsel %vm196_vm10, %v371_v39, 0.0 }
 0x2c8   :  { %v381_v43 = vpack.c.bf16 %v375_v25, %v374_v37 }
 0x2ca   :  { %2324 = vmatmul.msk.bf16.vlgmr.msrb.gmra.mxu1 %vm169_vm8, %v381_v43  ;;  %v462_v0 = vrot.slane %v381_v43, 1  ;;  %v421_v42 = vshll.u32 %v381_v43, 16  ;;  %v419_v41 = vshrl.u32 %v381_v43, 16 }
 0x2cc   :  { %2342 = vmatmul.msk.bf16.vlgmr.msra.gmra.mxu3 %vm169_vm8, %v462_v0  ;;  %v423_v44 = vrot.slane %v421_v42, 1 }
 0x2ce   :  { %v424_v45 = vor.u32 %v423_v44, %v419_v41 }
 0x2d0   :  { %2333 = vmatmul.msk.bf16.vlgmr.msra.gmra.mxu2 %vm169_vm8, %v424_v45 }
 0x2da   :  { %2370 = vmatmul.msk.bf16.vlgmr.msra.gmra.mxu1 %vm169_vm8, %v593_v48  ;;  %v2687_v48 = vld [vmem:[#allocation2 + $0x68] sm:$0xff] }
 0x2db   :  { %654 = vmatpush.bf16.msrb.mxu2 %v2687_v48 }
 0x347   :  { %v406_v49 = vpop.f32.mrf.mxu1 }
 0x348   :  { %v412_v51 = vadd.f32 %v3110_v50, %v406_v49  ;;  %v2689_v49 = vld [vmem:[#allocation2 + $0x78] sm:$0xff] }
 0x349   :  { %697 = vmatpush.bf16.msrb.mxu3 %v2689_v49  ;;  %v661_v49 = vperm.slane %v3037_v38, 7 }
 0x34f   :  { %v487_v52 = vpop.f32.mrf.mxu3  ;;  %v408_v57 = vpop.f32.mrf.mxu1 }
 0x350   :  { %v413_v61 = vadd.f32 %v3110_v50, %v408_v57 }
 0x353   :  { %v449_v53 = vpop.f32.mrf.mxu2 }
 0x354   :  { %v454_v54 = vadd.f32 %v449_v53, %v412_v51  ;;  %v2686_v53 = vld [vmem:[#allocation2 + $0x60] sm:$0xff] }
 0x355   :  { %655 = vmatpush.bf16.msrb.mxu2 %v2686_v53 }
 0x356   :  { %v3113_v55 = vadd.f32 %v487_v52, %v454_v54  ;;  %v2688_v54 = vld [vmem:[#allocation2 + $0x70] sm:$0xff] }
 0x357   :  { %v489_v17 = vpop.f32.mrf.mxu3  ;;  %698 = vmatpush.bf16.msrb.mxu3 %v2688_v54 }
 0x358   :  { %v2343_v60 = vmul.f32 -1.442695, %v3113_v55 }
 0x35a   :  { %2760 = vpow2.f32 %v2343_v60 }
 0x35b   :  { %v451_v62 = vpop.f32.mrf.mxu2 }
 0x35c   :  { %v455_v63 = vadd.f32 %v451_v62, %v413_v61  ;;  %v594_v61 = vperm.slane %v3037_v38, 2  ;;  %v619_v62 = vpop.f32.mrf.mxu1 }
 0x35e   :  { %v3117_v1 = vadd.f32 %v489_v17, %v455_v63  ;;  %v3125_v63 = vadd.f32 %v619_v62, %v594_v61 }
 0x360   :  { %v2761_v16 = vpop.eup %2760  ;;  %v2344_v20 = vmul.f32 -1.442695, %v3117_v1  ;;  %v624_v17 = vrot.slane %v3125_v63, 6 }
 0x361   :  { %v500_v21 = vadd.f32 1.0, %v2761_v16 }
 0x362   :  { %2762 = vpow2.f32 %v2344_v20  ;;  %v626_v16 = vsel %vm91_vm0, 0.0, %v624_v17 }
 0x363   :  { %2764 = vrcp.f32 %v500_v21  ;;  %v513_v33 = vand.u32 2147483648, %v500_v21  ;;  %v511_v36 = vand.u32 2147483647, %v500_v21  ;;  %vm507_vm14 = vweird.f32 %v500_v21 }
 0x364   :  { %v632_v20 = vpack.c.bf16 %v626_v16, %v626_v16 }
 0x365   :  { %v514_v25 = vor.u32 1.1754944e-38, %v513_v33  ;;  %vm512_vm2 = vcmp.eq.f32.partialorder %v511_v36, 8.507059e+37  ;;  %v2683_v33 = vld [vmem:[%s3470_s3 + $0x18] sm:$0xff]  ;;  %v2691_v36 = vld [vmem:[#allocation2 + $0x88] sm:$0xff] }
 0x366   :  { %2379 = vmatmul.msk.bf16.vlgmr.msrb.gmra.mxu2 %vm169_vm8, %v632_v20  ;;  %574 = vmatpush.bf16.msrb.mxu0 %v2683_v33 }
 0x368   :  { %v2763_v23 = vpop.eup %2762 }
 0x369   :  { %v2765_v26 = vpop.eup %2764  ;;  %v501_v27 = vadd.f32 1.0, %v2763_v23 }
 0x36a   :  { %v503_v28 = vmul.f32 %v2765_v26, %v500_v21  ;;  %vm508_vm13 = vweird.f32 %v2765_v26  ;;  %v668_v21 = vpack.c.bf16 %v624_v17, %v626_v16 }
 0x36b   :  { %2766 = vrcp.f32 %v501_v27  ;;  %vm509_vm15 = vmor %vm507_vm14, %vm508_vm13  ;;  %v528_v44 = vand.u32 2147483648, %v501_v27  ;;  %v526_v46 = vand.u32 2147483647, %v501_v27  ;;  %vm522_vm6 = vweird.f32 %v501_v27 }
 0x36c   :  { %v504_v31 = vsub.f32 1.0, %v503_v28  ;;  %v670_v23 = vshrl.u32 %v668_v21, 16  ;;  %v711_v48 = vrot.slane %v668_v21, 1  ;;  %vm3475_vm13 = vcmask 1045504  }
 0x36d   :  { %v529_v52 = vor.u32 1.1754944e-38, %v528_v44  ;;  %vm527_vm12 = vcmp.eq.f32.partialorder %v526_v46, 8.507059e+37 }
 0x36e   :  { %v505_v35 = vmul.f32 %v2765_v26, %v504_v31 }
 0x370   :  { %v506_v37 = vadd.f32 %v2765_v26, %v505_v35  ;;  %v2682_v35 = vld [vmem:[%s3470_s3 + $0x10] sm:$0xff] }
 0x371   :  { %v2767_v39 = vpop.eup %2766  ;;  %575 = vmatpush.bf16.msrb.mxu0 %v2682_v35  ;;  %v2697_v35 = vld [vmem:[#allocation2 + $0x98] sm:$0xff] }
 0x372   :  { %v510_v43 = vsel %vm509_vm15, %v2765_v26, %v506_v37  ;;  %v518_v0 = vmul.f32 %v2767_v39, %v501_v27  ;;  %vm523_vm4 = vweird.f32 %v2767_v39  ;;  %v672_v26 = vshll.u32 %v668_v21, 16  ;;  %v621_v27 = vpop.f32.mrf.mxu1  ;;  %v2690_v37 = vld [vmem:[#allocation2 + $0x80] sm:$0xff] }
 0x373   :  { %v515_v42 = vsel %vm512_vm2, %v514_v25, %v510_v43  ;;  %vm524_vm11 = vmor %vm522_vm6, %vm523_vm4  ;;  %vm822_vm6 = vcmask 97280  }
 0x374   :  { %534 = vrot.lane.b32.xlu2 %v515_v42, %s2848_s1  ;;  %v519_v41 = vsub.f32 1.0, %v518_v0  ;;  %v674_v28 = vrot.slane %v672_v26, 1 }
 0x375   :  { %733 = vmatpush.bf16.msra.mxu0 %v2691_v36 }
 0x376   :  { %v520_v45 = vmul.f32 %v2767_v39, %v519_v41  ;;  %v675_v31 = vor.u32 %v674_v28, %v670_v23  ;;  %v3157_v28 = vld [vmem:[%s3470_s3 + $0x38] sm:$0xff] }
 0x377   :  { %793 = vmatpush.bf16.msrb.mxu1 %v3157_v28 }
 0x378   :  { %v521_v51 = vadd.f32 %v2767_v39, %v520_v45  ;;  %2388 = vmatmul.msk.bf16.vlgmr.msrb.gmra.mxu3 %vm169_vm8, %v675_v31 }
 0x379   :  { %734 = vmatpush.bf16.msra.mxu0 %v2690_v37 }
 0x37a   :  { %v525_v57 = vsel %vm524_vm11, %v2767_v39, %v521_v51 }
 0x37b   :  { %v530_v60 = vsel %vm527_vm12, %v529_v52, %v525_v57 }
 0x37c   :  { %536 = vrot.lane.b32.xlu0 %v530_v60, %s2848_s1 }
 0x3ce   :  { %v535_v39 = vpop.permute.xlu2 %534 }
 0x3cf   :  { %v540_v25 = vmul.f32 %v535_v39, %v3113_v55 }
 0x3d1   :  { %v542_v0 = vadd.f32 %v540_v25, %v3091_v34 }
 0x3d3   :  { %v544_v44 = vmul.f32 0.70710677, %v542_v0 }
 0x3e9   :  { %v657_v51 = vpop.f32.mrf.mxu2 }
 0x3ea   :  { %v662_v55 = vadd.f32 %v661_v49, %v657_v51 }
 0x3ee   :  { %v537_v43 = vpop.permute.xlu0 %536 }
 0x3ef   :  { %v541_v42 = vmul.f32 %v537_v43, %v3117_v1 }
 0x3f1   :  { %v543_v41 = vadd.f32 %v541_v42, %v3088_v32  ;;  %v659_v53 = vpop.f32.mrf.mxu2  ;;  %v3147_v32 = vperm.slane %v3037_v38, 1 }
 0x3f3   :  { %v545_v45 = vmul.f32 0.70710677, %v543_v41 }
 0x3f5   :  { %v551_v46 = vpack.c.bf16 %v545_v45, %v544_v44 }
 0x3f7   :  { %2357 = vmatmul.msk.bf16.vlgmr.msrb.gmra.mxu0 %vm169_vm8, %v551_v46 }
 0x3fb   :  { %v700_v52 = vpop.f32.mrf.mxu3 }
 0x3fc   :  { %v704_v34 = vadd.f32 %v700_v52, %v662_v55  ;;  %v2696_v52 = vld [vmem:[#allocation2 + $0x90] sm:$0xff] }
 0x403   :  { %v702_v1 = vpop.f32.mrf.mxu3 }
 0x407   :  { %2397 = vmatmul.msk.bf16.vlgmr.msra.gmra.mxu0 %vm169_vm8, %v711_v48 }
 0x474   :  { %v577_v54 = vpop.f32.mrf.mxu0 }
 0x475   :  { %v578_v57 = vadd.f32 %v577_v54, %v3147_v32  ;;  %v2699_v54 = vld [vmem:[#allocation2 + $0xa8] sm:$0xff] }
 0x477   :  { %v582_v62 = vadd.f32 %v578_v57, %v3027_v29 }
 0x479   :  { %v584_v21 = vmul.f32 0.70710677, %v582_v62 }
 0x47c   :  { %v579_v60 = vpop.f32.mrf.mxu0 }
 0x47d   :  { %v580_v17 = vadd.f32 %v579_v60, %v3147_v32  ;;  %v3174_v60 = vperm.slane %v3037_v38, 3 }
 0x47f   :  { %v583_v16 = vadd.f32 %v580_v17, %v3029_v30  ;;  %v586_v20 = vpack.c.bf16 %v580_v17, %v578_v57  ;;  %v3164_v30 = vld [vmem:[%s3470_s3 + $0x30] sm:$0xff]  ;;  %v2698_v57 = vld [vmem:[#allocation2 + $0xa0] sm:$0xff] }
 0x480   :  { %794 = vmatpush.bf16.msrb.mxu1 %v3164_v30 }
 0x481   :  { %v585_v23 = vmul.f32 0.70710677, %v583_v16  ;;  %v807_v26 = vsel %vm169_vm8, %v586_v20, 0 }
 0x482   :  { %816 = vmatpush.bf16.xpose.msra.mxu2 %v807_v26 }
 0x483   :  { %v587_v27 = vpack.c.bf16 %v585_v23, %v584_v21 }
 0x484   :  { %v736_v31 = vpop.f32.mrf.mxu0  ;;  %939 = vmatpush.bf16.msra.mxu1 %v2697_v35 }
 0x485   :  { %v740_v33 = vadd.f32 %v736_v31, %v704_v34  ;;  %v854_v29 = vsel %vm3475_vm13, %v587_v27, 0 }
 0x486   :  { %863 = vmatpush.bf16.msra.mxu3 %v854_v29 }
 0x487   :  { %v2398_v36 = vmul.f32 -1.442695, %v740_v33 }
 0x488   :  { %940 = vmatpush.bf16.msra.mxu1 %v2696_v52 }
 0x489   :  { %2768 = vpow2.f32 %v2398_v36 }
 0x48a   :  { %982 = vmatpush.bf16.msrb.mxu2 %v2699_v54 }
 0x48c   :  { %v738_v37 = vpop.f32.mrf.mxu0 }
 0x48e   :  { %983 = vmatpush.bf16.msrb.mxu2 %v2698_v57  ;;  %v2701_v57 = vld [vmem:[#allocation2 + $0xb8] sm:$0xff] }
 0x48f   :  { %v2769_v39 = vpop.eup %2768  ;;  %1018 = vmatpush.bf16.msrb.mxu3 %v2701_v57 }
 0x490   :  { %v744_v25 = vadd.f32 1.0, %v2769_v39 }
 0x492   :  { %2770 = vrcp.f32 %v744_v25  ;;  %v756_v41 = vand.u32 2147483648, %v744_v25  ;;  %v754_v45 = vand.u32 2147483647, %v744_v25  ;;  %vm750_vm15 = vweird.f32 %v744_v25 }
 0x494   :  { %v757_v48 = vor.u32 1.1754944e-38, %v756_v41  ;;  %vm755_vm4 = vcmp.eq.f32.partialorder %v754_v45, 8.507059e+37 }
 0x498   :  { %v2771_v43 = vpop.eup %2770 }
 0x499   :  { %v746_v0 = vmul.f32 %v2771_v43, %v744_v25  ;;  %vm751_vm14 = vweird.f32 %v2771_v43  ;;  %v2695_v25 = vld [vmem:[%s3470_s3 + $0x48] sm:$0xff] }
 0x49a   :  { %vm752_vm2 = vmor %vm750_vm15, %vm751_vm14  ;;  %897 = vmatpush.bf16.msrb.mxu0 %v2695_v25 }
 0x49b   :  { %v747_v42 = vsub.f32 1.0, %v746_v0 }
 0x49d   :  { %v748_v44 = vmul.f32 %v2771_v43, %v747_v42 }
 0x49f   :  { %v749_v46 = vadd.f32 %v2771_v43, %v748_v44 }
 0x4a1   :  { %v753_v51 = vsel %vm752_vm2, %v2771_v43, %v749_v46 }
 0x4a2   :  { %v758_v55 = vsel %vm755_vm4, %v757_v48, %v753_v51 }
 0x4a3   :  { %761 = vrot.lane.b32.xlu1 %v758_v55, %s2848_s1 }
 0x515   :  { %v762_v34 = vpop.permute.xlu1 %761 }
 0x516   :  { %v3168_v53 = vmul.f32 %v762_v34, %v740_v33 }
 0x518   :  { %v770_v1 = vpack.c.bf16 %v3168_v53, %v3168_v53 }
 0x51a   :  { %2411 = vmatmul.msk.bf16.vlgmr.msrb.gmra.mxu1 %vm169_vm8, %v770_v1 }
 0x51b   :  { %1080 = vmatpush.bf16.xpose.msrb.mxu1 %v807_v26 }
 0x597   :  { %v796_v62 = vpop.f32.mrf.mxu1 }
 0x598   :  { %v797_v17 = vadd.f32 %v796_v62, %v3174_v60  ;;  %v2700_v62 = vld [vmem:[#allocation2 + $0xb0] sm:$0xff] }
 0x599   :  { %1019 = vmatpush.bf16.msrb.mxu3 %v2700_v62 }
 0x59a   :  { %v800_v16 = vadd.f32 %v797_v17, %v3104_v47  ;;  %v3192_v17 = vperm.slane %v3037_v38, 4 }
 0x59c   :  { %v801_v20 = vmul.f32 0.70710677, %v800_v16 }
 0x59e   :  { %v802_v21 = vpack.c.bf16 %v801_v20, %v801_v20 }
 0x59f   :  { %v798_v23 = vpop.f32.mrf.mxu1 }
 0x5a0   :  { %2412 = vmatmul.msk.bf16.vlgmr.msra.gmra.mxu2 %vm169_vm8, %v802_v21 }
 0x5a1   :  { %1122 = vmatpush.bf16.msra.mxu2 %v854_v29  ;;  %v2694_v29 = vld [vmem:[%s3470_s3 + $0x40] sm:$0xff] }
 0x5a2   :  { %898 = vmatpush.bf16.msrb.mxu0 %v2694_v29 }
 0x5a6   :  { %1060 = vmatpush.bf16.msra.mxu0 %v3157_v28 }
 0x5aa   :  { %1061 = vmatpush.bf16.msra.mxu0 %v3164_v30 }
 0x623   :  { %v818_v26 = vpop.f32.mrf.mxu2 }
 0x624   :  { %v823_v27 = vsel %vm822_vm6, %v818_v26, -inf }
 0x625   :  { %824 = vmax.xlane.f32.xlu2 %v823_v27 }
 0x62b   :  { %v820_v31 = vpop.f32.mrf.mxu2 }
 0x698   :  { %v825_v33 = vpop.xlane.xlu2 %824 }
 0x699   :  { %v826_v35 = vsub.f32 %v818_v26, %v825_v33 }
 0x69b   :  { %v827_v36 = vmul.f32 1.442695, %v826_v35 }
 0x69d   :  { %2772 = vpow2.f32 %v827_v36 }
 0x6a3   :  { %v2773_v37 = vpop.eup %2772 }
 0x6a4   :  { %v829_v39 = vsel %vm822_vm6, %v2773_v37, 0.0 }
 0x6a5   :  { %830 = vadd.xlane.f32.xlu0 %v829_v39 }
 0x718   :  { %v831_v43 = vpop.xlane.xlu0 %830 }
 0x719   :  { %2774 = vrcp.f32 %v831_v43  ;;  %v843_v44 = vand.u32 2147483648, %v831_v43  ;;  %v841_v46 = vand.u32 2147483647, %v831_v43  ;;  %vm837_vm12 = vweird.f32 %v831_v43 }
 0x71b   :  { %v844_v51 = vor.u32 1.1754944e-38, %v843_v44  ;;  %vm842_vm15 = vcmp.eq.f32.partialorder %v841_v46, 8.507059e+37 }
 0x71f   :  { %v2775_v0 = vpop.eup %2774 }
 0x720   :  { %v833_v42 = vmul.f32 %v2775_v0, %v831_v43  ;;  %vm838_vm11 = vweird.f32 %v2775_v0 }
 0x721   :  { %vm839_vm14 = vmor %vm837_vm12, %vm838_vm11 }
 0x722   :  { %v834_v41 = vsub.f32 1.0, %v833_v42 }
 0x724   :  { %v835_v45 = vmul.f32 %v2775_v0, %v834_v41 }
 0x726   :  { %v836_v48 = vadd.f32 %v2775_v0, %v835_v45 }
 0x728   :  { %v840_v55 = vsel %vm839_vm14, %v2775_v0, %v836_v48 }
 0x729   :  { %v845_v52 = vsel %vm842_vm15, %v844_v51, %v840_v55 }
 0x72a   :  { %v847_v34 = vmul.f32 %v2773_v37, %v845_v52 }
 0x72c   :  { %v848_v28 = vpack.c.bf16 %v847_v34, %v847_v34 }
 0x72e   :  { %2413 = vmatmul.msk.bf16.vlgmr.msra.gmra.mxu3 %vm822_vm6, %v848_v28 }
 0x72f   :  { %1138 = vmatpush.bf16.msra.mxu3 %v2695_v25 }
 0x733   :  { %1139 = vmatpush.bf16.msra.mxu3 %v2694_v29 }
 0x7b1   :  { %v865_v1 = vpop.f32.mrf.mxu3 }
 0x7b2   :  { %v874_v30 = vpack.c.bf16 %v865_v1, %v865_v1 }
 0x7b4   :  { %2426 = vmatmul.msk.bf16.vlgmr.msrb.gmra.mxu0 %vm169_vm8, %v874_v30 }
 0x7b9   :  { %v867_v54 = vpop.f32.mrf.mxu3 }
 0x831   :  { %v900_v16 = vpop.f32.mrf.mxu0 }
 0x832   :  { %v901_v20 = vadd.f32 %v900_v16, %v3192_v17 }
 0x834   :  { %v904_v21 = vadd.f32 %v901_v20, %v3168_v53 }
 0x836   :  { %v905_v23 = vmul.f32 0.70710677, %v904_v21 }
 0x838   :  { %v906_v26 = vadd.f32 %v905_v23, %v3125_v63 }
 0x839   :  { %v902_v27 = vpop.f32.mrf.mxu0 }
 0x83a   :  { %v3197_v31 = vmul.f32 0.70710677, %v906_v26  ;;  %v2849_v27 = vmov 1  }
 0x83b   :  { %2750 = vset.pattern.permute.xlu0 %v2849_v27  ;;  %2749 = vset.pattern.permute.xlu2 %v2849_v27 }
 0x83c   :  { %v909_v33 = vrot.slane %v3197_v31, 6  ;;  %1190 = vperm.xlu0 %2750, %v2926_v6   ;;  %2751 = vset.pattern.permute.xlu1 %v2849_v27  ;;  %v2710_v27 = vld [vmem:[#allocation2 + $0x20] sm:$0xff] }
 0x83e   :  { %v911_v35 = vsel %vm91_vm0, 0.0, %v909_v33 }
 0x83f   :  { %v917_v36 = vpack.c.bf16 %v911_v35, %v911_v35  ;;  %v953_v37 = vpack.c.bf16 %v909_v33, %v911_v35 }
 0x841   :  { %v957_v39 = vshll.u32 %v953_v37, 16  ;;  %2435 = vmatmul.msk.bf16.vlgmr.msra.gmra.mxu1 %vm169_vm8, %v917_v36  ;;  %v996_v25 = vrot.slane %v953_v37, 1  ;;  %v955_v53 = vshrl.u32 %v953_v37, 16 }
 0x842   :  { %2470 = vmatpush.msk.msra.mxu1 %vm91_vm0, %v2899_v2 }
 0x843   :  { %2453 = vmatmul.msk.bf16.vlgmr.msrb.gmra.mxu3 %vm169_vm8, %v996_v25  ;;  %v959_v63 = vrot.slane %v957_v39, 1  ;;  %v2816_v39 = vld [vmem:[%s3467_s0] sm:$0xff] }
 0x844   :  { %1210 = vmatpush.msra.mxu1 %v2906_v3  ;;  %1285 = vmatpush.bf16.msrb.mxu3 %v2705_v24 }
 0x845   :  { %v960_v29 = vor.u32 %v959_v63, %v955_v53 }
 0x846   :  { %1211 = vmatpush.msra.mxu1 %v2911_v4 }
 0x847   :  { %2444 = vmatmul.msk.bf16.vlgmr.msrb.gmra.mxu2 %vm169_vm8, %v960_v29 }
 0x848   :  { %1212 = vmatpush.msra.mxu1 %v2919_v5  ;;  %2474 = vmatpush.msk.msrb.mxu2 %vm91_vm0, %v2899_v2 }
 0x84a   :  { %1213 = vmatpush.msra.mxu1 %v2931_v7  ;;  %1243 = vmatpush.msrb.mxu2 %v2906_v3  ;;  %v3235_v3 = vld [vmem:[%s3473_s6 + $0x8] sm:$0x3] }
 0x84c   :  { %1214 = vmatpush.msra.mxu1 %v2938_v8  ;;  %1244 = vmatpush.msrb.mxu2 %v2911_v4  ;;  %v946_v4 = vperm.slane %v3235_v3, 0 }
 0x84e   :  { %1215 = vmatpush.msra.mxu1 %v2946_v9  ;;  %1245 = vmatpush.msrb.mxu2 %v2919_v5 }
 0x850   :  { %1216 = vmatpush.msra.mxu1 %v2953_v10  ;;  %1246 = vmatpush.msrb.mxu2 %v2931_v7 }
 0x852   :  { %1217 = vmatpush.msra.mxu1 %v2960_v11  ;;  %1247 = vmatpush.msrb.mxu2 %v2938_v8 }
 0x854   :  { %1218 = vmatpush.msra.mxu1 %v2967_v12  ;;  %1248 = vmatpush.msrb.mxu2 %v2946_v9 }
 0x856   :  { %1219 = vmatpush.msra.mxu1 %v2974_v13  ;;  %1249 = vmatpush.msrb.mxu2 %v2953_v10 }
 0x858   :  { %1220 = vmatpush.msra.mxu1 %v2984_v14  ;;  %1250 = vmatpush.msrb.mxu2 %v2960_v11 }
 0x85a   :  { %1221 = vmatpush.msra.mxu1 %v2991_v15  ;;  %1251 = vmatpush.msrb.mxu2 %v2967_v12 }
 0x85c   :  { %1252 = vmatpush.msrb.mxu2 %v2974_v13 }
 0x85e   :  { %1253 = vmatpush.msrb.mxu2 %v2984_v14 }
 0x860   :  { %1254 = vmatpush.msrb.mxu2 %v2991_v15 }
 0x8ae   :  { %v1191_v29 = vpop.permute.xlu0 %1190 }
 0x8be   :  { %v942_v2 = vpop.f32.mrf.mxu1 }
 0x8bf   :  { %v947_v8 = vadd.f32 %v946_v4, %v942_v2 }
 0x8c6   :  { %v944_v5 = vpop.f32.mrf.mxu1  ;;  %v1021_v7 = vpop.f32.mrf.mxu3 }
 0x8ca   :  { %v985_v9 = vpop.f32.mrf.mxu2 }
 0x8cb   :  { %v989_v10 = vadd.f32 %v985_v9, %v947_v8 }
 0x8cd   :  { %v1025_v11 = vadd.f32 %v1021_v7, %v989_v10 }
 0x8ce   :  { %v1023_v12 = vpop.f32.mrf.mxu3 }
 0x8cf   :  { %v2454_v13 = vmul.f32 -1.442695, %v1025_v11 }
 0x8d1   :  { %2776 = vpow2.f32 %v2454_v13 }
 0x8d2   :  { %v987_v14 = vpop.f32.mrf.mxu2 }
 0x8d7   :  { %v2777_v15 = vpop.eup %2776 }
 0x8d8   :  { %v1029_v43 = vadd.f32 1.0, %v2777_v15 }
 0x8da   :  { %2778 = vrcp.f32 %v1029_v43  ;;  %v1041_v44 = vand.u32 2147483648, %v1029_v43  ;;  %v1039_v46 = vand.u32 2147483647, %v1029_v43  ;;  %vm1035_vm4 = vweird.f32 %v1029_v43 }
 0x8dc   :  { %v1042_v51 = vor.u32 1.1754944e-38, %v1041_v44  ;;  %vm1040_vm12 = vcmp.eq.f32.partialorder %v1039_v46, 8.507059e+37 }
 0x8e0   :  { %v2779_v0 = vpop.eup %2778 }
 0x8e1   :  { %v1031_v42 = vmul.f32 %v2779_v0, %v1029_v43  ;;  %vm1036_vm2 = vweird.f32 %v2779_v0  ;;  %v2704_v43 = vld [vmem:[%s3470_s3] sm:$0xff] }
 0x8e2   :  { %vm1037_vm11 = vmor %vm1035_vm4, %vm1036_vm2  ;;  %vm1193_vm2 = vcmp.eq.s32.totalorder %v2997_v18, %v1191_v29  ;;  %1286 = vmatpush.bf16.msrb.mxu3 %v2704_v43 }
 0x8e3   :  { %v1032_v41 = vsub.f32 1.0, %v1031_v42 }
 0x8e5   :  { %v1033_v45 = vmul.f32 %v2779_v0, %v1032_v41 }
 0x8e7   :  { %v1034_v48 = vadd.f32 %v2779_v0, %v1033_v45 }
 0x8e9   :  { %v1038_v55 = vsel %vm1037_vm11, %v2779_v0, %v1034_v48  ;;  %v2703_v48 = vld [vmem:[%s3472_s5 + $0x8] sm:$0xff] }
 0x8ea   :  { %v1043_v52 = vsel %vm1040_vm12, %v1042_v51, %v1038_v55  ;;  %vm1195_vm12 = vmor %vm1193_vm2, %vm77_vm5  ;;  %1176 = vmatpush.bf16.msrb.mxu0 %v2703_v48  ;;  %v2702_v51 = vld [vmem:[%s3472_s5] sm:$0xff]  ;;  %v2707_v55 = vld [vmem:[#allocation2 + $0x8] sm:$0xff] }
 0x8eb   :  { %1046 = vrot.lane.b32.xlu1 %v1043_v52, %s2848_s1  ;;  %v2469_v12 = vsel %vm1195_vm12, 1.0, %v2847_v22  ;;  %v2706_v52 = vld [vmem:[#allocation2] sm:$0xff] }
 0x8ee   :  { %1177 = vmatpush.bf16.msrb.mxu0 %v2702_v51 }
 0x95d   :  { %v1047_v34 = vpop.permute.xlu1 %1046 }
 0x95e   :  { %v3241_v28 = vmul.f32 %v1047_v34, %v1025_v11  ;;  %v2709_v34 = vld [vmem:[#allocation2 + $0x18] sm:$0xff] }
 0x960   :  { %v1050_v1 = vpack.c.bf16 %v3241_v28, %v3241_v28 }
 0x962   :  { %2455 = vmatmul.msk.bf16.vlgmr.msra.gmra.mxu0 %vm169_vm8, %v1050_v1 }
 0x963   :  { %1328 = vmatpush.bf16.msra.mxu0 %v2707_v55 }
 0x967   :  { %1329 = vmatpush.bf16.msra.mxu0 %v2706_v52 }
 0x9df   :  { %v1063_v30 = vpop.f32.mrf.mxu0 }
 0x9e0   :  { %v1064_v54 = vadd.f32 %v1063_v30, %v3174_v60 }
 0x9e2   :  { %v1067_v57 = vadd.f32 %v1064_v54, %v3104_v47  ;;  %v2708_v54 = vld [vmem:[#allocation2 + $0x10] sm:$0xff] }
 0x9e4   :  { %v1068_v62 = vmul.f32 0.70710677, %v1067_v57 }
 0x9e6   :  { %v1069_v16 = vpack.c.bf16 %v1068_v62, %v1068_v62 }
 0x9e7   :  { %v1065_v20 = vpop.f32.mrf.mxu0 }
 0x9e8   :  { %2456 = vmatmul.msk.bf16.vlgmr.msrb.gmra.mxu1 %vm169_vm8, %v1069_v16 }
 0xa65   :  { %v1082_v21 = vpop.f32.mrf.mxu1 }
 0xa66   :  { %v1086_v23 = vsel %vm822_vm6, %v1082_v21, -inf }
 0xa67   :  { %1087 = vmax.xlane.f32.xlu1 %v1086_v23  ;;  %v2711_v23 = vld [vmem:[#allocation2 + $0x28] sm:$0xff] }
 0xa6d   :  { %v1084_v26 = vpop.f32.mrf.mxu1 }
 0xa80   :  { %1230 = vperm.xlu1 %2751, %v3059_v56  }
 0xada   :  { %v1088_v33 = vpop.xlane.xlu1 %1087 }
 0xadb   :  { %v1089_v47 = vsub.f32 %v1082_v21, %v1088_v33 }
 0xadd   :  { %v1090_v35 = vmul.f32 1.442695, %v1089_v47 }
 0xadf   :  { %2780 = vpow2.f32 %v1090_v35 }
 0xae5   :  { %v2781_v36 = vpop.eup %2780 }
 0xae6   :  { %v1092_v37 = vsel %vm822_vm6, %v2781_v36, 0.0 }
 0xae7   :  { %1093 = vadd.xlane.f32.xlu2 %v1092_v37 }
 0xaff   :  { %1187 = vperm.xlu2 %2749, %v2816_v39  }
 0xb5a   :  { %v1094_v25 = vpop.xlane.xlu2 %1093 }
 0xb5b   :  { %2782 = vrcp.f32 %v1094_v25  ;;  %v1106_v2 = vand.u32 2147483648, %v1094_v25  ;;  %v1104_v8 = vand.u32 2147483647, %v1094_v25  ;;  %vm1100_vm11 = vweird.f32 %v1094_v25 }
 0xb5d   :  { %v1107_v10 = vor.u32 1.1754944e-38, %v1106_v2  ;;  %v1154_v2 = vperm.slane %v3235_v3, 1 }
 0xb61   :  { %v2783_v53 = vpop.eup %2782 }
 0xb62   :  { %v1096_v6 = vmul.f32 %v2783_v53, %v1094_v25  ;;  %v1188_v63 = vpop.permute.xlu2 %1187  ;;  %vm1101_vm4 = vweird.f32 %v2783_v53 }
 0xb63   :  { %vm1192_vm14 = vcmp.eq.s32.totalorder %v2997_v18, %v1188_v63  ;;  %vm1102_vm13 = vmor %vm1100_vm11, %vm1101_vm4 }
 0xb64   :  { %v1097_v56 = vsub.f32 1.0, %v1096_v6  ;;  %vm1194_vm15 = vmor %vm1192_vm14, %vm76_vm1  ;;  %vm1105_vm1 = vcmp.eq.f32.partialorder %v1104_v8, 8.507059e+37 }
 0xb65   :  { %v2468_v5 = vsel %vm1194_vm15, 1.0, %v2847_v22 }
 0xb66   :  { %v1098_v7 = vmul.f32 %v2783_v53, %v1097_v56  ;;  %2471 = vmatmul.msk.f32.vlgmr.msra.gmra.mxu1 %vm84_vm3, %v2468_v5 }
 0xb68   :  { %v1099_v9 = vadd.f32 %v2783_v53, %v1098_v7 }
 0xb6a   :  { %v1103_v19 = vsel %vm1102_vm13, %v2783_v53, %v1099_v9 }
 0xb6b   :  { %v1108_v11 = vsel %vm1105_vm1, %v1107_v10, %v1103_v19 }
 0xb6c   :  { %v1110_v13 = vmul.f32 %v2781_v36, %v1108_v11 }
 0xb6e   :  { %v1183_v14 = vsel %vm822_vm6, %v1110_v13, 0.0  ;;  %v1111_v15 = vpack.c.bf16 %v1110_v13, %v1110_v13  ;;  %2472 = vmatmul.msk.f32.gmra.mxu1 %vm84_vm3, %v2469_v12 }
 0xb6f   :  { %1185 = vst [vmem:[%s3474_s7 + $0x8] sm:$0xff] %v1183_v14 }
 0xb70   :  { %2457 = vmatmul.msk.bf16.vlgmr.msra.gmra.mxu2 %vm822_vm6, %v1111_v15 }
 0xbe3   :  { %v3280_v41 = vpop.f32.mrf.mxu1 }
 0xbeb   :  { %v3282_v45 = vpop.f32.mrf.mxu1 }
 0xbec   :  { %v1263_v46 = vpack.c.bf16 %v3282_v45, %v3280_v41 }
 0xbf3   :  { %v1124_v0 = vpop.f32.mrf.mxu2 }
 0xbf4   :  { %v1128_v42 = vpack.c.bf16 %v1124_v0, %v1124_v0 }
 0xbf6   :  { %2458 = vmatmul.msk.bf16.vlgmr.msra.gmra.mxu3 %vm169_vm8, %v1128_v42  ;;  %v1231_v42 = vpop.permute.xlu1 %1230 }
 0xbf7   :  { %1369 = vmatpush.bf16.msra.mxu3 %v2709_v34  ;;  %vm1232_vm5 = vcmp.eq.s32.totalorder %v2997_v18, %v1231_v42 }
 0xbf8   :  { %vm1233_vm13 = vmor %vm1232_vm5, %vm124_vm7 }
 0xbf9   :  { %v2473_v48 = vsel %vm1233_vm13, 1.0, %v2847_v22 }
 0xbfa   :  { %2475 = vmatmul.msk.f32.vlgmr.msrb.gmra.mxu2 %vm84_vm3, %v2473_v48 }
 0xbfb   :  { %v1126_v44 = vpop.f32.mrf.mxu2  ;;  %1370 = vmatpush.bf16.msra.mxu3 %v2708_v54 }
 0xc06   :  { %2484 = vmatmul.msk.bf16.vlgmr.msrb.gmra.mxu3 %vm169_vm8, %v1263_v46 }
 0xc79   :  { %v1141_v1 = vpop.f32.mrf.mxu3 }
 0xc7a   :  { %v1142_v30 = vadd.f32 %v1141_v1, %v3192_v17 }
 0xc7c   :  { %v1145_v57 = vadd.f32 %v1142_v30, %v3241_v28 }
 0xc7e   :  { %v1146_v62 = vmul.f32 0.70710677, %v1145_v57 }
 0xc80   :  { %v1147_v16 = vadd.f32 %v1146_v62, %v3197_v31 }
 0xc81   :  { %v1143_v20 = vpop.f32.mrf.mxu3 }
 0xc82   :  { %v1148_v21 = vmul.f32 0.70710677, %v1147_v16 }
 0xc84   :  { %v1153_v26 = vpack.c.bf16 %v1148_v21, %v1148_v21 }
 0xc86   :  { %2467 = vmatmul.msk.bf16.vlgmr.msrb.gmra.mxu0 %vm169_vm8, %v1153_v26 }
 0xc87   :  { %1406 = vmatpush.bf16.msrb.mxu0 %v2711_v23 }
 0xc89   :  { %v1288_v33 = vpop.f32.mrf.mxu3 }
 0xc8a   :  { %v3298_v47 = vadd.f32 %v1288_v33, %v3040_v40 }
 0xc8b   :  { %1407 = vmatpush.bf16.msrb.mxu0 %v2710_v27 }
 0xc8c   :  { %v1295_v36 = vrot.slane %v3298_v47, 7 }
 0xc8e   :  { %v1300_v39 = vsel %vm189_vm9, 0.0, %v1295_v36 }
 0xc91   :  { %v1290_v35 = vpop.f32.mrf.mxu3 }
 0xc92   :  { %v3301_v28 = vadd.f32 %v1290_v35, %v3040_v40 }
 0xc94   :  { %v1296_v31 = vrot.slane %v3301_v28, 7 }
 0xc96   :  { %v1297_v37 = vsel %vm189_vm9, %v1295_v36, %v1296_v31 }
 0xc97   :  { %v1301_v25 = vsel %vm196_vm10, %v1297_v37, 0.0 }
 0xc98   :  { %v1306_v53 = vpack.c.bf16 %v1301_v25, %v1300_v39  ;;  %v2713_v25 = vld [vmem:[#allocation2 + $0x38] sm:$0xff] }
 0xc99   :  { %1503 = vmatpush.bf16.msra.mxu2 %v2713_v25 }
 0xc9a   :  { %2493 = vmatmul.msk.bf16.vlgmr.msra.gmra.mxu0 %vm169_vm8, %v1306_v53  ;;  %v1344_v6 = vshll.u32 %v1306_v53, 16  ;;  %v1342_v63 = vshrl.u32 %v1306_v53, 16  ;;  %v1384_v40 = vrot.slane %v1306_v53, 1  ;;  %v2717_v53 = vld [vmem:[#allocation2 + $0x58] sm:$0xff] }
 0xc9b   :  { %1581 = vmatpush.bf16.msrb.mxu3 %v2717_v53 }
 0xc9c   :  { %v1346_v29 = vrot.slane %v1344_v6, 1  ;;  %v2712_v6 = vld [vmem:[#allocation2 + $0x30] sm:$0xff] }
 0xc9d   :  { %1504 = vmatpush.bf16.msra.mxu2 %v2712_v6 }
 0xc9e   :  { %v1347_v56 = vor.u32 %v1346_v29, %v1342_v63  ;;  %v2715_v63 = vld [vmem:[#allocation2 + $0x48] sm:$0xff]  ;;  %v2716_v29 = vld [vmem:[#allocation2 + $0x50] sm:$0xff] }
 0xc9f   :  { %1544 = vmatpush.bf16.msrb.mxu1 %v2715_v63  ;;  %1582 = vmatpush.bf16.msrb.mxu3 %v2716_v29 }
 0xca0   :  { %2502 = vmatmul.msk.bf16.vlgmr.msra.gmra.mxu3 %vm169_vm8, %v1347_v56  ;;  %v2714_v56 = vld [vmem:[#allocation2 + $0x40] sm:$0xff] }
 0xca3   :  { %1545 = vmatpush.bf16.msrb.mxu1 %v2714_v56 }
 0xcaa   :  { %2511 = vmatmul.msk.bf16.vlgmr.msrb.gmra.mxu0 %vm169_vm8, %v1384_v40  ;;  %v2721_v40 = vld [vmem:[%s3470_s3 + $0x28] sm:$0xff] }
 0xcab   :  { %1709 = vmatpush.bf16.msrb.mxu2 %v2721_v40 }
 0xd03   :  { %v1179_v5 = vpop.f32.mrf.mxu0 }
 0xd04   :  { %v1180_v7 = vadd.f32 %v1179_v5, %v1154_v2  ;;  %v2720_v5 = vld [vmem:[%s3470_s3 + $0x20] sm:$0xff] }
 0xd05   :  { %1710 = vmatpush.bf16.msrb.mxu2 %v2720_v5 }
 0xd06   :  { %1184 = vst [vmem:[%s3474_s7] sm:$0xff] %v1180_v7 }
 0xd0b   :  { %v1181_v8 = vpop.f32.mrf.mxu0 }
 0xd17   :  { %v1331_v9 = vpop.f32.mrf.mxu0 }
 0xd18   :  { %v1336_v11 = vadd.f32 %v1331_v9, %v3063_v59 }
 0xd1f   :  { %v1333_v10 = vpop.f32.mrf.mxu0 }
 0xd20   :  { %v1337_v43 = vadd.f32 %v1333_v10, %v3063_v59 }
 0xd23   :  { %v1372_v19 = vpop.f32.mrf.mxu3 }
 0xd24   :  { %v1377_v12 = vadd.f32 %v1372_v19, %v1336_v11 }
 0xd27   :  { %v1409_v13 = vpop.f32.mrf.mxu0 }
 0xd28   :  { %v3318_v14 = vadd.f32 %v1409_v13, %v1377_v12 }
 0xd2a   :  { %v2512_v15 = vmul.f32 -1.442695, %v3318_v14 }
 0xd2b   :  { %v1374_v24 = vpop.f32.mrf.mxu3 }
 0xd2c   :  { %2784 = vpow2.f32 %v2512_v15  ;;  %v1378_v0 = vadd.f32 %v1374_v24, %v1337_v43 }
 0xd2f   :  { %v1411_v44 = vpop.f32.mrf.mxu0 }
 0xd30   :  { %v1415_v46 = vadd.f32 %v1411_v44, %v1378_v0 }
 0xd32   :  { %v2785_v51 = vpop.eup %2784  ;;  %v2513_v55 = vmul.f32 -1.442695, %v1415_v46 }
 0xd33   :  { %v1422_v52 = vadd.f32 1.0, %v2785_v51  ;;  %v3351_v51 = vpop.f32.mrf.mxu2 }
 0xd34   :  { %2786 = vpow2.f32 %v2513_v55  ;;  %v1687_v55 = vpack.c.bf16 %v3351_v51, %v3351_v51 }
 0xd35   :  { %2788 = vrcp.f32 %v1422_v52  ;;  %v1435_v57 = vand.u32 2147483648, %v1422_v52  ;;  %v1433_v18 = vand.u32 2147483647, %v1422_v52  ;;  %vm1429_vm7 = vweird.f32 %v1422_v52 }
 0xd37   :  { %v1436_v16 = vor.u32 1.1754944e-38, %v1435_v57  ;;  %vm1434_vm3 = vcmp.eq.f32.partialorder %v1433_v18, 8.507059e+37 }
 0xd3a   :  { %v2787_v59 = vpop.eup %2786 }
 0xd3b   :  { %v2789_v34 = vpop.eup %2788  ;;  %v1423_v1 = vadd.f32 1.0, %v2787_v59 }
 0xd3c   :  { %v1425_v30 = vmul.f32 %v2789_v34, %v1422_v52  ;;  %vm1430_vm14 = vweird.f32 %v2789_v34 }
 0xd3d   :  { %2790 = vrcp.f32 %v1423_v1  ;;  %vm1431_vm15 = vmor %vm1429_vm7, %vm1430_vm14  ;;  %v1450_v27 = vand.u32 2147483648, %v1423_v1  ;;  %v1448_v35 = vand.u32 2147483647, %v1423_v1  ;;  %vm1444_vm4 = vweird.f32 %v1423_v1 }
 0xd3e   :  { %v1426_v54 = vsub.f32 1.0, %v1425_v30 }
 0xd3f   :  { %v1451_v31 = vor.u32 1.1754944e-38, %v1450_v27  ;;  %vm1449_vm12 = vcmp.eq.f32.partialorder %v1448_v35, 8.507059e+37  ;;  %v2724_v27 = vld [vmem:[#allocation2 + $0x70] sm:$0xff] }
 0xd40   :  { %v1427_v62 = vmul.f32 %v2789_v34, %v1426_v54 }
 0xd42   :  { %v1428_v58 = vadd.f32 %v2789_v34, %v1427_v62 }
 0xd43   :  { %v2791_v22 = vpop.eup %2790 }
 0xd44   :  { %v1432_v20 = vsel %vm1431_vm15, %v2789_v34, %v1428_v58  ;;  %v1440_v21 = vmul.f32 %v2791_v22, %v1423_v1  ;;  %vm1445_vm2 = vweird.f32 %v2791_v22 }
 0xd45   :  { %v1437_v23 = vsel %vm1434_vm3, %v1436_v16, %v1432_v20  ;;  %vm1446_vm11 = vmor %vm1444_vm4, %vm1445_vm2  ;;  %v2723_v16 = vld [vmem:[#allocation2 + $0x68] sm:$0xff]  ;;  %v2725_v20 = vld [vmem:[#allocation2 + $0x78] sm:$0xff]  ;;  %vm3476_vm3 = vcmask 1045504  }
 0xd46   :  { %1456 = vrot.lane.b32.xlu2 %v1437_v23, %s2848_s1  ;;  %v1441_v26 = vsub.f32 1.0, %v1440_v21  ;;  %1746 = vmatpush.bf16.msra.mxu1 %v2723_v16 }
 0xd47   :  { %1787 = vmatpush.bf16.msra.mxu3 %v2725_v20 }
 0xd48   :  { %v1442_v33 = vmul.f32 %v2791_v22, %v1441_v26  ;;  %v2722_v26 = vld [vmem:[#allocation2 + $0x60] sm:$0xff] }
 0xd4a   :  { %v1443_v36 = vadd.f32 %v2791_v22, %v1442_v33  ;;  %1747 = vmatpush.bf16.msra.mxu1 %v2722_v26 }
 0xd4b   :  { %1788 = vmatpush.bf16.msra.mxu3 %v2724_v27 }
 0xd4c   :  { %v1447_v37 = vsel %vm1446_vm11, %v2791_v22, %v1443_v36 }
 0xd4d   :  { %v1452_v39 = vsel %vm1449_vm12, %v1451_v31, %v1447_v37 }
 0xd4e   :  { %1458 = vrot.lane.b32.xlu2 %v1452_v39, %s2848_s1 }
 0xda0   :  { %v1457_v7 = vpop.permute.xlu2 %1456 }
 0xda1   :  { %v1462_v8 = vmul.f32 %v1457_v7, %v3318_v14 }
 0xda3   :  { %v1464_v9 = vadd.f32 %v1462_v8, %v3298_v47 }
 0xda5   :  { %v3338_v11 = vmul.f32 0.70710677, %v1464_v9 }
 0xda7   :  { %v1470_v15 = vrot.slane %v3338_v11, 7 }
 0xda8   :  { %v1459_v10 = vpop.permute.xlu2 %1458 }
 0xda9   :  { %v1463_v19 = vmul.f32 %v1459_v10, %v1415_v46  ;;  %v1475_v0 = vsel %vm189_vm9, 0.0, %v1470_v15 }
 0xdab   :  { %v1465_v12 = vadd.f32 %v1463_v19, %v3301_v28 }
 0xdad   :  { %v3341_v13 = vmul.f32 0.70710677, %v1465_v12 }
 0xdaf   :  { %v1471_v24 = vrot.slane %v3341_v13, 7 }
 0xdb1   :  { %v1472_v43 = vsel %vm189_vm9, %v1470_v15, %v1471_v24 }
 0xdb2   :  { %v1476_v14 = vsel %vm196_vm10, %v1472_v43, 0.0 }
 0xdb3   :  { %v1481_v42 = vpack.c.bf16 %v1476_v14, %v1475_v0 }
 0xdb5   :  { %2522 = vmatmul.msk.bf16.vlgmr.msra.gmra.mxu2 %vm169_vm8, %v1481_v42  ;;  %v1559_v47 = vrot.slane %v1481_v42, 1  ;;  %v1519_v44 = vshll.u32 %v1481_v42, 16  ;;  %v1517_v28 = vshrl.u32 %v1481_v42, 16 }
 0xdb7   :  { %2540 = vmatmul.msk.bf16.vlgmr.msrb.gmra.mxu3 %vm169_vm8, %v1559_v47  ;;  %v1521_v46 = vrot.slane %v1519_v44, 1 }
 0xdb9   :  { %v1522_v48 = vor.u32 %v1521_v46, %v1517_v28 }
 0xdbb   :  { %2531 = vmatmul.msk.bf16.vlgmr.msrb.gmra.mxu1 %vm169_vm8, %v1522_v48 }
 0xdc5   :  { %2568 = vmatmul.msk.bf16.vlgmr.msrb.gmra.mxu2 %vm169_vm8, %v1687_v55 }
 0xe38   :  { %v1506_v52 = vpop.f32.mrf.mxu2  ;;  %v1547_v59 = vpop.f32.mrf.mxu1 }
 0xe39   :  { %v1511_v34 = vadd.f32 %v1506_v52, %v3110_v50 }
 0xe3a   :  { %v1584_v1 = vpop.f32.mrf.mxu3 }
 0xe3b   :  { %v1552_v30 = vadd.f32 %v1547_v59, %v1511_v34  ;;  %v2719_v34 = vld [vmem:[%s3470_s3 + $0x18] sm:$0xff] }
 0xe3c   :  { %1669 = vmatpush.bf16.msra.mxu0 %v2719_v34 }
 0xe3d   :  { %v3357_v54 = vadd.f32 %v1584_v1, %v1552_v30  ;;  %v2718_v1 = vld [vmem:[%s3470_s3 + $0x10] sm:$0xff]  ;;  %v2727_v30 = vld [vmem:[#allocation2 + $0x88] sm:$0xff] }
 0xe3f   :  { %v2541_v57 = vmul.f32 -1.442695, %v3357_v54 }
 0xe40   :  { %v1508_v62 = vpop.f32.mrf.mxu2  ;;  %v1549_v58 = vpop.f32.mrf.mxu1  ;;  %1670 = vmatpush.bf16.msra.mxu0 %v2718_v1 }
 0xe41   :  { %2792 = vpow2.f32 %v2541_v57  ;;  %v1512_v18 = vadd.f32 %v1508_v62, %v3110_v50  ;;  %v2726_v57 = vld [vmem:[#allocation2 + $0x80] sm:$0xff] }
 0xe42   :  { %v1586_v21 = vpop.f32.mrf.mxu3 }
 0xe43   :  { %v1553_v22 = vadd.f32 %v1549_v58, %v1512_v18 }
 0xe44   :  { %1822 = vmatpush.bf16.msrb.mxu0 %v2727_v30 }
 0xe45   :  { %v3361_v23 = vadd.f32 %v1586_v21, %v1553_v22 }
 0xe47   :  { %v2793_v33 = vpop.eup %2792  ;;  %v2542_v35 = vmul.f32 -1.442695, %v3361_v23 }
 0xe48   :  { %v1597_v36 = vadd.f32 1.0, %v2793_v33  ;;  %v1712_v31 = vpop.f32.mrf.mxu2  ;;  %1823 = vmatpush.bf16.msrb.mxu0 %v2726_v57 }
 0xe49   :  { %2794 = vpow2.f32 %v2542_v35  ;;  %v3366_v50 = vadd.f32 %v1712_v31, %v594_v61 }
 0xe4a   :  { %2796 = vrcp.f32 %v1597_v36  ;;  %v1610_v9 = vand.u32 2147483648, %v1597_v36  ;;  %v1608_v19 = vand.u32 2147483647, %v1597_v36  ;;  %vm1604_vm10 = vweird.f32 %v1597_v36 }
 0xe4b   :  { %v1717_v37 = vrot.slane %v3366_v50, 6 }
 0xe4c   :  { %v1611_v43 = vor.u32 1.1754944e-38, %v1610_v9  ;;  %vm1609_vm5 = vcmp.eq.f32.partialorder %v1608_v19, 8.507059e+37 }
 0xe4d   :  { %v1719_v39 = vsel %vm91_vm0, 0.0, %v1717_v37 }
 0xe4e   :  { %v1724_v25 = vpack.c.bf16 %v1719_v39, %v1719_v39  ;;  %v3370_v53 = vpack.c.bf16 %v1717_v37, %v1719_v39 }
 0xe4f   :  { %v2795_v6 = vpop.eup %2794 }
 0xe50   :  { %v2797_v63 = vpop.eup %2796  ;;  %v1598_v29 = vadd.f32 1.0, %v2795_v6  ;;  %v1762_v56 = vshll.u32 %v3370_v53, 16  ;;  %v1714_v40 = vpop.f32.mrf.mxu2  ;;  %2577 = vmatmul.msk.bf16.vlgmr.msra.gmra.mxu1 %vm169_vm8, %v1724_v25  ;;  %v1760_v5 = vshrl.u32 %v3370_v53, 16  ;;  %v1800_v39 = vrot.slane %v3370_v53, 1  ;;  %v3401_v53 = vld [vmem:[%s3470_s3 + $0x38] sm:$0xff] }
 0xe51   :  { %v1600_v61 = vmul.f32 %v2797_v63, %v1597_v36  ;;  %vm1605_vm9 = vweird.f32 %v2797_v63  ;;  %1880 = vmatpush.bf16.msra.mxu2 %v3401_v53 }
 0xe52   :  { %2798 = vrcp.f32 %v1598_v29  ;;  %v1764_v8 = vrot.slane %v1762_v56, 1  ;;  %vm1606_vm1 = vmor %vm1604_vm10, %vm1605_vm9  ;;  %v1625_v44 = vand.u32 2147483648, %v1598_v29  ;;  %v1623_v46 = vand.u32 2147483647, %v1598_v29 }
 0xe53   :  { %v1601_v7 = vsub.f32 1.0, %v1600_v61  ;;  %vm1619_vm14 = vweird.f32 %v1598_v29 }
 0xe54   :  { %v1765_v12 = vor.u32 %v1764_v8, %v1760_v5  ;;  %v1626_v55 = vor.u32 1.1754944e-38, %v1625_v44  ;;  %vm1624_vm15 = vcmp.eq.f32.partialorder %v1623_v46, 8.507059e+37 }
 0xe55   :  { %v1602_v10 = vmul.f32 %v2797_v63, %v1601_v7 }
 0xe56   :  { %2586 = vmatmul.msk.bf16.vlgmr.msra.gmra.mxu3 %vm169_vm8, %v1765_v12 }
 0xe57   :  { %v1603_v15 = vadd.f32 %v2797_v63, %v1602_v10 }
 0xe58   :  { %v2799_v24 = vpop.eup %2798 }
 0xe59   :  { %v1607_v0 = vsel %vm1606_vm1, %v2797_v63, %v1603_v15  ;;  %v1615_v14 = vmul.f32 %v2799_v24, %v1598_v29  ;;  %vm1620_vm13 = vweird.f32 %v2799_v24 }
 0xe5a   :  { %v1612_v42 = vsel %vm1609_vm5, %v1611_v43, %v1607_v0  ;;  %vm1621_vm7 = vmor %vm1619_vm14, %vm1620_vm13 }
 0xe5b   :  { %1631 = vrot.lane.b32.xlu1 %v1612_v42, %s2848_s1  ;;  %v1616_v47 = vsub.f32 1.0, %v1615_v14 }
 0xe5d   :  { %v1617_v28 = vmul.f32 %v2799_v24, %v1616_v47 }
 0xe5f   :  { %v1618_v48 = vadd.f32 %v2799_v24, %v1617_v28  ;;  %v2732_v28 = vld [vmem:[#allocation2 + $0x90] sm:$0xff] }
 0xe61   :  { %v1622_v52 = vsel %vm1621_vm7, %v2799_v24, %v1618_v48 }
 0xe62   :  { %v1627_v59 = vsel %vm1624_vm15, %v1626_v55, %v1622_v52  ;;  %v2735_v52 = vld [vmem:[#allocation2 + $0xa8] sm:$0xff] }
 0xe63   :  { %1633 = vrot.lane.b32.xlu2 %v1627_v59, %s2848_s1  ;;  %v2734_v59 = vld [vmem:[#allocation2 + $0xa0] sm:$0xff] }
 0xebd   :  { %v1634_v62 = vpop.permute.xlu2 %1633 }
 0xebe   :  { %v1638_v18 = vmul.f32 %v1634_v62, %v3361_v23 }
 0xec0   :  { %v1640_v16 = vadd.f32 %v1638_v18, %v3341_v13 }
 0xec2   :  { %v1642_v26 = vmul.f32 0.70710677, %v1640_v16 }
 0xecd   :  { %v1632_v58 = vpop.permute.xlu1 %1631  ;;  %v1749_v22 = vpop.f32.mrf.mxu1 }
 0xece   :  { %v1637_v20 = vmul.f32 %v1632_v58, %v3357_v54  ;;  %v1753_v36 = vadd.f32 %v1749_v22, %v661_v49 }
 0xed0   :  { %v1639_v21 = vadd.f32 %v1637_v20, %v3338_v11 }
 0xed2   :  { %v1641_v27 = vmul.f32 0.70710677, %v1639_v21 }
 0xed4   :  { %v1647_v33 = vpack.c.bf16 %v1642_v26, %v1641_v27 }
 0xed5   :  { %v1751_v35 = vpop.f32.mrf.mxu1 }
 0xed6   :  { %2555 = vmatmul.msk.bf16.vlgmr.msra.gmra.mxu0 %vm169_vm8, %v1647_v33  ;;  %v2731_v35 = vld [vmem:[%s3470_s3 + $0x48] sm:$0xff] }
 0xed7   :  { %1980 = vmatpush.bf16.msra.mxu0 %v2731_v35 }
 0xed9   :  { %v1790_v31 = vpop.f32.mrf.mxu3 }
 0xeda   :  { %v1794_v37 = vadd.f32 %v1790_v31, %v1753_v36  ;;  %v2730_v36 = vld [vmem:[%s3470_s3 + $0x40] sm:$0xff] }
 0xedb   :  { %1981 = vmatpush.bf16.msra.mxu0 %v2730_v36 }
 0xee1   :  { %v1792_v23 = vpop.f32.mrf.mxu3 }
 0xee6   :  { %2595 = vmatmul.msk.bf16.vlgmr.msrb.gmra.mxu0 %vm169_vm8, %v1800_v39 }
 0xee7   :  { %2139 = vmatpush.bf16.msrb.mxu0 %v3401_v53 }
 0xf53   :  { %v1672_v13 = vpop.f32.mrf.mxu0 }
 0xf54   :  { %v1673_v54 = vadd.f32 %v1672_v13, %v3147_v32 }
 0xf56   :  { %v1677_v25 = vadd.f32 %v1673_v54, %v3280_v41 }
 0xf58   :  { %v1679_v38 = vmul.f32 0.70710677, %v1677_v25 }
 0xf5b   :  { %v1674_v11 = vpop.f32.mrf.mxu0 }
 0xf5c   :  { %v1675_v6 = vadd.f32 %v1674_v11, %v3147_v32  ;;  %v2728_v32 = vld [vmem:[%s3470_s3 + $0x30] sm:$0xff] }
 0xf5d   :  { %1881 = vmatpush.bf16.msra.mxu2 %v2728_v32  ;;  %2140 = vmatpush.bf16.msrb.mxu0 %v2728_v32 }
 0xf5e   :  { %v1678_v63 = vadd.f32 %v1675_v6, %v3282_v45  ;;  %v1681_v29 = vpack.c.bf16 %v1675_v6, %v1673_v54  ;;  %v2733_v45 = vld [vmem:[#allocation2 + $0x98] sm:$0xff] }
 0xf60   :  { %v1680_v49 = vmul.f32 0.70710677, %v1678_v63  ;;  %v1894_v56 = vsel %vm169_vm8, %v1681_v29, 0 }
 0xf61   :  { %1903 = vmatpush.bf16.xpose.msrb.mxu1 %v1894_v56  ;;  %2021 = vmatpush.bf16.msrb.mxu2 %v2733_v45 }
 0xf62   :  { %v1682_v40 = vpack.c.bf16 %v1680_v49, %v1679_v38 }
 0xf63   :  { %v1825_v61 = vpop.f32.mrf.mxu0 }
 0xf64   :  { %v1829_v5 = vadd.f32 %v1825_v61, %v1794_v37  ;;  %v1939_v41 = vsel %vm3476_vm3, %v1682_v40, 0  ;;  %v2737_v61 = vld [vmem:[#allocation2 + $0xb8] sm:$0xff] }
 0xf65   :  { %1948 = vmatpush.bf16.msrb.mxu3 %v1939_v41  ;;  %2022 = vmatpush.bf16.msrb.mxu2 %v2732_v28 }
 0xf66   :  { %v2596_v7 = vmul.f32 -1.442695, %v1829_v5 }
 0xf68   :  { %2800 = vpow2.f32 %v2596_v7 }
 0xf69   :  { %2062 = vmatpush.bf16.msra.mxu1 %v2735_v52  ;;  %2097 = vmatpush.bf16.msra.mxu3 %v2737_v61 }
 0xf6b   :  { %v1827_v8 = vpop.f32.mrf.mxu0 }
 0xf6d   :  { %2063 = vmatpush.bf16.msra.mxu1 %v2734_v59 }
 0xf6e   :  { %v2801_v9 = vpop.eup %2800 }
 0xf6f   :  { %v1833_v10 = vadd.f32 1.0, %v2801_v9 }
 0xf71   :  { %2802 = vrcp.f32 %v1833_v10  ;;  %v1845_v24 = vand.u32 2147483648, %v1833_v10  ;;  %v1843_v0 = vand.u32 2147483647, %v1833_v10  ;;  %vm1839_vm4 = vweird.f32 %v1833_v10 }
 0xf73   :  { %v1846_v42 = vor.u32 1.1754944e-38, %v1845_v24  ;;  %vm1844_vm12 = vcmp.eq.f32.partialorder %v1843_v0, 8.507059e+37 }
 0xf77   :  { %v2803_v19 = vpop.eup %2802 }
 0xf78   :  { %v1835_v12 = vmul.f32 %v2803_v19, %v1833_v10  ;;  %vm1840_vm2 = vweird.f32 %v2803_v19 }
 0xf79   :  { %vm1841_vm11 = vmor %vm1839_vm4, %vm1840_vm2 }
 0xf7a   :  { %v1836_v15 = vsub.f32 1.0, %v1835_v12 }
 0xf7c   :  { %v1837_v43 = vmul.f32 %v2803_v19, %v1836_v15 }
 0xf7e   :  { %v1838_v14 = vadd.f32 %v2803_v19, %v1837_v43 }
 0xf80   :  { %v1842_v47 = vsel %vm1841_vm11, %v2803_v19, %v1838_v14 }
 0xf81   :  { %v1847_v44 = vsel %vm1844_vm12, %v1846_v42, %v1842_v47 }
 0xf82   :  { %1850 = vrot.lane.b32.xlu0 %v1847_v44, %s2848_s1 }
 0xff4   :  { %v1851_v46 = vpop.permute.xlu0 %1850 }
 0xff5   :  { %v3409_v48 = vmul.f32 %v1851_v46, %v1829_v5  ;;  %v2736_v5 = vld [vmem:[#allocation2 + $0xb0] sm:$0xff] }
 0xff6   :  { %2098 = vmatpush.bf16.msra.mxu3 %v2736_v5 }
 0xff7   :  { %v1858_v55 = vpack.c.bf16 %v3409_v48, %v3409_v48 }
 0xff9   :  { %2609 = vmatmul.msk.bf16.vlgmr.msra.gmra.mxu2 %vm169_vm8, %v1858_v55 }
 0xffa   :  { %2159 = vmatpush.bf16.xpose.msra.mxu2 %v1894_v56 }
0x107c   :  { %v1883_v34 = vpop.f32.mrf.mxu2 }
0x107d   :  { %v1884_v1 = vadd.f32 %v1883_v34, %v3174_v60 }
0x107f   :  { %v1887_v30 = vadd.f32 %v1884_v1, %v3351_v51 }
0x1081   :  { %v1888_v57 = vmul.f32 0.70710677, %v1887_v30 }
0x1083   :  { %v1889_v62 = vpack.c.bf16 %v1888_v57, %v1888_v57 }
0x1084   :  { %v1885_v18 = vpop.f32.mrf.mxu2 }
0x1085   :  { %2610 = vmatmul.msk.bf16.vlgmr.msrb.gmra.mxu1 %vm169_vm8, %v1889_v62 }
0x1086   :  { %2201 = vmatpush.bf16.msrb.mxu1 %v1939_v41 }
0x1102   :  { %v1905_v58 = vpop.f32.mrf.mxu1 }
0x1103   :  { %v1909_v22 = vsel %vm822_vm6, %v1905_v58, -inf }
0x1104   :  { %1910 = vmax.xlane.f32.xlu1 %v1909_v22 }
0x110a   :  { %v1907_v16 = vpop.f32.mrf.mxu1 }
0x1177   :  { %v1911_v20 = vpop.xlane.xlu1 %1910 }
0x1178   :  { %v1912_v21 = vsub.f32 %v1905_v58, %v1911_v20 }
0x117a   :  { %v1913_v26 = vmul.f32 1.442695, %v1912_v21 }
0x117c   :  { %2804 = vpow2.f32 %v1913_v26 }
0x1182   :  { %v2805_v27 = vpop.eup %2804 }
0x1183   :  { %v1915_v33 = vsel %vm822_vm6, %v2805_v27, 0.0 }
0x1184   :  { %1916 = vadd.xlane.f32.xlu2 %v1915_v33 }
0x11f7   :  { %v1917_v31 = vpop.xlane.xlu2 %1916 }
0x11f8   :  { %2806 = vrcp.f32 %v1917_v31  ;;  %v1929_v13 = vand.u32 2147483648, %v1917_v31  ;;  %v1927_v11 = vand.u32 2147483647, %v1917_v31  ;;  %vm1923_vm10 = vweird.f32 %v1917_v31 }
0x11fa   :  { %v1930_v6 = vor.u32 1.1754944e-38, %v1929_v13  ;;  %vm1928_vm5 = vcmp.eq.f32.partialorder %v1927_v11, 8.507059e+37 }
0x11fe   :  { %v2807_v37 = vpop.eup %2806 }
0x11ff   :  { %v1919_v23 = vmul.f32 %v2807_v37, %v1917_v31  ;;  %vm1924_vm9 = vweird.f32 %v2807_v37 }
0x1200   :  { %vm1925_vm1 = vmor %vm1923_vm10, %vm1924_vm9 }
0x1201   :  { %v1920_v39 = vsub.f32 1.0, %v1919_v23 }
0x1203   :  { %v1921_v54 = vmul.f32 %v2807_v37, %v1920_v39 }
0x1205   :  { %v1922_v25 = vadd.f32 %v2807_v37, %v1921_v54 }
0x1207   :  { %v1926_v63 = vsel %vm1925_vm1, %v2807_v37, %v1922_v25 }
0x1208   :  { %v1931_v29 = vsel %vm1928_vm5, %v1930_v6, %v1926_v63 }
0x1209   :  { %v1933_v38 = vmul.f32 %v2805_v27, %v1931_v29 }
0x120b   :  { %v1934_v49 = vpack.c.bf16 %v1933_v38, %v1933_v38 }
0x120d   :  { %2611 = vmatmul.msk.bf16.vlgmr.msrb.gmra.mxu3 %vm822_vm6, %v1934_v49 }
0x120e   :  { %2217 = vmatpush.bf16.msrb.mxu3 %v2731_v35 }
0x1212   :  { %2218 = vmatpush.bf16.msrb.mxu3 %v2730_v36 }
0x1290   :  { %v1950_v56 = vpop.f32.mrf.mxu3 }
0x1291   :  { %v1958_v40 = vpack.c.bf16 %v1950_v56, %v1950_v56 }
0x1293   :  { %2624 = vmatmul.msk.bf16.vlgmr.msra.gmra.mxu0 %vm169_vm8, %v1958_v40 }
0x1298   :  { %v1952_v53 = vpop.f32.mrf.mxu3 }
0x1310   :  { %v1983_v41 = vpop.f32.mrf.mxu0 }
0x1311   :  { %v1984_v32 = vadd.f32 %v1983_v41, %v3192_v17 }
0x1313   :  { %v1987_v45 = vadd.f32 %v1984_v32, %v3409_v48 }
0x1315   :  { %v1988_v7 = vmul.f32 0.70710677, %v1987_v45 }
0x1317   :  { %v1989_v8 = vadd.f32 %v1988_v7, %v3366_v50 }
0x1318   :  { %v1985_v9 = vpop.f32.mrf.mxu0 }
0x1319   :  { %v3431_v10 = vmul.f32 0.70710677, %v1989_v8 }
0x131b   :  { %v1992_v19 = vrot.slane %v3431_v10, 6 }
0x131d   :  { %v1994_v12 = vsel %vm91_vm0, 0.0, %v1992_v19 }
0x131e   :  { %v1999_v15 = vpack.c.bf16 %v1994_v12, %v1994_v12  ;;  %v2033_v24 = vpack.c.bf16 %v1992_v19, %v1994_v12 }
0x1320   :  { %v2037_v43 = vshll.u32 %v2033_v24, 16  ;;  %v2075_v0 = vrot.slane %v2033_v24, 1  ;;  %2633 = vmatmul.msk.bf16.vlgmr.msrb.gmra.mxu2 %vm169_vm8, %v1999_v15  ;;  %v2035_v14 = vshrl.u32 %v2033_v24, 16  ;;  %v2739_v15 = vld [vmem:[%s3472_s5 + $0x8] sm:$0xff] }
0x1321   :  { %2254 = vmatpush.bf16.msra.mxu0 %v2739_v15 }
0x1322   :  { %2651 = vmatmul.msk.bf16.vlgmr.msra.gmra.mxu3 %vm169_vm8, %v2075_v0  ;;  %v2039_v42 = vrot.slane %v2037_v43, 1 }
0x1324   :  { %v2040_v47 = vor.u32 %v2039_v42, %v2035_v14  ;;  %v2738_v14 = vld [vmem:[%s3472_s5] sm:$0xff] }
0x1325   :  { %2255 = vmatpush.bf16.msra.mxu0 %v2738_v14 }
0x1326   :  { %2642 = vmatmul.msk.bf16.vlgmr.msra.gmra.mxu1 %vm169_vm8, %v2040_v47 }
0x13a3   :  { %v2024_v50 = vpop.f32.mrf.mxu2  ;;  %v2065_v44 = vpop.f32.mrf.mxu1 }
0x13a4   :  { %v2028_v28 = vadd.f32 %v2024_v50, %v946_v4 }
0x13a5   :  { %v2100_v46 = vpop.f32.mrf.mxu3 }
0x13a6   :  { %v2069_v48 = vadd.f32 %v2065_v44, %v2028_v28 }
0x13a8   :  { %v2104_v55 = vadd.f32 %v2100_v46, %v2069_v48 }
0x13aa   :  { %v2652_v52 = vmul.f32 -1.442695, %v2104_v55 }
0x13ab   :  { %v2026_v59 = vpop.f32.mrf.mxu2  ;;  %v2067_v34 = vpop.f32.mrf.mxu1 }
0x13ac   :  { %2808 = vpow2.f32 %v2652_v52 }
0x13ad   :  { %v2102_v1 = vpop.f32.mrf.mxu3 }
0x13b2   :  { %v2809_v30 = vpop.eup %2808 }
0x13b3   :  { %v2108_v57 = vadd.f32 1.0, %v2809_v30 }
0x13b5   :  { %2810 = vrcp.f32 %v2108_v57  ;;  %v2120_v22 = vand.u32 2147483648, %v2108_v57  ;;  %v2118_v20 = vand.u32 2147483647, %v2108_v57  ;;  %vm2114_vm13 = vweird.f32 %v2108_v57 }
0x13b7   :  { %v2121_v4 = vor.u32 1.1754944e-38, %v2120_v22  ;;  %vm2119_vm7 = vcmp.eq.f32.partialorder %v2118_v20, 8.507059e+37 }
0x13bb   :  { %v2811_v62 = vpop.eup %2810 }
0x13bc   :  { %v2110_v18 = vmul.f32 %v2811_v62, %v2108_v57  ;;  %vm2115_vm0 = vweird.f32 %v2811_v62 }
0x13bd   :  { %vm2116_vm14 = vmor %vm2114_vm13, %vm2115_vm0 }
0x13be   :  { %v2111_v58 = vsub.f32 1.0, %v2110_v18 }
0x13c0   :  { %v2112_v16 = vmul.f32 %v2811_v62, %v2111_v58 }
0x13c2   :  { %v2113_v21 = vadd.f32 %v2811_v62, %v2112_v16 }
0x13c4   :  { %v2117_v26 = vsel %vm2116_vm14, %v2811_v62, %v2113_v21 }
0x13c5   :  { %v2122_v27 = vsel %vm2119_vm7, %v2121_v4, %v2117_v26 }
0x13c6   :  { %2125 = vrot.lane.b32.xlu0 %v2122_v27, %s2848_s1 }
0x1438   :  { %v2126_v33 = vpop.permute.xlu0 %2125 }
0x1439   :  { %v2128_v35 = vmul.f32 %v2126_v33, %v2104_v55 }
0x143b   :  { %v2129_v36 = vpack.c.bf16 %v2128_v35, %v2128_v35 }
0x143d   :  { %2653 = vmatmul.msk.bf16.vlgmr.msrb.gmra.mxu0 %vm169_vm8, %v2129_v36 }
0x14ba   :  { %v2142_v31 = vpop.f32.mrf.mxu0 }
0x14bb   :  { %v2143_v37 = vadd.f32 %v2142_v31, %v3174_v60 }
0x14bd   :  { %v2146_v23 = vadd.f32 %v2143_v37, %v3351_v51 }
0x14bf   :  { %v2147_v39 = vmul.f32 0.70710677, %v2146_v23 }
0x14c1   :  { %v2148_v13 = vpack.c.bf16 %v2147_v39, %v2147_v39 }
0x14c2   :  { %v2144_v54 = vpop.f32.mrf.mxu0 }
0x14c3   :  { %2654 = vmatmul.msk.bf16.vlgmr.msra.gmra.mxu2 %vm169_vm8, %v2148_v13 }
0x1546   :  { %v2161_v11 = vpop.f32.mrf.mxu2 }
0x1547   :  { %v2165_v25 = vsel %vm822_vm6, %v2161_v11, -inf }
0x1548   :  { %2166 = vmax.xlane.f32.xlu0 %v2165_v25 }
0x154e   :  { %v2163_v6 = vpop.f32.mrf.mxu2 }
0x15bb   :  { %v2167_v63 = vpop.xlane.xlu0 %2166 }
0x15bc   :  { %v2168_v29 = vsub.f32 %v2161_v11, %v2167_v63 }
0x15be   :  { %v2169_v38 = vmul.f32 1.442695, %v2168_v29 }
0x15c0   :  { %2812 = vpow2.f32 %v2169_v38 }
0x15c6   :  { %v2813_v49 = vpop.eup %2812 }
0x15c7   :  { %v2171_v56 = vsel %vm822_vm6, %v2813_v49, 0.0 }
0x15c8   :  { %2172 = vadd.xlane.f32.xlu1 %v2171_v56 }
0x163b   :  { %v2173_v60 = vpop.xlane.xlu1 %2172 }
0x163c   :  { %2814 = vrcp.f32 %v2173_v60  ;;  %v2185_v61 = vand.u32 2147483648, %v2173_v60  ;;  %v2183_v41 = vand.u32 2147483647, %v2173_v60  ;;  %vm2179_vm3 = vweird.f32 %v2173_v60 }
0x163e   :  { %v2186_v45 = vor.u32 1.1754944e-38, %v2185_v61  ;;  %vm2184_vm4 = vcmp.eq.f32.partialorder %v2183_v41, 8.507059e+37 }
0x1642   :  { %v2815_v51 = vpop.eup %2814 }
0x1643   :  { %v2175_v40 = vmul.f32 %v2815_v51, %v2173_v60  ;;  %vm2180_vm15 = vweird.f32 %v2815_v51 }
0x1644   :  { %vm2181_vm2 = vmor %vm2179_vm3, %vm2180_vm15 }
0x1645   :  { %v2176_v53 = vsub.f32 1.0, %v2175_v40 }
0x1647   :  { %v2177_v5 = vmul.f32 %v2815_v51, %v2176_v53 }
0x1649   :  { %v2178_v32 = vadd.f32 %v2815_v51, %v2177_v5 }
0x164b   :  { %v2182_v7 = vsel %vm2181_vm2, %v2815_v51, %v2178_v32 }
0x164c   :  { %v2187_v8 = vsel %vm2184_vm4, %v2186_v45, %v2182_v7 }
0x164d   :  { %v2189_v9 = vmul.f32 %v2813_v49, %v2187_v8 }
0x164f   :  { %v2190_v19 = vpack.c.bf16 %v2189_v9, %v2189_v9  ;;  %v2261_v12 = vsel %vm822_vm6, %v2189_v9, 0.0 }
0x1650   :  { %2667 = vst [vmem:[%s3474_s7 + $0x18] sm:$0xff] %v2261_v12 }
0x1651   :  { %2655 = vmatmul.msk.bf16.vlgmr.msrb.gmra.mxu1 %vm822_vm6, %v2190_v19 }
0x16ce   :  { %v2203_v24 = vpop.f32.mrf.mxu1 }
0x16cf   :  { %v2207_v43 = vpack.c.bf16 %v2203_v24, %v2203_v24 }
0x16d1   :  { %2656 = vmatmul.msk.bf16.vlgmr.msrb.gmra.mxu3 %vm169_vm8, %v2207_v43 }
0x16d6   :  { %v2205_v0 = vpop.f32.mrf.mxu1 }
0x1754   :  { %v2220_v42 = vpop.f32.mrf.mxu3 }
0x1755   :  { %v2221_v47 = vadd.f32 %v2220_v42, %v3192_v17 }
0x1757   :  { %v2224_v50 = vadd.f32 %v2221_v47, %v2128_v35 }
0x1759   :  { %v2225_v44 = vmul.f32 0.70710677, %v2224_v50 }
0x175b   :  { %v2226_v28 = vadd.f32 %v2225_v44, %v3431_v10 }
0x175c   :  { %v2222_v46 = vpop.f32.mrf.mxu3 }
0x175d   :  { %v2227_v48 = vmul.f32 0.70710677, %v2226_v28 }
0x175f   :  { %v2232_v55 = vpack.c.bf16 %v2227_v48, %v2227_v48 }
0x1761   :  { %2665 = vmatmul.msk.bf16.vlgmr.msra.gmra.mxu0 %vm169_vm8, %v2232_v55 }
0x17de   :  { %v2257_v52 = vpop.f32.mrf.mxu0 }
0x17df   :  { %v2258_v59 = vadd.f32 %v2257_v52, %v1154_v2 }
0x17e1   :  { %2666 = vst [vmem:[%s3474_s7 + $0x10] sm:$0xff] %v2258_v59 }
0x17e6   :  { %v2259_v34 = vpop.f32.mrf.mxu0 }
0x17e7   :  { %2269 = vsyncpa [#allocation3], 1 }

</bundles_post_ra>
